<compile_context>
chip_gen: v7x
topology: tpu7x:2x2x1
jax: 0.10.0
libtpu: 0.0.40
codegen_flags: <defaults>
</compile_context>

<pallas_src>
import jax
import jax.numpy as jnp
import numpy as np
from jax.experimental import pallas as pl
from jax.experimental.pallas import tpu as pltpu

STATE_SIZE = 33
ACTION_SIZE = 4
N_FILT = (8, 16, 32)
KERNEL_SIZE = (9, 5, 3)
STRIDE = (2, 2, 1)
FC_UNITS = (128, 64, 32)
EPS = 1e-5
LANES = 128
STAT_PREC = jax.lax.Precision.HIGHEST   # only for the tiny (1,128) BN-stat dots
REF_PREC = jax.lax.Precision.HIGHEST    # pure-JAX reference (ground truth)


def conv_out_size(in_size, ks, strd):
    return (in_size - ks + strd) // strd


# Conv output lengths: 33 -> 13 -> 5 -> 3 ; flat_size = 32 * 3 = 96
L_SIZES = [STATE_SIZE]
for _ks, _s in zip(KERNEL_SIZE, STRIDE):
    L_SIZES.append(conv_out_size(L_SIZES[-1], _ks, _s))
FLAT_SIZE = N_FILT[-1] * L_SIZES[-1]

N_CONV = len(N_FILT)
N_FC = len(FC_UNITS)
N_W = 2 * N_CONV + N_FC + 1              # 3 Toeplitz + 3 G + 3 fc + 1 out = 10
N_V = 3 * (N_CONV + N_FC) + 1            # 19 bias/gamma/beta rows
N_V_PAD = ((N_V + 7) // 8) * 8           # pad rows to a multiple of 8 sublanes


# ----------------------------------------------------------------------------
# Pallas kernel: whole forward pass as 10 lane-dense matmuls + BN in VMEM.
# ----------------------------------------------------------------------------
def actor_kernel(state_ref, w_ref, v_ref, out_ref):
    B = state_ref.shape[0]
    relu = lambda t: jnp.maximum(t, 0.0)

    def wmat(i):                                       # (128,128) weight i (aligned static slice)
        return w_ref[i * LANES:(i + 1) * LANES, :]

    def vrow(i):                                       # (1,128) bias/gamma/beta row i
        return v_ref[i:i + 1, :]

    def mm(a, i):                                      # layer matmul, default MXU precision
        return jnp.dot(a, wmat(i), preferred_element_type=jnp.float32)

    def bn(h, g_idx, gamma, beta):
        # BatchNorm1d, training mode: biased stats over batch (and positions for convs).
        m = jnp.mean(h, axis=0, keepdims=True)                 # (1,128)
        e2 = jnp.mean(h * h, axis=0, keepdims=True)            # single-pass variance
        if g_idx is not None:                                  # conv: pool stats per channel
            g = wmat(g_idx)
            m = jnp.dot(m, g, precision=STAT_PREC, preferred_element_type=jnp.float32)
            e2 = jnp.dot(e2, g, precision=STAT_PREC, preferred_element_type=jnp.float32)
        var = jnp.maximum(e2 - m * m, 0.0)
        return gamma * (h - m) * jax.lax.rsqrt(var + EPS) + beta

    # state (B,33) -> lane-dense (B,128); padded lanes stay exactly 0 through the net.
    x = state_ref[...]
    h = jnp.concatenate([x, jnp.zeros((B, LANES - STATE_SIZE), jnp.float32)], axis=1)

    # conv blocks:  h = relu(bn(relu(conv(h))))
    for i in range(N_CONV):
        z = relu(mm(h, 2 * i) + vrow(3 * i))
        h = relu(bn(z, 2 * i + 1, vrow(3 * i + 1), vrow(3 * i + 2)))

    # View((-1, 96)) is the identity in this channel-major layout; its relu is a no-op.
    # fc blocks:  h = relu(bn(relu(fc(h))))
    for j in range(N_FC):
        z = relu(mm(h, 2 * N_CONV + j) + vrow(3 * (N_CONV + j)))
        h = relu(bn(z, None, vrow(3 * (N_CONV + j) + 1), vrow(3 * (N_CONV + j) + 2)))

    # output layer + tanh; lane-dense store, the wrapper slices the 4 valid lanes.
    out_ref[...] = jnp.tanh(mm(h, 2 * N_CONV + N_FC) + vrow(3 * (N_CONV + N_FC)))


def actor_forward(state, w_slab, v_slab):
    B = state.shape[0]
    out = pl.pallas_call(
        actor_kernel,
        out_shape=jax.ShapeDtypeStruct((B, LANES), jnp.float32),
        in_specs=[pl.BlockSpec(memory_space=pltpu.MemorySpace.VMEM)] * 3,
        out_specs=pl.BlockSpec(memory_space=pltpu.MemorySpace.VMEM),
        compiler_params=pltpu.CompilerParams(vmem_limit_bytes=16 * 1024 * 1024),
    )(state, w_slab, v_slab)
    return out[:, :ACTION_SIZE]


# ----------------------------------------------------------------------------
# Deterministic parameter init: pack everything into two 128-lane slabs.
# `raw` keeps the torch-layout weights for the pure-JAX reference.
# ----------------------------------------------------------------------------
def make_params(key):
    keys = iter(jax.random.split(key, 32))

    def normal(shape, scale):
        return (scale * np.asarray(jax.random.normal(next(keys), shape, jnp.float32))
                ).astype(np.float32)

    w_slab = np.zeros((N_W * LANES, LANES), np.float32)
    v_slab = np.zeros((N_V_PAD, LANES), np.float32)
    raw = {}

    cin, lin = 1, STATE_SIZE
    for i, (cout, ks, s) in enumerate(zip(N_FILT, KERNEL_SIZE, STRIDE)):
        lout = conv_out_size(lin, ks, s)
        w = normal((cout, cin, ks), 1.0 / np.sqrt(cin * ks))
        b = normal((cout,), 0.1)
        gamma = (1.0 + normal((cout,), 0.1)).astype(np.float32)
        beta = normal((cout,), 0.1)
        raw[f"conv{i}"] = (w, b, gamma, beta, s)

        # Toeplitz-unrolled conv:  (B, cin*lin) @ T -> (B, cout*lout), col = co*lout + lo
        T = np.zeros((LANES, LANES), np.float32)
        for co in range(cout):
            for lo in range(lout):
                for ci in range(cin):
                    r0 = ci * lin + lo * s
                    T[r0:r0 + ks, co * lout + lo] = w[co, ci, :]
        w_slab[(2 * i) * LANES:(2 * i + 1) * LANES, :] = T

        # block-diagonal averaging matrix: pools column stats over positions per channel
        G = np.zeros((LANES, LANES), np.float32)
        for co in range(cout):
            G[co * lout:(co + 1) * lout, co * lout:(co + 1) * lout] = 1.0 / lout
        w_slab[(2 * i + 1) * LANES:(2 * i + 2) * LANES, :] = G

        v_slab[3 * i + 0, :cout * lout] = np.repeat(b, lout)
        v_slab[3 * i + 1, :cout * lout] = np.repeat(gamma, lout)
        v_slab[3 * i + 2, :cout * lout] = np.repeat(beta, lout)
        cin, lin = cout, lout

    fin = FLAT_SIZE
    for j, fout in enumerate(FC_UNITS):
        w = normal((fout, fin), 1.0 / np.sqrt(fin))
        b = normal((fout,), 0.1)
        gamma = (1.0 + normal((fout,), 0.1)).astype(np.float32)
        beta = normal((fout,), 0.1)
        raw[f"fc{j}"] = (w, b, gamma, beta)
        widx = 2 * N_CONV + j
        w_slab[widx * LANES:widx * LANES + fin, :fout] = w.T
        v_slab[3 * (N_CONV + j) + 0, :fout] = b
        v_slab[3 * (N_CONV + j) + 1, :fout] = gamma
        v_slab[3 * (N_CONV + j) + 2, :fout] = beta
        fin = fout

    w = normal((ACTION_SIZE, fin), 1.0 / np.sqrt(fin))
    b = normal((ACTION_SIZE,), 0.1)
    raw["out"] = (w, b)
    widx = 2 * N_CONV + N_FC
    w_slab[widx * LANES:widx * LANES + fin, :ACTION_SIZE] = w.T
    v_slab[3 * (N_CONV + N_FC), :ACTION_SIZE] = b

    return jnp.asarray(w_slab), jnp.asarray(v_slab), raw


# ----------------------------------------------------------------------------
# Pure-JAX reference (mirrors the PyTorch forward in NCL layout, full f32).
# ----------------------------------------------------------------------------
def reference_forward(state, raw):
    relu = lambda t: jnp.maximum(t, 0.0)

    def bn(h, axes, gamma, beta, shape):
        m = jnp.mean(h, axis=axes, keepdims=True)
        v = jnp.mean((h - m) ** 2, axis=axes, keepdims=True)
        return (jnp.asarray(gamma).reshape(shape) * (h - m) * jax.lax.rsqrt(v + EPS)
                + jnp.asarray(beta).reshape(shape))

    def conv1d(x, w, b, s):
        ks = w.shape[-1]
        Lo = conv_out_size(x.shape[-1], ks, s)
        cols = [jnp.einsum("bck,ock->bo", x[:, :, l * s:l * s + ks], jnp.asarray(w),
                           precision=REF_PREC) for l in range(Lo)]
        return jnp.stack(cols, axis=-1) + jnp.asarray(b)[None, :, None]

    x = state[:, None, :]                                  # (B, 1, 33)
    for i in range(N_CONV):
        w, b, gamma, beta, s = raw[f"conv{i}"]
        x = relu(conv1d(x, w, b, s))
        x = relu(bn(x, (0, 2), gamma, beta, (1, -1, 1)))
    v = x.reshape(state.shape[0], -1)                      # torch .view(-1, flat_size)
    for j in range(N_FC):
        w, b, gamma, beta = raw[f"fc{j}"]
        v = relu(jnp.dot(v, jnp.asarray(w).T, precision=REF_PREC) + jnp.asarray(b))
        v = relu(bn(v, (0,), gamma, beta, (1, -1)))
    w, b = raw["out"]
    return jnp.tanh(jnp.dot(v, jnp.asarray(w).T, precision=REF_PREC) + jnp.asarray(b))


if __name__ == "__main__":
    B = 8
    key = jax.random.PRNGKey(0)
    k_state, k_params = jax.random.split(key)
    state = jax.random.normal(k_state, (B, STATE_SIZE), jnp.float32)
    w_slab, v_slab, raw = make_params(k_params)

    out = actor_forward(state, w_slab, v_slab)
    out = jax.block_until_ready(out)

    assert out.shape == (B, ACTION_SIZE)
    assert bool(jnp.all(jnp.isfinite(out)))
    ref = reference_forward(state, raw)
    # Kernel layer matmuls run at default (single-pass bf16) MXU precision per the
    # perf review; the reference is full-f32 HIGHEST, hence the relaxed tolerance.
    assert bool(jnp.allclose(out, ref, atol=2.5e-2, rtol=2.5e-2)), (out, ref)
    print("KERNEL_OK")
</pallas_src>

<mosaic_0001>
module attributes {stable_mosaic.version = 11 : i64} {
  func.func @actor_kernel(%arg0: memref<8x33xf32, #tpu.memory_space<vmem>>, %arg1: memref<1280x128xf32, #tpu.memory_space<vmem>>, %arg2: memref<24x128xf32, #tpu.memory_space<vmem>>, %arg3: memref<8x128xf32, #tpu.memory_space<vmem>>) attributes {dimension_semantics = [], scalar_prefetch = 0 : i64, scratch_operands = 0 : i64, tpu.core_type = #tpu.core_type<tc>} {
    %c0 = arith.constant 0 : index
    %c0_0 = arith.constant 0 : index
    %0 = vector.load %arg0[%c0, %c0_0] : memref<8x33xf32, #tpu.memory_space<vmem>>, vector<8x33xf32>
    %cst = arith.constant 0.000000e+00 : f32
    %1 = vector.broadcast %cst : f32 to vector<8x95xf32>
    %2 = tpu.concatenate %0, %1 in 1 : vector<8x33xf32>, vector<8x95xf32> -> vector<8x128xf32>
    %c0_1 = arith.constant 0 : index
    %c0_2 = arith.constant 0 : index
    %3 = vector.load %arg1[%c0_1, %c0_2] : memref<1280x128xf32, #tpu.memory_space<vmem>>, vector<128x128xf32>
    %cst_3 = arith.constant dense<0.000000e+00> : vector<8x128xf32>
    %4 = tpu.matmul %2, %3, %cst_3 {dimension_numbers = #tpu.dot_dimension_numbers<[1], [0], [0], [1], [0, 0, 1, 1], [], []>} : vector<8x128xf32>, vector<128x128xf32>, vector<8x128xf32> -> vector<8x128xf32>
    %c0_4 = arith.constant 0 : index
    %c0_5 = arith.constant 0 : index
    %5 = vector.load %arg2[%c0_4, %c0_5] : memref<24x128xf32, #tpu.memory_space<vmem>>, vector<1x128xf32>
    %6 = vector.broadcast %5 : vector<1x128xf32> to vector<8x128xf32>
    %7 = arith.addf %4, %6 : vector<8x128xf32>
    %cst_6 = arith.constant 0.000000e+00 : f32
    %8 = vector.broadcast %cst_6 : f32 to vector<8x128xf32>
    %9 = arith.maximumf %7, %8 : vector<8x128xf32>
    %c1 = arith.constant 1 : index
    %c0_7 = arith.constant 0 : index
    %10 = vector.load %arg2[%c1, %c0_7] : memref<24x128xf32, #tpu.memory_space<vmem>>, vector<1x128xf32>
    %c2 = arith.constant 2 : index
    %c0_8 = arith.constant 0 : index
    %11 = vector.load %arg2[%c2, %c0_8] : memref<24x128xf32, #tpu.memory_space<vmem>>, vector<1x128xf32>
    %cst_9 = arith.constant dense<0.000000e+00> : vector<128xf32>
    %12 = vector.multi_reduction <add>, %9, %cst_9 [0] : vector<8x128xf32> to vector<128xf32>
    %13 = vector.shape_cast %12 : vector<128xf32> to vector<1x128xf32>
    %cst_10 = arith.constant 8.000000e+00 : f32
    %14 = vector.broadcast %cst_10 : f32 to vector<1x128xf32>
    %15 = arith.divf %13, %14 : vector<1x128xf32>
    %16 = arith.mulf %9, %9 : vector<8x128xf32>
    %cst_11 = arith.constant dense<0.000000e+00> : vector<128xf32>
    %17 = vector.multi_reduction <add>, %16, %cst_11 [0] : vector<8x128xf32> to vector<128xf32>
    %18 = vector.shape_cast %17 : vector<128xf32> to vector<1x128xf32>
    %cst_12 = arith.constant 8.000000e+00 : f32
    %19 = vector.broadcast %cst_12 : f32 to vector<1x128xf32>
    %20 = arith.divf %18, %19 : vector<1x128xf32>
    %c128 = arith.constant 128 : index
    %c0_13 = arith.constant 0 : index
    %21 = vector.load %arg1[%c128, %c0_13] : memref<1280x128xf32, #tpu.memory_space<vmem>>, vector<128x128xf32>
    %cst_14 = arith.constant dense<0.000000e+00> : vector<1x128xf32>
    %22 = tpu.matmul %15, %21, %cst_14 {dimension_numbers = #tpu.dot_dimension_numbers<[1], [0], [0], [1], [0, 0, 1, 1], [], []>, precision = #tpu.contract_precision<fp32>} : vector<1x128xf32>, vector<128x128xf32>, vector<1x128xf32> -> vector<1x128xf32>
    %cst_15 = arith.constant dense<0.000000e+00> : vector<1x128xf32>
    %23 = tpu.matmul %20, %21, %cst_15 {dimension_numbers = #tpu.dot_dimension_numbers<[1], [0], [0], [1], [0, 0, 1, 1], [], []>, precision = #tpu.contract_precision<fp32>} : vector<1x128xf32>, vector<128x128xf32>, vector<1x128xf32> -> vector<1x128xf32>
    %24 = arith.mulf %22, %22 : vector<1x128xf32>
    %25 = arith.subf %23, %24 : vector<1x128xf32>
    %cst_16 = arith.constant 0.000000e+00 : f32
    %26 = vector.broadcast %cst_16 : f32 to vector<1x128xf32>
    %27 = arith.maximumf %25, %26 : vector<1x128xf32>
    %28 = vector.broadcast %22 : vector<1x128xf32> to vector<8x128xf32>
    %29 = arith.subf %9, %28 : vector<8x128xf32>
    %30 = vector.broadcast %10 : vector<1x128xf32> to vector<8x128xf32>
    %31 = arith.mulf %30, %29 : vector<8x128xf32>
    %cst_17 = arith.constant 9.99999974E-6 : f32
    %32 = vector.broadcast %cst_17 : f32 to vector<1x128xf32>
    %33 = arith.addf %27, %32 : vector<1x128xf32>
    %34 = math.rsqrt %33 : vector<1x128xf32>
    %35 = vector.broadcast %34 : vector<1x128xf32> to vector<8x128xf32>
    %36 = arith.mulf %31, %35 : vector<8x128xf32>
    %37 = vector.broadcast %11 : vector<1x128xf32> to vector<8x128xf32>
    %38 = arith.addf %36, %37 : vector<8x128xf32>
    %cst_18 = arith.constant 0.000000e+00 : f32
    %39 = vector.broadcast %cst_18 : f32 to vector<8x128xf32>
    %40 = arith.maximumf %38, %39 : vector<8x128xf32>
    %c256 = arith.constant 256 : index
    %c0_19 = arith.constant 0 : index
    %41 = vector.load %arg1[%c256, %c0_19] : memref<1280x128xf32, #tpu.memory_space<vmem>>, vector<128x128xf32>
    %cst_20 = arith.constant dense<0.000000e+00> : vector<8x128xf32>
    %42 = tpu.matmul %40, %41, %cst_20 {dimension_numbers = #tpu.dot_dimension_numbers<[1], [0], [0], [1], [0, 0, 1, 1], [], []>} : vector<8x128xf32>, vector<128x128xf32>, vector<8x128xf32> -> vector<8x128xf32>
    %c3 = arith.constant 3 : index
    %c0_21 = arith.constant 0 : index
    %43 = vector.load %arg2[%c3, %c0_21] : memref<24x128xf32, #tpu.memory_space<vmem>>, vector<1x128xf32>
    %44 = vector.broadcast %43 : vector<1x128xf32> to vector<8x128xf32>
    %45 = arith.addf %42, %44 : vector<8x128xf32>
    %cst_22 = arith.constant 0.000000e+00 : f32
    %46 = vector.broadcast %cst_22 : f32 to vector<8x128xf32>
    %47 = arith.maximumf %45, %46 : vector<8x128xf32>
    %c4 = arith.constant 4 : index
    %c0_23 = arith.constant 0 : index
    %48 = vector.load %arg2[%c4, %c0_23] : memref<24x128xf32, #tpu.memory_space<vmem>>, vector<1x128xf32>
    %c5 = arith.constant 5 : index
    %c0_24 = arith.constant 0 : index
    %49 = vector.load %arg2[%c5, %c0_24] : memref<24x128xf32, #tpu.memory_space<vmem>>, vector<1x128xf32>
    %cst_25 = arith.constant dense<0.000000e+00> : vector<128xf32>
    %50 = vector.multi_reduction <add>, %47, %cst_25 [0] : vector<8x128xf32> to vector<128xf32>
    %51 = vector.shape_cast %50 : vector<128xf32> to vector<1x128xf32>
    %cst_26 = arith.constant 8.000000e+00 : f32
    %52 = vector.broadcast %cst_26 : f32 to vector<1x128xf32>
    %53 = arith.divf %51, %52 : vector<1x128xf32>
    %54 = arith.mulf %47, %47 : vector<8x128xf32>
    %cst_27 = arith.constant dense<0.000000e+00> : vector<128xf32>
    %55 = vector.multi_reduction <add>, %54, %cst_27 [0] : vector<8x128xf32> to vector<128xf32>
    %56 = vector.shape_cast %55 : vector<128xf32> to vector<1x128xf32>
    %cst_28 = arith.constant 8.000000e+00 : f32
    %57 = vector.broadcast %cst_28 : f32 to vector<1x128xf32>
    %58 = arith.divf %56, %57 : vector<1x128xf32>
    %c384 = arith.constant 384 : index
    %c0_29 = arith.constant 0 : index
    %59 = vector.load %arg1[%c384, %c0_29] : memref<1280x128xf32, #tpu.memory_space<vmem>>, vector<128x128xf32>
    %cst_30 = arith.constant dense<0.000000e+00> : vector<1x128xf32>
    %60 = tpu.matmul %53, %59, %cst_30 {dimension_numbers = #tpu.dot_dimension_numbers<[1], [0], [0], [1], [0, 0, 1, 1], [], []>, precision = #tpu.contract_precision<fp32>} : vector<1x128xf32>, vector<128x128xf32>, vector<1x128xf32> -> vector<1x128xf32>
    %cst_31 = arith.constant dense<0.000000e+00> : vector<1x128xf32>
    %61 = tpu.matmul %58, %59, %cst_31 {dimension_numbers = #tpu.dot_dimension_numbers<[1], [0], [0], [1], [0, 0, 1, 1], [], []>, precision = #tpu.contract_precision<fp32>} : vector<1x128xf32>, vector<128x128xf32>, vector<1x128xf32> -> vector<1x128xf32>
    %62 = arith.mulf %60, %60 : vector<1x128xf32>
    %63 = arith.subf %61, %62 : vector<1x128xf32>
    %cst_32 = arith.constant 0.000000e+00 : f32
    %64 = vector.broadcast %cst_32 : f32 to vector<1x128xf32>
    %65 = arith.maximumf %63, %64 : vector<1x128xf32>
    %66 = vector.broadcast %60 : vector<1x128xf32> to vector<8x128xf32>
    %67 = arith.subf %47, %66 : vector<8x128xf32>
    %68 = vector.broadcast %48 : vector<1x128xf32> to vector<8x128xf32>
    %69 = arith.mulf %68, %67 : vector<8x128xf32>
    %cst_33 = arith.constant 9.99999974E-6 : f32
    %70 = vector.broadcast %cst_33 : f32 to vector<1x128xf32>
    %71 = arith.addf %65, %70 : vector<1x128xf32>
    %72 = math.rsqrt %71 : vector<1x128xf32>
    %73 = vector.broadcast %72 : vector<1x128xf32> to vector<8x128xf32>
    %74 = arith.mulf %69, %73 : vector<8x128xf32>
    %75 = vector.broadcast %49 : vector<1x128xf32> to vector<8x128xf32>
    %76 = arith.addf %74, %75 : vector<8x128xf32>
    %cst_34 = arith.constant 0.000000e+00 : f32
    %77 = vector.broadcast %cst_34 : f32 to vector<8x128xf32>
    %78 = arith.maximumf %76, %77 : vector<8x128xf32>
    %c512 = arith.constant 512 : index
    %c0_35 = arith.constant 0 : index
    %79 = vector.load %arg1[%c512, %c0_35] : memref<1280x128xf32, #tpu.memory_space<vmem>>, vector<128x128xf32>
    %cst_36 = arith.constant dense<0.000000e+00> : vector<8x128xf32>
    %80 = tpu.matmul %78, %79, %cst_36 {dimension_numbers = #tpu.dot_dimension_numbers<[1], [0], [0], [1], [0, 0, 1, 1], [], []>} : vector<8x128xf32>, vector<128x128xf32>, vector<8x128xf32> -> vector<8x128xf32>
    %c6 = arith.constant 6 : index
    %c0_37 = arith.constant 0 : index
    %81 = vector.load %arg2[%c6, %c0_37] : memref<24x128xf32, #tpu.memory_space<vmem>>, vector<1x128xf32>
    %82 = vector.broadcast %81 : vector<1x128xf32> to vector<8x128xf32>
    %83 = arith.addf %80, %82 : vector<8x128xf32>
    %cst_38 = arith.constant 0.000000e+00 : f32
    %84 = vector.broadcast %cst_38 : f32 to vector<8x128xf32>
    %85 = arith.maximumf %83, %84 : vector<8x128xf32>
    %c7 = arith.constant 7 : index
    %c0_39 = arith.constant 0 : index
    %86 = vector.load %arg2[%c7, %c0_39] : memref<24x128xf32, #tpu.memory_space<vmem>>, vector<1x128xf32>
    %c8 = arith.constant 8 : index
    %c0_40 = arith.constant 0 : index
    %87 = vector.load %arg2[%c8, %c0_40] : memref<24x128xf32, #tpu.memory_space<vmem>>, vector<1x128xf32>
    %cst_41 = arith.constant dense<0.000000e+00> : vector<128xf32>
    %88 = vector.multi_reduction <add>, %85, %cst_41 [0] : vector<8x128xf32> to vector<128xf32>
    %89 = vector.shape_cast %88 : vector<128xf32> to vector<1x128xf32>
    %cst_42 = arith.constant 8.000000e+00 : f32
    %90 = vector.broadcast %cst_42 : f32 to vector<1x128xf32>
    %91 = arith.divf %89, %90 : vector<1x128xf32>
    %92 = arith.mulf %85, %85 : vector<8x128xf32>
    %cst_43 = arith.constant dense<0.000000e+00> : vector<128xf32>
    %93 = vector.multi_reduction <add>, %92, %cst_43 [0] : vector<8x128xf32> to vector<128xf32>
    %94 = vector.shape_cast %93 : vector<128xf32> to vector<1x128xf32>
    %cst_44 = arith.constant 8.000000e+00 : f32
    %95 = vector.broadcast %cst_44 : f32 to vector<1x128xf32>
    %96 = arith.divf %94, %95 : vector<1x128xf32>
    %c640 = arith.constant 640 : index
    %c0_45 = arith.constant 0 : index
    %97 = vector.load %arg1[%c640, %c0_45] : memref<1280x128xf32, #tpu.memory_space<vmem>>, vector<128x128xf32>
    %cst_46 = arith.constant dense<0.000000e+00> : vector<1x128xf32>
    %98 = tpu.matmul %91, %97, %cst_46 {dimension_numbers = #tpu.dot_dimension_numbers<[1], [0], [0], [1], [0, 0, 1, 1], [], []>, precision = #tpu.contract_precision<fp32>} : vector<1x128xf32>, vector<128x128xf32>, vector<1x128xf32> -> vector<1x128xf32>
    %cst_47 = arith.constant dense<0.000000e+00> : vector<1x128xf32>
    %99 = tpu.matmul %96, %97, %cst_47 {dimension_numbers = #tpu.dot_dimension_numbers<[1], [0], [0], [1], [0, 0, 1, 1], [], []>, precision = #tpu.contract_precision<fp32>} : vector<1x128xf32>, vector<128x128xf32>, vector<1x128xf32> -> vector<1x128xf32>
    %100 = arith.mulf %98, %98 : vector<1x128xf32>
    %101 = arith.subf %99, %100 : vector<1x128xf32>
    %cst_48 = arith.constant 0.000000e+00 : f32
    %102 = vector.broadcast %cst_48 : f32 to vector<1x128xf32>
    %103 = arith.maximumf %101, %102 : vector<1x128xf32>
    %104 = vector.broadcast %98 : vector<1x128xf32> to vector<8x128xf32>
    %105 = arith.subf %85, %104 : vector<8x128xf32>
    %106 = vector.broadcast %86 : vector<1x128xf32> to vector<8x128xf32>
    %107 = arith.mulf %106, %105 : vector<8x128xf32>
    %cst_49 = arith.constant 9.99999974E-6 : f32
    %108 = vector.broadcast %cst_49 : f32 to vector<1x128xf32>
    %109 = arith.addf %103, %108 : vector<1x128xf32>
    %110 = math.rsqrt %109 : vector<1x128xf32>
    %111 = vector.broadcast %110 : vector<1x128xf32> to vector<8x128xf32>
    %112 = arith.mulf %107, %111 : vector<8x128xf32>
    %113 = vector.broadcast %87 : vector<1x128xf32> to vector<8x128xf32>
    %114 = arith.addf %112, %113 : vector<8x128xf32>
    %cst_50 = arith.constant 0.000000e+00 : f32
    %115 = vector.broadcast %cst_50 : f32 to vector<8x128xf32>
    %116 = arith.maximumf %114, %115 : vector<8x128xf32>
    %c768 = arith.constant 768 : index
    %c0_51 = arith.constant 0 : index
    %117 = vector.load %arg1[%c768, %c0_51] : memref<1280x128xf32, #tpu.memory_space<vmem>>, vector<128x128xf32>
    %cst_52 = arith.constant dense<0.000000e+00> : vector<8x128xf32>
    %118 = tpu.matmul %116, %117, %cst_52 {dimension_numbers = #tpu.dot_dimension_numbers<[1], [0], [0], [1], [0, 0, 1, 1], [], []>} : vector<8x128xf32>, vector<128x128xf32>, vector<8x128xf32> -> vector<8x128xf32>
    %c9 = arith.constant 9 : index
    %c0_53 = arith.constant 0 : index
    %119 = vector.load %arg2[%c9, %c0_53] : memref<24x128xf32, #tpu.memory_space<vmem>>, vector<1x128xf32>
    %120 = vector.broadcast %119 : vector<1x128xf32> to vector<8x128xf32>
    %121 = arith.addf %118, %120 : vector<8x128xf32>
    %cst_54 = arith.constant 0.000000e+00 : f32
    %122 = vector.broadcast %cst_54 : f32 to vector<8x128xf32>
    %123 = arith.maximumf %121, %122 : vector<8x128xf32>
    %c10 = arith.constant 10 : index
    %c0_55 = arith.constant 0 : index
    %124 = vector.load %arg2[%c10, %c0_55] : memref<24x128xf32, #tpu.memory_space<vmem>>, vector<1x128xf32>
    %c11 = arith.constant 11 : index
    %c0_56 = arith.constant 0 : index
    %125 = vector.load %arg2[%c11, %c0_56] : memref<24x128xf32, #tpu.memory_space<vmem>>, vector<1x128xf32>
    %cst_57 = arith.constant dense<0.000000e+00> : vector<128xf32>
    %126 = vector.multi_reduction <add>, %123, %cst_57 [0] : vector<8x128xf32> to vector<128xf32>
    %127 = vector.shape_cast %126 : vector<128xf32> to vector<1x128xf32>
    %cst_58 = arith.constant 8.000000e+00 : f32
    %128 = vector.broadcast %cst_58 : f32 to vector<1x128xf32>
    %129 = arith.divf %127, %128 : vector<1x128xf32>
    %130 = arith.mulf %123, %123 : vector<8x128xf32>
    %cst_59 = arith.constant dense<0.000000e+00> : vector<128xf32>
    %131 = vector.multi_reduction <add>, %130, %cst_59 [0] : vector<8x128xf32> to vector<128xf32>
    %132 = vector.shape_cast %131 : vector<128xf32> to vector<1x128xf32>
    %cst_60 = arith.constant 8.000000e+00 : f32
    %133 = vector.broadcast %cst_60 : f32 to vector<1x128xf32>
    %134 = arith.divf %132, %133 : vector<1x128xf32>
    %135 = arith.mulf %129, %129 : vector<1x128xf32>
    %136 = arith.subf %134, %135 : vector<1x128xf32>
    %cst_61 = arith.constant 0.000000e+00 : f32
    %137 = vector.broadcast %cst_61 : f32 to vector<1x128xf32>
    %138 = arith.maximumf %136, %137 : vector<1x128xf32>
    %139 = vector.broadcast %129 : vector<1x128xf32> to vector<8x128xf32>
    %140 = arith.subf %123, %139 : vector<8x128xf32>
    %141 = vector.broadcast %124 : vector<1x128xf32> to vector<8x128xf32>
    %142 = arith.mulf %141, %140 : vector<8x128xf32>
    %cst_62 = arith.constant 9.99999974E-6 : f32
    %143 = vector.broadcast %cst_62 : f32 to vector<1x128xf32>
    %144 = arith.addf %138, %143 : vector<1x128xf32>
    %145 = math.rsqrt %144 : vector<1x128xf32>
    %146 = vector.broadcast %145 : vector<1x128xf32> to vector<8x128xf32>
    %147 = arith.mulf %142, %146 : vector<8x128xf32>
    %148 = vector.broadcast %125 : vector<1x128xf32> to vector<8x128xf32>
    %149 = arith.addf %147, %148 : vector<8x128xf32>
    %cst_63 = arith.constant 0.000000e+00 : f32
    %150 = vector.broadcast %cst_63 : f32 to vector<8x128xf32>
    %151 = arith.maximumf %149, %150 : vector<8x128xf32>
    %c896 = arith.constant 896 : index
    %c0_64 = arith.constant 0 : index
    %152 = vector.load %arg1[%c896, %c0_64] : memref<1280x128xf32, #tpu.memory_space<vmem>>, vector<128x128xf32>
    %cst_65 = arith.constant dense<0.000000e+00> : vector<8x128xf32>
    %153 = tpu.matmul %151, %152, %cst_65 {dimension_numbers = #tpu.dot_dimension_numbers<[1], [0], [0], [1], [0, 0, 1, 1], [], []>} : vector<8x128xf32>, vector<128x128xf32>, vector<8x128xf32> -> vector<8x128xf32>
    %c12 = arith.constant 12 : index
    %c0_66 = arith.constant 0 : index
    %154 = vector.load %arg2[%c12, %c0_66] : memref<24x128xf32, #tpu.memory_space<vmem>>, vector<1x128xf32>
    %155 = vector.broadcast %154 : vector<1x128xf32> to vector<8x128xf32>
    %156 = arith.addf %153, %155 : vector<8x128xf32>
    %cst_67 = arith.constant 0.000000e+00 : f32
    %157 = vector.broadcast %cst_67 : f32 to vector<8x128xf32>
    %158 = arith.maximumf %156, %157 : vector<8x128xf32>
    %c13 = arith.constant 13 : index
    %c0_68 = arith.constant 0 : index
    %159 = vector.load %arg2[%c13, %c0_68] : memref<24x128xf32, #tpu.memory_space<vmem>>, vector<1x128xf32>
    %c14 = arith.constant 14 : index
    %c0_69 = arith.constant 0 : index
    %160 = vector.load %arg2[%c14, %c0_69] : memref<24x128xf32, #tpu.memory_space<vmem>>, vector<1x128xf32>
    %cst_70 = arith.constant dense<0.000000e+00> : vector<128xf32>
    %161 = vector.multi_reduction <add>, %158, %cst_70 [0] : vector<8x128xf32> to vector<128xf32>
    %162 = vector.shape_cast %161 : vector<128xf32> to vector<1x128xf32>
    %cst_71 = arith.constant 8.000000e+00 : f32
    %163 = vector.broadcast %cst_71 : f32 to vector<1x128xf32>
    %164 = arith.divf %162, %163 : vector<1x128xf32>
    %165 = arith.mulf %158, %158 : vector<8x128xf32>
    %cst_72 = arith.constant dense<0.000000e+00> : vector<128xf32>
    %166 = vector.multi_reduction <add>, %165, %cst_72 [0] : vector<8x128xf32> to vector<128xf32>
    %167 = vector.shape_cast %166 : vector<128xf32> to vector<1x128xf32>
    %cst_73 = arith.constant 8.000000e+00 : f32
    %168 = vector.broadcast %cst_73 : f32 to vector<1x128xf32>
    %169 = arith.divf %167, %168 : vector<1x128xf32>
    %170 = arith.mulf %164, %164 : vector<1x128xf32>
    %171 = arith.subf %169, %170 : vector<1x128xf32>
    %cst_74 = arith.constant 0.000000e+00 : f32
    %172 = vector.broadcast %cst_74 : f32 to vector<1x128xf32>
    %173 = arith.maximumf %171, %172 : vector<1x128xf32>
    %174 = vector.broadcast %164 : vector<1x128xf32> to vector<8x128xf32>
    %175 = arith.subf %158, %174 : vector<8x128xf32>
    %176 = vector.broadcast %159 : vector<1x128xf32> to vector<8x128xf32>
    %177 = arith.mulf %176, %175 : vector<8x128xf32>
    %cst_75 = arith.constant 9.99999974E-6 : f32
    %178 = vector.broadcast %cst_75 : f32 to vector<1x128xf32>
    %179 = arith.addf %173, %178 : vector<1x128xf32>
    %180 = math.rsqrt %179 : vector<1x128xf32>
    %181 = vector.broadcast %180 : vector<1x128xf32> to vector<8x128xf32>
    %182 = arith.mulf %177, %181 : vector<8x128xf32>
    %183 = vector.broadcast %160 : vector<1x128xf32> to vector<8x128xf32>
    %184 = arith.addf %182, %183 : vector<8x128xf32>
    %cst_76 = arith.constant 0.000000e+00 : f32
    %185 = vector.broadcast %cst_76 : f32 to vector<8x128xf32>
    %186 = arith.maximumf %184, %185 : vector<8x128xf32>
    %c1024 = arith.constant 1024 : index
    %c0_77 = arith.constant 0 : index
    %187 = vector.load %arg1[%c1024, %c0_77] : memref<1280x128xf32, #tpu.memory_space<vmem>>, vector<128x128xf32>
    %cst_78 = arith.constant dense<0.000000e+00> : vector<8x128xf32>
    %188 = tpu.matmul %186, %187, %cst_78 {dimension_numbers = #tpu.dot_dimension_numbers<[1], [0], [0], [1], [0, 0, 1, 1], [], []>} : vector<8x128xf32>, vector<128x128xf32>, vector<8x128xf32> -> vector<8x128xf32>
    %c15 = arith.constant 15 : index
    %c0_79 = arith.constant 0 : index
    %189 = vector.load %arg2[%c15, %c0_79] : memref<24x128xf32, #tpu.memory_space<vmem>>, vector<1x128xf32>
    %190 = vector.broadcast %189 : vector<1x128xf32> to vector<8x128xf32>
    %191 = arith.addf %188, %190 : vector<8x128xf32>
    %cst_80 = arith.constant 0.000000e+00 : f32
    %192 = vector.broadcast %cst_80 : f32 to vector<8x128xf32>
    %193 = arith.maximumf %191, %192 : vector<8x128xf32>
    %c16 = arith.constant 16 : index
    %c0_81 = arith.constant 0 : index
    %194 = vector.load %arg2[%c16, %c0_81] : memref<24x128xf32, #tpu.memory_space<vmem>>, vector<1x128xf32>
    %c17 = arith.constant 17 : index
    %c0_82 = arith.constant 0 : index
    %195 = vector.load %arg2[%c17, %c0_82] : memref<24x128xf32, #tpu.memory_space<vmem>>, vector<1x128xf32>
    %cst_83 = arith.constant dense<0.000000e+00> : vector<128xf32>
    %196 = vector.multi_reduction <add>, %193, %cst_83 [0] : vector<8x128xf32> to vector<128xf32>
    %197 = vector.shape_cast %196 : vector<128xf32> to vector<1x128xf32>
    %cst_84 = arith.constant 8.000000e+00 : f32
    %198 = vector.broadcast %cst_84 : f32 to vector<1x128xf32>
    %199 = arith.divf %197, %198 : vector<1x128xf32>
    %200 = arith.mulf %193, %193 : vector<8x128xf32>
    %cst_85 = arith.constant dense<0.000000e+00> : vector<128xf32>
    %201 = vector.multi_reduction <add>, %200, %cst_85 [0] : vector<8x128xf32> to vector<128xf32>
    %202 = vector.shape_cast %201 : vector<128xf32> to vector<1x128xf32>
    %cst_86 = arith.constant 8.000000e+00 : f32
    %203 = vector.broadcast %cst_86 : f32 to vector<1x128xf32>
    %204 = arith.divf %202, %203 : vector<1x128xf32>
    %205 = arith.mulf %199, %199 : vector<1x128xf32>
    %206 = arith.subf %204, %205 : vector<1x128xf32>
    %cst_87 = arith.constant 0.000000e+00 : f32
    %207 = vector.broadcast %cst_87 : f32 to vector<1x128xf32>
    %208 = arith.maximumf %206, %207 : vector<1x128xf32>
    %209 = vector.broadcast %199 : vector<1x128xf32> to vector<8x128xf32>
    %210 = arith.subf %193, %209 : vector<8x128xf32>
    %211 = vector.broadcast %194 : vector<1x128xf32> to vector<8x128xf32>
    %212 = arith.mulf %211, %210 : vector<8x128xf32>
    %cst_88 = arith.constant 9.99999974E-6 : f32
    %213 = vector.broadcast %cst_88 : f32 to vector<1x128xf32>
    %214 = arith.addf %208, %213 : vector<1x128xf32>
    %215 = math.rsqrt %214 : vector<1x128xf32>
    %216 = vector.broadcast %215 : vector<1x128xf32> to vector<8x128xf32>
    %217 = arith.mulf %212, %216 : vector<8x128xf32>
    %218 = vector.broadcast %195 : vector<1x128xf32> to vector<8x128xf32>
    %219 = arith.addf %217, %218 : vector<8x128xf32>
    %cst_89 = arith.constant 0.000000e+00 : f32
    %220 = vector.broadcast %cst_89 : f32 to vector<8x128xf32>
    %221 = arith.maximumf %219, %220 : vector<8x128xf32>
    %c1152 = arith.constant 1152 : index
    %c0_90 = arith.constant 0 : index
    %222 = vector.load %arg1[%c1152, %c0_90] : memref<1280x128xf32, #tpu.memory_space<vmem>>, vector<128x128xf32>
    %cst_91 = arith.constant dense<0.000000e+00> : vector<8x128xf32>
    %223 = tpu.matmul %221, %222, %cst_91 {dimension_numbers = #tpu.dot_dimension_numbers<[1], [0], [0], [1], [0, 0, 1, 1], [], []>} : vector<8x128xf32>, vector<128x128xf32>, vector<8x128xf32> -> vector<8x128xf32>
    %c18 = arith.constant 18 : index
    %c0_92 = arith.constant 0 : index
    %224 = vector.load %arg2[%c18, %c0_92] : memref<24x128xf32, #tpu.memory_space<vmem>>, vector<1x128xf32>
    %225 = vector.broadcast %224 : vector<1x128xf32> to vector<8x128xf32>
    %226 = arith.addf %223, %225 : vector<8x128xf32>
    %227 = math.tanh %226 : vector<8x128xf32>
    %c0_93 = arith.constant 0 : index
    %c0_94 = arith.constant 0 : index
    %228 = vector.load %arg3[%c0_93, %c0_94] : memref<8x128xf32, #tpu.memory_space<vmem>>, vector<8x128xf32>
    tpu.vector_store %arg3[%c0_93, %c0_94], %227 {strides = array<i32>} : memref<8x128xf32, #tpu.memory_space<vmem>>, vector<8x128xf32>,
    return
  }
}

</mosaic_0001>

<bundles_post_ra>
// kernel: tpu_custom_call.1
= control target key start
LH: loop header
LB: loop body
LE: loop exit
PB: predicated region body
PF: predicated region fallthrough
CT: control target
= control target key end

     0   :  { %8 = vsyncpa [#allocation3], 0  ;;  %s9936_s0 = inlined_call_operand.hbm [shape: f32[8,33], index: 0, kind: input, shape index: {}]   ;;  %s9937_s1 = inlined_call_operand.hbm [shape: f32[1280,128], index: 1, kind: input, shape index: {}]   ;;  %s9938_s2 = inlined_call_operand.hbm [shape: f32[24,128], index: 2, kind: input, shape index: {}]   ;;  %s9939_s3 = inlined_call_operand.hbm [shape: f32[8,128], index: 3, kind: output, shape index: {}]  }
   0x1   :  { %9 = vsyncpa [#allocation6], 0 }
   0x2   :  { %10 = vsyncpa [#allocation4], 0  ;;  %s8312_s12 = smov [#allocation5]   ;;  %s8218_s16 = scalar_lea.hbm %s9937_s1, 20480 }
   0x3   :  { %s26_s13 = sshll.u32 %s8312_s12, 4  ;;  %p8219_p0 = scmp.ne.s32.totalorder %s9937_s1, %s8218_s16  ;;  %s27_s13 = int_to_ptr.vmem [resolvable:$true] %s26_s13 }
   0x4   :  { %p8222_p1 = scmp.lt.u32.totalorder %s8218_s16, %s9937_s1 }
   0x6   :  { %p8224_p2 = pnand %p8222_p1, %p8219_p0 }
   0x8   :  { %8227 = shalt.err (!%p8224_p2)
}
   0x9   :  { %s8228_s21 = scalar_lea.vmem %s27_s13, 20480  ;;  %p8233_p4 = scmp.lt.s32.totalorder %s27_s13, %s27_s13 }
   0xa   :  { %p8229_p3 = scmp.ne.s32.totalorder %s27_s13, %s8228_s21  ;;  %p8234_p5 = scmp.lt.s32.totalorder %s8228_s21, %s8228_s21 }
   0xc   :  { %p8235_p6 = por %p8234_p5, %p8233_p4 }
   0xe   :  { %p8236_p7 = pnand %p8235_p6, %p8229_p3 }
  0x10   :  { %8239 = shalt.err (!%p8236_p7)
}
  0x11   :  { %s8313_s22 = smov 128   ;;  %s8314_s23 = smov 8  }
  0x12   :  { %32 = dma.hbm_to_vmem [thread:$0]  %s9937_s1, 20480, %s27_s13, [#allocation6], %s8313_s22, %s8313_s22, %s8314_s23  }
  0x13   :  { %s8315_s26 = smov [#allocation2]   ;;  %s8316_s28 = smov [#allocation7]  }
  0x14   :  { %s17_s27 = sshll.u32 %s8315_s26, 4  ;;  %s38_s29 = sshll.u32 %s8316_s28, 4  ;;  %s18_s27 = int_to_ptr.vmem [resolvable:$true] %s17_s27  ;;  %s39_s29 = int_to_ptr.vmem [resolvable:$true] %s38_s29 }
  0x15   :  { %s8240_s5 = scalar_lea.hbm %s9936_s0, 128 }
  0x16   :  { %p8241_p8 = scmp.ne.s32.totalorder %s9936_s0, %s8240_s5  ;;  %p8244_p9 = scmp.lt.u32.totalorder %s8240_s5, %s9936_s0 }
  0x18   :  { %p8246_p10 = pnand %p8244_p9, %p8241_p8 }
  0x1a   :  { %8249 = shalt.err (!%p8246_p10)
}
  0x1b   :  { %s8250_s1 = scalar_lea.vmem %s18_s27, 128  ;;  %p8255_p12 = scmp.lt.s32.totalorder %s18_s27, %s18_s27 }
  0x1c   :  { %p8251_p11 = scmp.ne.s32.totalorder %s18_s27, %s8250_s1  ;;  %p8256_p13 = scmp.lt.s32.totalorder %s8250_s1, %s8250_s1 }
  0x1e   :  { %p8257_p0 = por %p8256_p13, %p8255_p12 }
  0x20   :  { %p8258_p1 = pnand %p8257_p0, %p8251_p11 }
  0x22   :  { %8261 = shalt.err (!%p8258_p1)
}
  0x23   :  { %20 = dma.hbm_to_vmem [thread:$0]  %s9936_s0, 128, %s18_s27, [#allocation3]  }
  0x24   :  { %s8262_s14 = scalar_lea.hbm %s9938_s2, 384 }
  0x25   :  { %p8263_p2 = scmp.ne.s32.totalorder %s9938_s2, %s8262_s14  ;;  %p8266_p3 = scmp.lt.u32.totalorder %s8262_s14, %s9938_s2 }
  0x27   :  { %p8268_p4 = pnand %p8266_p3, %p8263_p2 }
  0x29   :  { %8271 = shalt.err (!%p8268_p4)
}
  0x2a   :  { %s8272_s19 = scalar_lea.vmem %s39_s29, 384  ;;  %p8277_p6 = scmp.lt.s32.totalorder %s39_s29, %s39_s29 }
  0x2b   :  { %p8273_p5 = scmp.ne.s32.totalorder %s39_s29, %s8272_s19  ;;  %p8278_p7 = scmp.lt.s32.totalorder %s8272_s19, %s8272_s19 }
  0x2d   :  { %p8279_p8 = por %p8278_p7, %p8277_p6 }
  0x2f   :  { %p8280_p9 = pnand %p8279_p8, %p8273_p5 }
  0x31   :  { %8283 = shalt.err (!%p8280_p9)
}
  0x32   :  { %44 = dma.hbm_to_vmem [thread:$0]  %s9938_s2, 384, %s39_s29, [#allocation6], %s8313_s22, %s8313_s22, %s8314_s23  }
  0x33   :  { %8306 = dma.done.wait [#allocation3], 128  }
  0x34   :  { %8307 = vsyncadd [#allocation3], 4294967168 }
  0x35   :  { %8308 = dma.done.wait [#allocation6], 20864  }
  0x36   :  { %8309 = vsyncadd [#allocation6], 4294946432  ;;  %v8317_v0 = vmov 0.0|0.0   ;;  %vm8318_vm0 = vmmov 0   ;;  %v8319_v1 = vmov 0.0   ;;  %v57_v2 = vld [vmem:[#allocation5] sm:$0xff] }
  0x37   :  { %7103 = vmatprep.subr.bf16.mxu0 %v8317_v0  ;;  %5630 = vmatprep.mubr.msk.f32.mxu0 %vm8318_vm0, %v8319_v1  ;;  %v58_v3 = vld [vmem:[#allocation5 + $0x8] sm:$0xff]  ;;  %v59_v4 = vld [vmem:[#allocation5 + $0x10] sm:$0xff]  ;;  %v60_v6 = vld [vmem:[#allocation5 + $0x18] sm:$0xff]  ;;  %vm55_vm1 = vcmask 269312   ;;  %s8320_s2 = smov [#allocation8]  }
  0x38   :  { %7127 = vmatprep.subr.bf16.mxu1 %v8317_v0  ;;  %5665 = vmatprep.mubr.msk.f32.mxu1 %vm8318_vm0, %v8319_v1  ;;  %v7104_v5 = vpack.c.bf16 %v58_v3, %v57_v2  ;;  %v7107_v7 = vpack.c.bf16 %v60_v6, %v59_v4  ;;  %v61_v8 = vld [vmem:[#allocation5 + $0x20] sm:$0xff]  ;;  %v62_v9 = vld [vmem:[#allocation5 + $0x28] sm:$0xff]  ;;  %v63_v15 = vld [vmem:[#allocation5 + $0x30] sm:$0xff]  ;;  %s4837_s21 = sshll.u32 %s8320_s2, 4  ;;  %s4838_s21 = int_to_ptr.vmem [resolvable:$true] %s4837_s21 }
  0x39   :  { %v8390_v10 = vld [vmem:[#allocation5 + $0x80] sm:$0xff]  ;;  %v8392_v11 = vld [vmem:[#allocation5 + $0x88] sm:$0xff]  ;;  %v7110_v13 = vpack.c.bf16 %v62_v9, %v61_v8  ;;  %v64_v16 = vld [vmem:[#allocation5 + $0x38] sm:$0xff]  ;;  %s8284_s22 = scalar_lea.vmem %s4838_s21, 128  ;;  %p8289_p11 = scmp.lt.s32.totalorder %s4838_s21, %s4838_s21 }
  0x3a   :  { %7105 = vmatpush3.bf16.msra.mxu0 %v7104_v5  ;;  %v184_v12 = vand.u32 4294901760, %v8390_v10  ;;  %v187_v14 = vand.u32 4294901760, %v8392_v11  ;;  %v7113_v18 = vpack.c.bf16 %v64_v16, %v63_v15  ;;  %v65_v19 = vld [vmem:[#allocation5 + $0x40] sm:$0xff]  ;;  %v66_v20 = vld [vmem:[#allocation5 + $0x48] sm:$0xff]  ;;  %v67_v22 = vld [vmem:[#allocation5 + $0x50] sm:$0xff]  ;;  %p8285_p10 = scmp.ne.s32.totalorder %s4838_s21, %s8284_s22  ;;  %p8290_p12 = scmp.lt.s32.totalorder %s8284_s22, %s8284_s22 }
  0x3b   :  { %7106 = vmatprep.subr.bf16.mxu0 %v8317_v0  ;;  %v7116_v21 = vpack.c.bf16 %v66_v20, %v65_v19  ;;  %v68_v23 = vld [vmem:[#allocation5 + $0x58] sm:$0xff]  ;;  %v69_v25 = vld [vmem:[#allocation5 + $0x60] sm:$0xff]  ;;  %v70_v26 = vld [vmem:[#allocation5 + $0x68] sm:$0xff] }
  0x3c   :  { %v8401_v17 = vpack.c.bf16 %v187_v14, %v184_v12  ;;  %v7119_v24 = vpack.c.bf16 %v68_v23, %v67_v22  ;;  %v7122_v27 = vpack.c.bf16 %v70_v26, %v69_v25  ;;  %v71_v28 = vld [vmem:[#allocation5 + $0x70] sm:$0xff]  ;;  %v72_v29 = vld [vmem:[#allocation5 + $0x78] sm:$0xff]  ;;  %v8417_v37 = vld [vmem:[#allocation5 + $0xa0] sm:$0xff]  ;;  %p8291_p13 = por %p8290_p12, %p8289_p11 }
  0x3d   :  { %v7125_v30 = vpack.c.bf16 %v72_v29, %v71_v28  ;;  %v54_v31 = vld [vmem:[#allocation2] sm:$0xff]  ;;  %v169_v32 = vld [vmem:[#allocation5 + $0x90] sm:$0xff]  ;;  %v8419_v38 = vld [vmem:[#allocation5 + $0xa8] sm:$0xff]  ;;  %v196_v39 = vand.u32 4294901760, %v8417_v37 }
  0x3e   :  { %7108 = vmatpush3.bf16.msra.mxu0 %v7107_v7  ;;  %7129 = vmatpush3.bf16.msra.mxu1 %v8401_v17  ;;  %v170_v33 = vld [vmem:[#allocation5 + $0x98] sm:$0xff]  ;;  %v190_v34 = vand.u32 4294901760, %v169_v32  ;;  %v199_v40 = vand.u32 4294901760, %v8419_v38  ;;  %v8429_v42 = vld [vmem:[#allocation5 + $0xb0] sm:$0xff]  ;;  %v8441_v47 = vld [vmem:[#allocation5 + $0xc0] sm:$0xff]  ;;  %p8292_p0 = pnand %p8291_p13, %p8285_p10 }
  0x3f   :  { %7109 = vmatprep.subr.bf16.mxu0 %v8317_v0  ;;  %7130 = vmatprep.subr.bf16.mxu1 %v8317_v0  ;;  %v193_v35 = vand.u32 4294901760, %v170_v33  ;;  %v8431_v43 = vld [vmem:[#allocation5 + $0xb8] sm:$0xff]  ;;  %v202_v44 = vand.u32 4294901760, %v8429_v42  ;;  %v8443_v48 = vld [vmem:[#allocation5 + $0xc8] sm:$0xff]  ;;  %v208_v49 = vand.u32 4294901760, %v8441_v47  ;;  %v8453_v52 = vld [vmem:[#allocation5 + $0xd0] sm:$0xff]  ;;  %v8510_v15 = vsub.f32 %v8417_v37, %v196_v39 }
  0x40   :  { %v8427_v41 = vpack.c.bf16 %v199_v40, %v196_v39  ;;  %v205_v45 = vand.u32 4294901760, %v8431_v43  ;;  %v211_v50 = vand.u32 4294901760, %v8443_v48  ;;  %v8455_v53 = vld [vmem:[#allocation5 + $0xd8] sm:$0xff]  ;;  %v214_v54 = vand.u32 4294901760, %v8453_v52  ;;  %v8465_v57 = vld [vmem:[#allocation5 + $0xe0] sm:$0xff]  ;;  %v8467_v58 = vld [vmem:[#allocation5 + $0xe8] sm:$0xff] }
  0x41   :  { %v8415_v36 = vpack.c.bf16 %v193_v35, %v190_v34  ;;  %v217_v55 = vand.u32 4294901760, %v8455_v53  ;;  %v8469_v59 = vld [vmem:[#allocation5 + $0xf0] sm:$0xff]  ;;  %v220_v60 = vand.u32 4294901760, %v8465_v57  ;;  %v223_v61 = vand.u32 4294901760, %v8467_v58  ;;  %v8473_v62 = vld [vmem:[#allocation5 + $0xf8] sm:$0xff] }
  0x42   :  { %7111 = vmatpush3.bf16.msra.mxu0 %v7110_v13  ;;  %v8439_v46 = vpack.c.bf16 %v205_v45, %v202_v44  ;;  %v8451_v51 = vpack.c.bf16 %v211_v50, %v208_v49  ;;  %v226_v63 = vand.u32 4294901760, %v8469_v59  ;;  %v229_v2 = vand.u32 4294901760, %v8473_v62 }
  0x43   :  { %7112 = vmatprep.subr.bf16.mxu0 %v8317_v0  ;;  %7132 = vmatpush3.bf16.msra.mxu1 %v8415_v36  ;;  %v8463_v56 = vpack.c.bf16 %v217_v55, %v214_v54  ;;  %v8480_v3 = vpack.c.bf16 %v223_v61, %v220_v60  ;;  %v8493_v5 = vsub.f32 %v169_v32, %v190_v34  ;;  %v305_v20 = vand.u32 4294901760, %v8510_v15 }
  0x44   :  { %7133 = vmatprep.subr.bf16.mxu1 %v8317_v0  ;;  %v8489_v4 = vpack.c.bf16 %v229_v2, %v226_v63  ;;  %v8495_v6 = vsub.f32 %v170_v33, %v193_v35  ;;  %v8513_v16 = vsub.f32 %v8419_v38, %v199_v40  ;;  %v8526_v25 = vsub.f32 %v8429_v42, %v202_v44 }
  0x45   :  { %v291_v7 = vand.u32 4294901760, %v8493_v5  ;;  %v306_v23 = vsub.f32 %v8510_v15, %v305_v20  ;;  %v8529_v26 = vsub.f32 %v8431_v43, %v205_v45  ;;  %v8539_v33 = vsub.f32 %v8441_v47, %v208_v49 }
  0x46   :  { %7114 = vmatpush3.bf16.msra.mxu0 %v7113_v18  ;;  %v298_v8 = vand.u32 4294901760, %v8495_v6  ;;  %v319_v29 = vand.u32 4294901760, %v8526_v25  ;;  %v8542_v34 = vsub.f32 %v8443_v48, %v211_v50  ;;  %v8556_v44 = vsub.f32 %v8453_v52, %v214_v54 }
  0x47   :  { %7115 = vmatprep.subr.bf16.mxu0 %v8317_v0  ;;  %7135 = vmatpush3.bf16.msra.mxu1 %v8427_v41  ;;  %v292_v9 = vsub.f32 %v8493_v5, %v291_v7  ;;  %v9947_v38 = vand.u32 4294901760, %v8539_v33  ;;  %v8559_v45 = vsub.f32 %v8455_v53, %v217_v55  ;;  %v8574_v53 = vsub.f32 %v8465_v57, %v220_v60 }
  0x48   :  { %7136 = vmatprep.subr.bf16.mxu1 %v8317_v0  ;;  %v299_v13 = vsub.f32 %v8495_v6, %v298_v8  ;;  %v320_v32 = vsub.f32 %v8526_v25, %v319_v29  ;;  %v9946_v39 = vand.u32 4294901760, %v8542_v34  ;;  %v9945_v50 = vand.u32 4294901760, %v8556_v44 }
  0x49   :  { %v293_v18 = vand.u32 4294901760, %v292_v9  ;;  %v334_v42 = vsub.f32 %v8539_v33, %v9947_v38  ;;  %v9944_v9 = vand.u32 4294901760, %v8559_v45  ;;  %v8577_v54 = vsub.f32 %v8467_v58, %v223_v61 }
  0x4a   :  { %7117 = vmatpush3.bf16.msra.mxu0 %v7116_v21  ;;  %v300_v19 = vand.u32 4294901760, %v299_v13  ;;  %v312_v21 = vand.u32 4294901760, %v8513_v16  ;;  %v321_v37 = vand.u32 4294901760, %v320_v32  ;;  %v341_v43 = vsub.f32 %v8542_v34, %v9946_v39 }
  0x4b   :  { %7118 = vmatprep.subr.bf16.mxu0 %v8317_v0  ;;  %7138 = vmatpush3.bf16.msra.mxu1 %v8439_v46  ;;  %v335_v48 = vand.u32 4294901760, %v334_v42  ;;  %v355_v52 = vsub.f32 %v8559_v45, %v9944_v9  ;;  %v8589_v57 = vsub.f32 %v8469_v59, %v226_v63  ;;  %v8594_v58 = vsub.f32 %v8473_v62, %v229_v2 }
  0x4c   :  { %7139 = vmatprep.subr.bf16.mxu1 %v8317_v0  ;;  %v8517_v22 = vpack.c.bf16 %v300_v19, %v293_v18  ;;  %v342_v49 = vand.u32 4294901760, %v341_v43  ;;  %v348_v18 = vsub.f32 %v8556_v44, %v9945_v50  ;;  %v8613_v43 = vpack.c.bf16 %v8495_v6, %v8493_v5 }
  0x4d   :  { %v356_v19 = vand.u32 4294901760, %v355_v52  ;;  %v9941_v32 = vand.u32 4294901760, %v8589_v57  ;;  %v8629_v52 = vpack.c.bf16 %v8559_v45, %v8556_v44  ;;  %v7230_v5 = vpack.c.bf16 %v312_v21, %v305_v20 }
  0x4e   :  { %7120 = vmatpush3.bf16.msra.mxu0 %v7119_v24  ;;  %v313_v24 = vsub.f32 %v8513_v16, %v312_v21  ;;  %v8565_v13 = vpack.c.bf16 %v342_v49, %v335_v48  ;;  %v349_v55 = vand.u32 4294901760, %v348_v18  ;;  %v8617_v48 = vpack.c.bf16 %v8513_v16, %v8510_v15 }
  0x4f   :  { %7121 = vmatprep.subr.bf16.mxu0 %v8317_v0  ;;  %7141 = vmatpush3.bf16.msra.mxu1 %v8451_v51  ;;  %v376_v59 = vsub.f32 %v8589_v57, %v9941_v32  ;;  %v8621_v49 = vpack.c.bf16 %v8529_v26, %v8526_v25  ;;  %v8625_v18 = vpack.c.bf16 %v8542_v34, %v8539_v33  ;;  %v9968_v16 = vand.u32 4294901760, %v8556_v44 }
  0x50   :  { %7142 = vmatprep.subr.bf16.mxu1 %v8317_v0  ;;  %v314_v28 = vand.u32 4294901760, %v313_v24  ;;  %v9942_v24 = vand.u32 4294901760, %v8577_v54  ;;  %v9969_v20 = vand.u32 4294901760, %v8559_v45  ;;  %v9970_v25 = vand.u32 4294901760, %v8574_v53  ;;  %v1497_v45 = vld [vmem:[#allocation5 + $0x130] sm:$0xff] }
  0x51   :  { %v377_v2 = vand.u32 4294901760, %v376_v59 }
  0x52   :  { %7123 = vmatpush3.bf16.msra.mxu0 %v7122_v27  ;;  %v307_v27 = vand.u32 4294901760, %v306_v23  ;;  %v9943_v23 = vand.u32 4294901760, %v8574_v53  ;;  %v369_v60 = vsub.f32 %v8577_v54, %v9942_v24  ;;  %v7239_v21 = vpack.c.bf16 %v9969_v20, %v9968_v16 }
  0x53   :  { %7124 = vmatprep.subr.bf16.mxu0 %v8317_v0  ;;  %7144 = vmatpush3.bf16.msra.mxu1 %v8463_v56 }
  0x54   :  { %7145 = vmatprep.subr.bf16.mxu1 %v8317_v0 }
  0x56   :  { %7126 = vmatpush3.bf16.msra.mxu0 %v7125_v30  ;;  %v326_v30 = vand.u32 4294901760, %v8529_v26 }
  0x57   :  { %7271 = vmatprep.subr.bf16.mxu0 %v8317_v0  ;;  %7147 = vmatpush3.bf16.msra.mxu1 %v8480_v3 }
  0x58   :  { %7148 = vmatprep.subr.bf16.mxu1 %v8317_v0  ;;  %v327_v35 = vsub.f32 %v8529_v26, %v326_v30  ;;  %v7233_v6 = vpack.c.bf16 %v326_v30, %v319_v29  ;;  %v9971_v26 = vand.u32 4294901760, %v8577_v54  ;;  %v9972_v30 = vand.u32 4294901760, %v8589_v57 }
  0x59   :  { %5631 = vmatmul.mubr.msk.f32.vlgmr.msra.gmra.mrb[0].mxu0 %vm55_vm1, %v54_v31  ;;  %v8533_v31 = vpack.c.bf16 %v314_v28, %v307_v27  ;;  %v8581_v27 = vpack.c.bf16 %v356_v19, %v349_v55  ;;  %v362_v28 = vsub.f32 %v8574_v53, %v9943_v23  ;;  %v8633_v55 = vpack.c.bf16 %v8577_v54, %v8574_v53  ;;  %v1499_v53 = vld [vmem:[#allocation5 + $0x140] sm:$0xff]  ;;  %v1500_v54 = vld [vmem:[#allocation5 + $0x148] sm:$0xff] }
  0x5a   :  { %7273 = vmatpush3.bf16.msra.mxu0 %v8401_v17  ;;  %5875 = vmatprep.mubr.msk.f32.mxu0 %vm8318_vm0, %v8319_v1  ;;  %v328_v40 = vand.u32 4294901760, %v327_v35  ;;  %v9940_v35 = vand.u32 4294901760, %v8594_v58  ;;  %v8637_v19 = vpack.c.bf16 %v8594_v58, %v8589_v57  ;;  %v8648_v23 = vsub.f32 %v8390_v10, %v184_v12  ;;  %v1502_v57 = vld [vmem:[#allocation5 + $0x158] sm:$0xff] }
  0x5b   :  { %7274 = vmatprep.subr.bf16.mxu0 %v8317_v0  ;;  %7150 = vmatpush3.bf16.msra.mxu1 %v8489_v4  ;;  %v363_v61 = vand.u32 4294901760, %v362_v28  ;;  %v4847_v28 = vld [vmem:[#allocation7] ss:$0 sm:$0xff]  ;;  %v7242_v29 = vpack.c.bf16 %v9971_v26, %v9970_v25  ;;  %v8926_v25 = vld [vmem:[#allocation5 + $0x1a8] sm:$0xff] }
  0x5c   :  { %7151 = vmatprep.subr.bf16.mxu1 %v8317_v0  ;;  %v8561_v47 = vpack.c.bf16 %v328_v40, %v321_v37  ;;  %v370_v37 = vand.u32 4294901760, %v369_v60  ;;  %v383_v63 = vsub.f32 %v8594_v58, %v9940_v35  ;;  %v277_v50 = vand.u32 4294901760, %v8648_v23 }
  0x5e   :  { %7276 = vmatpush3.bf16.msra.mxu0 %v8415_v36  ;;  %v8607_v62 = vpack.c.bf16 %v370_v37, %v363_v61  ;;  %v384_v40 = vand.u32 4294901760, %v383_v63  ;;  %v278_v10 = vsub.f32 %v8648_v23, %v277_v50 }
  0x5f   :  { %7277 = vmatprep.subr.bf16.mxu0 %v8317_v0 }
  0x60   :  { %v8609_v42 = vpack.c.bf16 %v384_v40, %v377_v2 }
  0x62   :  { %7279 = vmatpush3.bf16.msra.mxu0 %v8427_v41 }
  0x63   :  { %7280 = vmatprep.subr.bf16.mxu0 %v8317_v0 }
  0x66   :  { %7282 = vmatpush3.bf16.msra.mxu0 %v8439_v46 }
  0x67   :  { %7283 = vmatprep.subr.bf16.mxu0 %v8317_v0 }
  0x6a   :  { %7285 = vmatpush3.bf16.msra.mxu0 %v8451_v51 }
  0x6b   :  { %7286 = vmatprep.subr.bf16.mxu0 %v8317_v0 }
  0x6e   :  { %7288 = vmatpush3.bf16.msra.mxu0 %v8463_v56 }
  0x6f   :  { %7289 = vmatprep.subr.bf16.mxu0 %v8317_v0 }
  0x72   :  { %7291 = vmatpush3.bf16.msra.mxu0 %v8480_v3 }
  0x73   :  { %7292 = vmatprep.subr.bf16.mxu0 %v8317_v0 }
  0x76   :  { %7294 = vmatpush3.bf16.msra.mxu0 %v8489_v4 }
  0x77   :  { %7295 = vmatprep.subr.bf16.mxu0 %v8317_v0 }
 0x12c   :  { %v144_v60 = vpop.f32.mrb[0].mxu0 }
 0x12d   :  { %v145_v61 = vadd.f32 %v4847_v28, %v144_v60  ;;  %v5632_v37 = vpop.f32.mrb[1].mxu0  ;;  %v8653_v28 = vsub.f32 %v8392_v11, %v187_v14 }
 0x12f   :  { %v8639_v59 = vmax.f32 %v145_v61, 0.0 }
 0x131   :  { %v151_v63 = vrot.slane %v8639_v59, 4  ;;  %v159_v2 = vmul.f32 %v8639_v59, %v8639_v59 }
 0x133   :  { %v152_v40 = vadd.f32 %v151_v63, %v8639_v59  ;;  %v160_v35 = vrot.slane %v159_v2, 4  ;;  %v284_v63 = vand.u32 4294901760, %v8653_v28 }
 0x135   :  { %v153_v32 = vrot.slane %v152_v40, 2  ;;  %v161_v24 = vadd.f32 %v160_v35, %v159_v2  ;;  %v285_v11 = vsub.f32 %v8653_v28, %v284_v63 }
 0x137   :  { %v154_v60 = vadd.f32 %v153_v32, %v152_v40  ;;  %v162_v61 = vrot.slane %v161_v24, 2  ;;  %v279_v40 = vand.u32 4294901760, %v278_v10 }
 0x139   :  { %v155_v37 = vrot.slane %v154_v60, 1  ;;  %v163_v9 = vadd.f32 %v162_v61, %v161_v24 }
 0x13b   :  { %v164_v39 = vrot.slane %v163_v9, 1  ;;  %v156_v35 = vadd.f32 %v155_v37, %v154_v60  ;;  %v286_v60 = vand.u32 4294901760, %v285_v11 }
 0x13d   :  { %v158_v2 = vmul.f32 0.125, %v156_v35  ;;  %v165_v38 = vadd.f32 %v164_v39, %v163_v9  ;;  %v7152_v35 = vpack.c.bf16 %v286_v60, %v279_v40 }
 0x13f   :  { %v8663_v12 = vand.u32 4294901760, %v158_v2  ;;  %v166_v14 = vmul.f32 0.125, %v165_v38 }
 0x141   :  { %v8666_v24 = vsub.f32 %v158_v2, %v8663_v12  ;;  %v8668_v32 = vand.u32 4294901760, %v166_v14 }
 0x143   :  { %v266_v39 = vand.u32 4294901760, %v8666_v24  ;;  %v8672_v9 = vsub.f32 %v166_v14, %v8668_v32 }
 0x145   :  { %v267_v61 = vsub.f32 %v8666_v24, %v266_v39  ;;  %v907_v37 = vand.u32 4294901760, %v8672_v9 }
 0x147   :  { %v268_v38 = vand.u32 4294901760, %v267_v61  ;;  %v908_v2 = vsub.f32 %v8672_v9, %v907_v37 }
 0x149   :  { %5666 = vmatmul.mubr.f32.vlgmr.msra.gmra.mrb[0].mxu1 %v268_v38  ;;  %v909_v10 = vand.u32 4294901760, %v908_v2  ;;  %v4849_v2 = vld [vmem:[#allocation7 + $0x1] ss:$0 sm:$0xff] }
 0x14a   :  { %7153 = vmatpush3.bf16.msra.mxu1 %v7152_v35  ;;  %5700 = vmatprep.mubr.msk.f32.mxu1 %vm8318_vm0, %v8319_v1 }
 0x14b   :  { %5876 = vmatmul.mubr.f32.vlgmr.msra.gmra.mrb[2].mxu0 %v909_v10  ;;  %7154 = vmatprep.subr.bf16.mxu1 %v8317_v0 }
 0x14c   :  { %7297 = vmatpush3.bf16.msra.mxu0 %v7152_v35  ;;  %5910 = vmatprep.mubr.msk.f32.mxu0 %vm8318_vm0, %v8319_v1 }
 0x14d   :  { %7298 = vmatprep.subr.bf16.mxu0 %v8317_v0 }
 0x14e   :  { %7156 = vmatpush3.bf16.msra.mxu1 %v8517_v22 }
 0x14f   :  { %7157 = vmatprep.subr.bf16.mxu1 %v8317_v0 }
 0x150   :  { %7300 = vmatpush3.bf16.msra.mxu0 %v8517_v22  ;;  %v7176_v22 = vpack.c.bf16 %v8653_v28, %v8648_v23  ;;  %v7428_v23 = vpack.c.bf16 %v1500_v54, %v1499_v53  ;;  %v8972_v54 = vld [vmem:[#allocation5 + $0x1e0] sm:$0xff] }
 0x151   :  { %7301 = vmatprep.subr.bf16.mxu0 %v8317_v0 }
 0x152   :  { %7159 = vmatpush3.bf16.msra.mxu1 %v8533_v31 }
 0x153   :  { %7160 = vmatprep.subr.bf16.mxu1 %v8317_v0 }
 0x154   :  { %7303 = vmatpush3.bf16.msra.mxu0 %v8533_v31  ;;  %v7224_v31 = vpack.c.bf16 %v284_v63, %v277_v50  ;;  %v1498_v50 = vld [vmem:[#allocation5 + $0x138] sm:$0xff] }
 0x155   :  { %7304 = vmatprep.subr.bf16.mxu0 %v8317_v0 }
 0x156   :  { %7162 = vmatpush3.bf16.msra.mxu1 %v8561_v47 }
 0x157   :  { %7163 = vmatprep.subr.bf16.mxu1 %v8317_v0 }
 0x158   :  { %7306 = vmatpush3.bf16.msra.mxu0 %v8561_v47  ;;  %v7227_v47 = vpack.c.bf16 %v298_v8, %v291_v7  ;;  %v9966_v7 = vand.u32 4294901760, %v8539_v33  ;;  %v9967_v8 = vand.u32 4294901760, %v8542_v34  ;;  %v9973_v33 = vand.u32 4294901760, %v8594_v58 }
 0x159   :  { %7307 = vmatprep.subr.bf16.mxu0 %v8317_v0 }
 0x15a   :  { %7165 = vmatpush3.bf16.msra.mxu1 %v8565_v13  ;;  %v7236_v15 = vpack.c.bf16 %v9967_v8, %v9966_v7  ;;  %v7245_v34 = vpack.c.bf16 %v9973_v33, %v9972_v30  ;;  %v1602_v8 = vld [vmem:[#allocation5 + $0x190] sm:$0xff] }
 0x15b   :  { %7166 = vmatprep.subr.bf16.mxu1 %v8317_v0  ;;  %v8936_v33 = vld [vmem:[#allocation5 + $0x1b0] sm:$0xff] }
 0x15c   :  { %7309 = vmatpush3.bf16.msra.mxu0 %v8565_v13  ;;  %v7425_v13 = vpack.c.bf16 %v1498_v50, %v1497_v45  ;;  %v8962_v45 = vld [vmem:[#allocation5 + $0x1d8] sm:$0xff] }
 0x15d   :  { %7310 = vmatprep.subr.bf16.mxu0 %v8317_v0 }
 0x15e   :  { %7168 = vmatpush3.bf16.msra.mxu1 %v8581_v27 }
 0x15f   :  { %7169 = vmatprep.subr.bf16.mxu1 %v8317_v0 }
 0x160   :  { %7312 = vmatpush3.bf16.msra.mxu0 %v8581_v27  ;;  %v1501_v27 = vld [vmem:[#allocation5 + $0x150] sm:$0xff] }
 0x161   :  { %7313 = vmatprep.subr.bf16.mxu0 %v8317_v0  ;;  %v7431_v58 = vpack.c.bf16 %v1502_v57, %v1501_v27  ;;  %v1653_v27 = vand.u32 4294901760, %v8972_v54 }
 0x162   :  { %7171 = vmatpush3.bf16.msra.mxu1 %v8607_v62 }
 0x163   :  { %7172 = vmatprep.subr.bf16.mxu1 %v8317_v0 }
 0x164   :  { %7315 = vmatpush3.bf16.msra.mxu0 %v8607_v62  ;;  %v1503_v62 = vld [vmem:[#allocation5 + $0x160] sm:$0xff] }
 0x165   :  { %7316 = vmatprep.subr.bf16.mxu0 %v8317_v0 }
 0x166   :  { %7174 = vmatpush3.bf16.msra.mxu1 %v8609_v42 }
 0x167   :  { %7175 = vmatprep.subr.bf16.mxu1 %v8317_v0 }
 0x168   :  { %7318 = vmatpush3.bf16.msra.mxu0 %v8609_v42  ;;  %v1504_v42 = vld [vmem:[#allocation5 + $0x168] sm:$0xff] }
 0x169   :  { %5701 = vmatmul.mubr.f32.vlgmr.msra.gmra.mrb[0].mxu1 %v8663_v12  ;;  %7319 = vmatprep.subr.bf16.mxu0 %v8317_v0 }
 0x16a   :  { %7177 = vmatpush3.bf16.msra.mxu1 %v7176_v22  ;;  %5735 = vmatprep.mubr.msk.f32.mxu1 %vm8318_vm0, %v8319_v1 }
 0x16b   :  { %5911 = vmatmul.mubr.f32.vlgmr.msra.gmra.mrb[2].mxu0 %v8668_v32  ;;  %7178 = vmatprep.subr.bf16.mxu1 %v8317_v0 }
 0x16c   :  { %7321 = vmatpush3.bf16.msra.mxu0 %v7176_v22  ;;  %5945 = vmatprep.mubr.msk.f32.mxu0 %vm8318_vm0, %v8319_v1 }
 0x16d   :  { %7322 = vmatprep.subr.bf16.mxu0 %v8317_v0 }
 0x16e   :  { %7180 = vmatpush3.bf16.msra.mxu1 %v8613_v43 }
 0x16f   :  { %7181 = vmatprep.subr.bf16.mxu1 %v8317_v0 }
 0x170   :  { %7324 = vmatpush3.bf16.msra.mxu0 %v8613_v43  ;;  %v7434_v43 = vpack.c.bf16 %v1504_v42, %v1503_v62  ;;  %v8984_v62 = vld [vmem:[#allocation5 + $0x1f0] sm:$0xff]  ;;  %v8986_v42 = vld [vmem:[#allocation5 + $0x1f8] sm:$0xff] }
 0x171   :  { %7325 = vmatprep.subr.bf16.mxu0 %v8317_v0 }
 0x172   :  { %7183 = vmatpush3.bf16.msra.mxu1 %v8617_v48 }
 0x173   :  { %7184 = vmatprep.subr.bf16.mxu1 %v8317_v0 }
 0x174   :  { %7327 = vmatpush3.bf16.msra.mxu0 %v8617_v48  ;;  %v1505_v48 = vld [vmem:[#allocation5 + $0x170] sm:$0xff] }
 0x175   :  { %7328 = vmatprep.subr.bf16.mxu0 %v8317_v0 }
 0x176   :  { %7186 = vmatpush3.bf16.msra.mxu1 %v8621_v49 }
 0x177   :  { %7187 = vmatprep.subr.bf16.mxu1 %v8317_v0 }
 0x178   :  { %7330 = vmatpush3.bf16.msra.mxu0 %v8621_v49  ;;  %v1506_v49 = vld [vmem:[#allocation5 + $0x178] sm:$0xff] }
 0x179   :  { %7331 = vmatprep.subr.bf16.mxu0 %v8317_v0 }
 0x17a   :  { %7189 = vmatpush3.bf16.msra.mxu1 %v8625_v18 }
 0x17b   :  { %7190 = vmatprep.subr.bf16.mxu1 %v8317_v0 }
 0x17c   :  { %7333 = vmatpush3.bf16.msra.mxu0 %v8625_v18  ;;  %v7437_v18 = vpack.c.bf16 %v1506_v49, %v1505_v48  ;;  %v1662_v48 = vand.u32 4294901760, %v8986_v42 }
 0x17d   :  { %7334 = vmatprep.subr.bf16.mxu0 %v8317_v0 }
 0x17e   :  { %7192 = vmatpush3.bf16.msra.mxu1 %v8629_v52 }
 0x17f   :  { %7193 = vmatprep.subr.bf16.mxu1 %v8317_v0 }
 0x180   :  { %7336 = vmatpush3.bf16.msra.mxu0 %v8629_v52  ;;  %v8899_v52 = vld [vmem:[#allocation5 + $0x180] sm:$0xff] }
 0x181   :  { %7337 = vmatprep.subr.bf16.mxu0 %v8317_v0 }
 0x182   :  { %7195 = vmatpush3.bf16.msra.mxu1 %v8633_v55 }
 0x183   :  { %7196 = vmatprep.subr.bf16.mxu1 %v8317_v0 }
 0x184   :  { %7339 = vmatpush3.bf16.msra.mxu0 %v8633_v55  ;;  %v8901_v55 = vld [vmem:[#allocation5 + $0x188] sm:$0xff] }
 0x185   :  { %7340 = vmatprep.subr.bf16.mxu0 %v8317_v0  ;;  %v1620_v28 = vand.u32 4294901760, %v8901_v55 }
 0x186   :  { %7198 = vmatpush3.bf16.msra.mxu1 %v8637_v19 }
 0x187   :  { %7199 = vmatprep.subr.bf16.mxu1 %v8317_v0 }
 0x188   :  { %7342 = vmatpush3.bf16.msra.mxu0 %v8637_v19  ;;  %v1617_v19 = vand.u32 4294901760, %v8899_v52 }
 0x189   :  { %5736 = vmatmul.mubr.f32.vlgmr.msra.gmra.mrb[0].mxu1 %v8666_v24  ;;  %7343 = vmatprep.subr.bf16.mxu0 %v8317_v0 }
 0x18a   :  { %7201 = vmatpush3.bf16.msra.mxu1 %v8401_v17  ;;  %5770 = vmatprep.mubr.msk.f32.mxu1 %vm8318_vm0, %v8319_v1  ;;  %v8909_v63 = vpack.c.bf16 %v1620_v28, %v1617_v19 }
 0x18b   :  { %5946 = vmatmul.mubr.f32.vlgmr.msra.gmra.mrb[2].mxu0 %v8672_v9  ;;  %7202 = vmatprep.subr.bf16.mxu1 %v8317_v0 }
 0x18c   :  { %7345 = vmatpush3.bf16.msra.mxu0 %v8401_v17  ;;  %5980 = vmatprep.mubr.msk.f32.mxu0 %vm8318_vm0, %v8319_v1 }
 0x18d   :  { %7346 = vmatprep.subr.bf16.mxu0 %v8317_v0 }
 0x18e   :  { %7204 = vmatpush3.bf16.msra.mxu1 %v8415_v36 }
 0x18f   :  { %7205 = vmatprep.subr.bf16.mxu1 %v8317_v0 }
 0x190   :  { %7348 = vmatpush3.bf16.msra.mxu0 %v8415_v36 }
 0x191   :  { %7349 = vmatprep.subr.bf16.mxu0 %v8317_v0 }
 0x192   :  { %7207 = vmatpush3.bf16.msra.mxu1 %v8427_v41 }
 0x193   :  { %7208 = vmatprep.subr.bf16.mxu1 %v8317_v0 }
 0x194   :  { %7351 = vmatpush3.bf16.msra.mxu0 %v8427_v41 }
 0x195   :  { %7352 = vmatprep.subr.bf16.mxu0 %v8317_v0 }
 0x196   :  { %7210 = vmatpush3.bf16.msra.mxu1 %v8439_v46 }
 0x197   :  { %7211 = vmatprep.subr.bf16.mxu1 %v8317_v0 }
 0x198   :  { %7354 = vmatpush3.bf16.msra.mxu0 %v8439_v46 }
 0x199   :  { %7355 = vmatprep.subr.bf16.mxu0 %v8317_v0 }
 0x19a   :  { %7213 = vmatpush3.bf16.msra.mxu1 %v8451_v51 }
 0x19b   :  { %7214 = vmatprep.subr.bf16.mxu1 %v8317_v0 }
 0x19c   :  { %7357 = vmatpush3.bf16.msra.mxu0 %v8451_v51 }
 0x19d   :  { %7358 = vmatprep.subr.bf16.mxu0 %v8317_v0 }
 0x19e   :  { %7216 = vmatpush3.bf16.msra.mxu1 %v8463_v56 }
 0x19f   :  { %7217 = vmatprep.subr.bf16.mxu1 %v8317_v0 }
 0x1a0   :  { %7360 = vmatpush3.bf16.msra.mxu0 %v8463_v56 }
 0x1a1   :  { %7361 = vmatprep.subr.bf16.mxu0 %v8317_v0 }
 0x1a2   :  { %7219 = vmatpush3.bf16.msra.mxu1 %v8480_v3 }
 0x1a3   :  { %7220 = vmatprep.subr.bf16.mxu1 %v8317_v0 }
 0x1a4   :  { %7363 = vmatpush3.bf16.msra.mxu0 %v8480_v3 }
 0x1a5   :  { %7364 = vmatprep.subr.bf16.mxu0 %v8317_v0 }
 0x1a6   :  { %7222 = vmatpush3.bf16.msra.mxu1 %v8489_v4 }
 0x1a7   :  { %7223 = vmatprep.subr.bf16.mxu1 %v8317_v0 }
 0x1a8   :  { %7366 = vmatpush3.bf16.msra.mxu0 %v8489_v4 }
 0x1a9   :  { %5771 = vmatmul.mubr.f32.vlgmr.msra.gmra.mrb[0].mxu1 %v266_v39  ;;  %7367 = vmatprep.subr.bf16.mxu0 %v8317_v0 }
 0x1aa   :  { %7225 = vmatpush3.bf16.msra.mxu1 %v7224_v31  ;;  %5805 = vmatprep.mubr.msk.f32.mxu1 %vm8318_vm0, %v8319_v1 }
 0x1ab   :  { %5981 = vmatmul.mubr.f32.vlgmr.msra.gmra.mrb[2].mxu0 %v907_v37  ;;  %7226 = vmatprep.subr.bf16.mxu1 %v8317_v0 }
 0x1ac   :  { %7369 = vmatpush3.bf16.msra.mxu0 %v7224_v31  ;;  %6015 = vmatprep.mubr.msk.f32.mxu0 %vm8318_vm0, %v8319_v1 }
 0x1ad   :  { %7370 = vmatprep.subr.bf16.mxu0 %v8317_v0 }
 0x1ae   :  { %7228 = vmatpush3.bf16.msra.mxu1 %v7227_v47 }
 0x1af   :  { %7229 = vmatprep.subr.bf16.mxu1 %v8317_v0 }
 0x1b0   :  { %7372 = vmatpush3.bf16.msra.mxu0 %v7227_v47  ;;  %v4850_v47 = vld [vmem:[#allocation7 + $0x2] ss:$0 sm:$0xff] }
 0x1b1   :  { %7373 = vmatprep.subr.bf16.mxu0 %v8317_v0 }
 0x1b2   :  { %7231 = vmatpush3.bf16.msra.mxu1 %v7230_v5 }
 0x1b3   :  { %7232 = vmatprep.subr.bf16.mxu1 %v8317_v0 }
 0x1b4   :  { %7375 = vmatpush3.bf16.msra.mxu0 %v7230_v5 }
 0x1b5   :  { %7376 = vmatprep.subr.bf16.mxu0 %v8317_v0 }
 0x1b6   :  { %7234 = vmatpush3.bf16.msra.mxu1 %v7233_v6 }
 0x1b7   :  { %7235 = vmatprep.subr.bf16.mxu1 %v8317_v0 }
 0x1b8   :  { %7378 = vmatpush3.bf16.msra.mxu0 %v7233_v6 }
 0x1b9   :  { %7379 = vmatprep.subr.bf16.mxu0 %v8317_v0 }
 0x1ba   :  { %7237 = vmatpush3.bf16.msra.mxu1 %v7236_v15 }
 0x1bb   :  { %7238 = vmatprep.subr.bf16.mxu1 %v8317_v0 }
 0x1bc   :  { %7381 = vmatpush3.bf16.msra.mxu0 %v7236_v15  ;;  %v1603_v15 = vld [vmem:[#allocation5 + $0x198] sm:$0xff] }
 0x1bd   :  { %7382 = vmatprep.subr.bf16.mxu0 %v8317_v0  ;;  %v1626_v16 = vand.u32 4294901760, %v1603_v15 }
 0x1be   :  { %7240 = vmatpush3.bf16.msra.mxu1 %v7239_v21 }
 0x1bf   :  { %7241 = vmatprep.subr.bf16.mxu1 %v8317_v0 }
 0x1c0   :  { %7384 = vmatpush3.bf16.msra.mxu0 %v7239_v21  ;;  %v8924_v21 = vld [vmem:[#allocation5 + $0x1a0] sm:$0xff] }
 0x1c1   :  { %7385 = vmatprep.subr.bf16.mxu0 %v8317_v0  ;;  %v1629_v26 = vand.u32 4294901760, %v8924_v21 }
 0x1c2   :  { %7243 = vmatpush3.bf16.msra.mxu1 %v7242_v29 }
 0x1c3   :  { %7244 = vmatprep.subr.bf16.mxu1 %v8317_v0 }
 0x1c4   :  { %7387 = vmatpush3.bf16.msra.mxu0 %v7242_v29  ;;  %v1632_v29 = vand.u32 4294901760, %v8926_v25 }
 0x1c5   :  { %7388 = vmatprep.subr.bf16.mxu0 %v8317_v0 }
 0x1c6   :  { %7246 = vmatpush3.bf16.msra.mxu1 %v7245_v34  ;;  %v8934_v30 = vpack.c.bf16 %v1632_v29, %v1629_v26 }
 0x1c7   :  { %7247 = vmatprep.subr.bf16.mxu1 %v8317_v0 }
 0x1c8   :  { %7390 = vmatpush3.bf16.msra.mxu0 %v7245_v34  ;;  %v8938_v34 = vld [vmem:[#allocation5 + $0x1b8] sm:$0xff] }
 0x1c9   :  { %5806 = vmatmul.mubr.f32.vlgmr.msra.gmra.mrb[0].mxu1 %v8663_v12  ;;  %7391 = vmatprep.subr.bf16.mxu0 %v8317_v0 }
 0x1ca   :  { %7249 = vmatpush3.bf16.msra.mxu1 %v8401_v17  ;;  %5840 = vmatprep.mubr.msk.f32.mxu1 %vm8318_vm0, %v8319_v1 }
 0x1cb   :  { %6016 = vmatmul.mubr.f32.vlgmr.msra.gmra.mrb[2].mxu0 %v8668_v32  ;;  %7250 = vmatprep.subr.bf16.mxu1 %v8317_v0 }
 0x1cc   :  { %7393 = vmatpush3.bf16.msra.mxu0 %v8401_v17  ;;  %6050 = vmatprep.mubr.msk.f32.mxu0 %vm8318_vm0, %v8319_v1  ;;  %v1491_v17 = vld [vmem:[#allocation5 + $0x100] sm:$0xff] }
 0x1cd   :  { %7394 = vmatprep.subr.bf16.mxu0 %v8317_v0 }
 0x1ce   :  { %7252 = vmatpush3.bf16.msra.mxu1 %v8415_v36 }
 0x1cf   :  { %7253 = vmatprep.subr.bf16.mxu1 %v8317_v0 }
 0x1d0   :  { %7396 = vmatpush3.bf16.msra.mxu0 %v8415_v36  ;;  %v1492_v36 = vld [vmem:[#allocation5 + $0x108] sm:$0xff] }
 0x1d1   :  { %7397 = vmatprep.subr.bf16.mxu0 %v8317_v0 }
 0x1d2   :  { %7255 = vmatpush3.bf16.msra.mxu1 %v8427_v41 }
 0x1d3   :  { %7256 = vmatprep.subr.bf16.mxu1 %v8317_v0 }
 0x1d4   :  { %7399 = vmatpush3.bf16.msra.mxu0 %v8427_v41  ;;  %v7416_v41 = vpack.c.bf16 %v1492_v36, %v1491_v17  ;;  %v1635_v17 = vand.u32 4294901760, %v8936_v33  ;;  %v1638_v36 = vand.u32 4294901760, %v8938_v34 }
 0x1d5   :  { %7400 = vmatprep.subr.bf16.mxu0 %v8317_v0 }
 0x1d6   :  { %7258 = vmatpush3.bf16.msra.mxu1 %v8439_v46 }
 0x1d7   :  { %7259 = vmatprep.subr.bf16.mxu1 %v8317_v0 }
 0x1d8   :  { %7402 = vmatpush3.bf16.msra.mxu0 %v8439_v46  ;;  %v1493_v46 = vld [vmem:[#allocation5 + $0x110] sm:$0xff] }
 0x1d9   :  { %7403 = vmatprep.subr.bf16.mxu0 %v8317_v0 }
 0x1da   :  { %7261 = vmatpush3.bf16.msra.mxu1 %v8451_v51 }
 0x1db   :  { %7262 = vmatprep.subr.bf16.mxu1 %v8317_v0 }
 0x1dc   :  { %7405 = vmatpush3.bf16.msra.mxu0 %v8451_v51  ;;  %v1494_v51 = vld [vmem:[#allocation5 + $0x118] sm:$0xff] }
 0x1dd   :  { %7406 = vmatprep.subr.bf16.mxu0 %v8317_v0 }
 0x1de   :  { %7264 = vmatpush3.bf16.msra.mxu1 %v8463_v56 }
 0x1df   :  { %7265 = vmatprep.subr.bf16.mxu1 %v8317_v0 }
 0x1e0   :  { %7408 = vmatpush3.bf16.msra.mxu0 %v8463_v56  ;;  %v7419_v56 = vpack.c.bf16 %v1494_v51, %v1493_v46  ;;  %v8948_v46 = vld [vmem:[#allocation5 + $0x1c0] sm:$0xff]  ;;  %v8950_v51 = vld [vmem:[#allocation5 + $0x1c8] sm:$0xff] }
 0x1e1   :  { %7409 = vmatprep.subr.bf16.mxu0 %v8317_v0 }
 0x1e2   :  { %7267 = vmatpush3.bf16.msra.mxu1 %v8480_v3 }
 0x1e3   :  { %7268 = vmatprep.subr.bf16.mxu1 %v8317_v0 }
 0x1e4   :  { %7411 = vmatpush3.bf16.msra.mxu0 %v8480_v3  ;;  %v1495_v3 = vld [vmem:[#allocation5 + $0x120] sm:$0xff] }
 0x1e5   :  { %7412 = vmatprep.subr.bf16.mxu0 %v8317_v0 }
 0x1e6   :  { %7270 = vmatpush3.bf16.msra.mxu1 %v8489_v4 }
 0x1e7   :  { %7415 = vmatprep.subr.bf16.mxu1 %v8317_v0 }
 0x1e8   :  { %7414 = vmatpush3.bf16.msra.mxu0 %v8489_v4  ;;  %v1496_v4 = vld [vmem:[#allocation5 + $0x128] sm:$0xff] }
 0x1e9   :  { %5841 = vmatmul.mubr.f32.vlgmr.msra.gmra.mrb[0].mxu1 %v8663_v12  ;;  %7439 = vmatprep.subr.bf16.mxu0 %v8317_v0  ;;  %v7422_v44 = vpack.c.bf16 %v1496_v4, %v1495_v3  ;;  %v1468_v12 = vlaneseq  ;;  %v1644_v3 = vand.u32 4294901760, %v8950_v51 }
 0x1ea   :  { %7417 = vmatpush3.bf16.msra.mxu1 %v7416_v41  ;;  %6085 = vmatprep.mubr.msk.f32.mxu1 %vm8318_vm0, %v8319_v1  ;;  %v8946_v41 = vpack.c.bf16 %v1638_v36, %v1635_v17 }
 0x1eb   :  { %6051 = vmatmul.mubr.f32.vlgmr.msra.gmra.mrb[2].mxu0 %v8668_v32  ;;  %7418 = vmatprep.subr.bf16.mxu1 %v8317_v0  ;;  %v1469_v39 = vshrl.u32 %v1468_v12, 7 }
 0x1ec   :  { %6120 = vmatprep.mubr.msk.f32.mxu0 %vm8318_vm0, %v8319_v1  ;;  %7441 = vmatpush3.bf16.msra.mxu0 %v8909_v63 }
 0x1ed   :  { %7442 = vmatprep.subr.bf16.mxu0 %v8317_v0  ;;  %v8913_v37 = vsub.s32 0, %v1469_v39 }
 0x1ee   :  { %7420 = vmatpush3.bf16.msra.mxu1 %v7419_v56  ;;  %v1641_v56 = vand.u32 4294901760, %v8948_v46 }
 0x1ef   :  { %7421 = vmatprep.subr.bf16.mxu1 %v8317_v0 }
 0x1f0   :  { %v8958_v4 = vpack.c.bf16 %v1644_v3, %v1641_v56 }
 0x1f2   :  { %7423 = vmatpush3.bf16.msra.mxu1 %v7422_v44  ;;  %v8960_v44 = vld [vmem:[#allocation5 + $0x1d0] sm:$0xff] }
 0x1f3   :  { %7424 = vmatprep.subr.bf16.mxu1 %v8317_v0  ;;  %v1647_v50 = vand.u32 4294901760, %v8960_v44 }
 0x1f6   :  { %7426 = vmatpush3.bf16.msra.mxu1 %v7425_v13  ;;  %v1650_v13 = vand.u32 4294901760, %v8962_v45 }
 0x1f7   :  { %7427 = vmatprep.subr.bf16.mxu1 %v8317_v0 }
 0x1f8   :  { %v8970_v53 = vpack.c.bf16 %v1650_v13, %v1647_v50 }
 0x1fa   :  { %7429 = vmatpush3.bf16.msra.mxu1 %v7428_v23  ;;  %v8974_v23 = vld [vmem:[#allocation5 + $0x1e8] sm:$0xff] }
 0x1fb   :  { %7430 = vmatprep.subr.bf16.mxu1 %v8317_v0  ;;  %v1656_v57 = vand.u32 4294901760, %v8974_v23 }
 0x1fe   :  { %7432 = vmatpush3.bf16.msra.mxu1 %v7431_v58  ;;  %v8982_v58 = vpack.c.bf16 %v1656_v57, %v1653_v27 }
 0x1ff   :  { %7433 = vmatprep.subr.bf16.mxu1 %v8317_v0 }
 0x202   :  { %7435 = vmatpush3.bf16.msra.mxu1 %v7434_v43  ;;  %v1659_v43 = vand.u32 4294901760, %v8984_v62 }
 0x203   :  { %7436 = vmatprep.subr.bf16.mxu1 %v8317_v0 }
 0x204   :  { %v8993_v49 = vpack.c.bf16 %v1662_v48, %v1659_v43 }
 0x206   :  { %7438 = vmatpush3.bf16.msra.mxu1 %v7437_v18 }
 0x207   :  { %7583 = vmatprep.subr.bf16.mxu1 %v8317_v0 }
 0x2bc   :  { %v820_v11 = vpop.f32.mrb[0].mxu1 }
 0x2bd   :  { %v1465_v14 = vmul.f32 %v820_v11, %v820_v11  ;;  %v5842_v24 = vpop.f32.mrb[1].mxu1  ;;  %v1471_v35 = vrot.slane %v820_v11, %v8913_v37  ;;  %v8998_v11 = vsub.f32 %v1603_v15, %v1626_v16 }
 0x2be   :  { %v1461_v32 = vpop.f32.mrb[2].mxu0 }
 0x2bf   :  { %v1466_v40 = vsub.f32 %v1461_v32, %v1465_v14  ;;  %v6052_v60 = vpop.f32.mrb[3].mxu0  ;;  %v1472_v38 = vsub.f32 %v8639_v59, %v1471_v35  ;;  %v1623_v59 = vand.u32 4294901760, %v1602_v8  ;;  %v1731_v14 = vand.u32 4294901760, %v8998_v11 }
 0x2c0   :  { %v9016_v60 = vsub.f32 %v8926_v25, %v1632_v29 }
 0x2c1   :  { %v1467_v9 = vmax.f32 %v1466_v40, 0.0  ;;  %v1477_v22 = vmul.f32 %v4849_v2, %v1472_v38  ;;  %v8922_v20 = vpack.c.bf16 %v1626_v16, %v1623_v59  ;;  %v8996_v18 = vsub.f32 %v1602_v8, %v1623_v59 }
 0x2c2   :  { %v1732_v32 = vsub.f32 %v8998_v11, %v1731_v14  ;;  %v9013_v40 = vsub.f32 %v8924_v21, %v1629_v26  ;;  %v1745_v35 = vand.u32 4294901760, %v9016_v60  ;;  %v9042_v59 = vsub.f32 %v8948_v46, %v1641_v56 }
 0x2c3   :  { %v1478_v61 = vadd.f32 1e-05, %v1467_v9  ;;  %7444 = vmatpush3.bf16.msra.mxu0 %v8922_v20  ;;  %v1724_v12 = vand.u32 4294901760, %v8996_v18  ;;  %v9045_v16 = vsub.f32 %v8950_v51, %v1644_v3  ;;  %v9062_v46 = vsub.f32 %v8962_v45, %v1650_v13 }
 0x2c4   :  { %7445 = vmatprep.subr.bf16.mxu0 %v8317_v0  ;;  %v1733_v9 = vand.u32 4294901760, %v1732_v32  ;;  %v9955_v26 = vand.u32 4294901760, %v9042_v59  ;;  %v9077_v45 = vsub.f32 %v8972_v54, %v1653_v27  ;;  %v9093_v54 = vsub.f32 %v8986_v42, %v1662_v48 }
 0x2c5   :  { %8204 = vrsqrt.f32 %v1478_v61  ;;  %v1725_v24 = vsub.f32 %v8996_v18, %v1724_v12  ;;  %v1738_v61 = vand.u32 4294901760, %v9013_v40  ;;  %v9954_v29 = vand.u32 4294901760, %v9045_v16 }
 0x2c6   :  { %v9952_v32 = vand.u32 4294901760, %v9062_v46 }
 0x2c7   :  { %7447 = vmatpush3.bf16.msra.mxu0 %v8934_v30  ;;  %v1726_v39 = vand.u32 4294901760, %v1725_v24  ;;  %v1739_v2 = vsub.f32 %v9013_v40, %v1738_v61 }
 0x2c8   :  { %7448 = vmatprep.subr.bf16.mxu0 %v8317_v0 }
 0x2c9   :  { %v9020_v38 = vpack.c.bf16 %v1733_v9, %v1726_v39 }
 0x2cb   :  { %7450 = vmatpush3.bf16.msra.mxu0 %v8946_v41 }
 0x2cc   :  { %7451 = vmatprep.subr.bf16.mxu0 %v8317_v0 }
 0x2cf   :  { %v8205_v10 = vpop.eup %8204  ;;  %7453 = vmatpush3.bf16.msra.mxu0 %v8958_v4 }
 0x2d0   :  { %v1483_v31 = vrot.slane %v8205_v10, %v8913_v37  ;;  %7454 = vmatprep.subr.bf16.mxu0 %v8317_v0  ;;  %v1746_v10 = vsub.f32 %v9016_v60, %v1745_v35 }
 0x2d2   :  { %v1484_v5 = vmul.f32 %v1483_v31, %v1477_v22  ;;  %v9029_v22 = vsub.f32 %v8936_v33, %v1635_v17  ;;  %v9032_v31 = vsub.f32 %v8938_v34, %v1638_v36  ;;  %v1767_v34 = vsub.f32 %v9042_v59, %v9955_v26 }
 0x2d3   :  { %7456 = vmatpush3.bf16.msra.mxu0 %v8970_v53  ;;  %v1774_v17 = vsub.f32 %v9045_v16, %v9954_v29  ;;  %v9059_v36 = vsub.f32 %v8960_v44, %v1647_v50  ;;  %v1788_v44 = vsub.f32 %v9062_v46, %v9952_v32  ;;  %v9080_v50 = vsub.f32 %v8974_v23, %v1656_v57 }
 0x2d4   :  { %v1489_v6 = vadd.f32 %v4850_v47, %v1484_v5  ;;  %7457 = vmatprep.subr.bf16.mxu0 %v8317_v0  ;;  %v1740_v47 = vand.u32 4294901760, %v1739_v2  ;;  %v1747_v5 = vand.u32 4294901760, %v1746_v10  ;;  %v1768_v56 = vand.u32 4294901760, %v1767_v34 }
 0x2d5   :  { %v1775_v3 = vand.u32 4294901760, %v1774_v17  ;;  %v9953_v24 = vand.u32 4294901760, %v9059_v36  ;;  %v1789_v2 = vand.u32 4294901760, %v1788_v44  ;;  %v9951_v10 = vand.u32 4294901760, %v9077_v45 }
 0x2d6   :  { %v1490_v7 = vmax.f32 %v1489_v6, 0.0  ;;  %v1752_v6 = vand.u32 4294901760, %v9029_v22  ;;  %v9036_v8 = vpack.c.bf16 %v1747_v5, %v1740_v47  ;;  %v9950_v47 = vand.u32 4294901760, %v9080_v50 }
 0x2d7   :  { %7459 = vmatpush3.bf16.msra.mxu0 %v8982_v58  ;;  %v9068_v39 = vpack.c.bf16 %v1775_v3, %v1768_v56  ;;  %v1781_v9 = vsub.f32 %v9059_v36, %v9953_v24  ;;  %v9112_v56 = vpack.c.bf16 %v8998_v11, %v8996_v18  ;;  %v9116_v3 = vpack.c.bf16 %v9016_v60, %v9013_v40 }
 0x2d8   :  { %6086 = vmatmul.mubr.f32.vlgmr.msra.gmra.mrb[2].mxu1 %v1490_v7  ;;  %7460 = vmatprep.subr.bf16.mxu0 %v8317_v0  ;;  %v9956_v7 = vand.u32 4294901760, %v9032_v31  ;;  %v1753_v15 = vsub.f32 %v9029_v22, %v1752_v6  ;;  %v1802_v23 = vsub.f32 %v9080_v50, %v9950_v47  ;;  %v9124_v44 = vpack.c.bf16 %v9045_v16, %v9042_v59 }
 0x2d9   :  { %7585 = vmatpush3.bf16.msra.mxu1 %v8909_v63  ;;  %6330 = vmatprep.mubr.msk.f32.mxu1 %vm8318_vm0, %v8319_v1  ;;  %v1782_v13 = vand.u32 4294901760, %v1781_v9  ;;  %v9120_v9 = vpack.c.bf16 %v9032_v31, %v9029_v22  ;;  %v9147_v32 = vsub.f32 %v8899_v52, %v1617_v19  ;;  %v7542_v18 = vpack.c.bf16 %v1745_v35, %v1738_v61 }
 0x2da   :  { %7586 = vmatprep.subr.bf16.mxu1 %v8317_v0  ;;  %v1760_v21 = vsub.f32 %v9032_v31, %v9956_v7  ;;  %v1754_v25 = vand.u32 4294901760, %v1753_v15  ;;  %v1795_v15 = vsub.f32 %v9077_v45, %v9951_v10  ;;  %v9974_v11 = vand.u32 4294901760, %v9032_v31 }
 0x2db   :  { %7462 = vmatpush3.bf16.msra.mxu0 %v8993_v49  ;;  %v9084_v5 = vpack.c.bf16 %v1789_v2, %v1782_v13  ;;  %v9128_v13 = vpack.c.bf16 %v9062_v46, %v9059_v36  ;;  %v9132_v2 = vpack.c.bf16 %v9080_v50, %v9077_v45  ;;  %v1710_v29 = vand.u32 4294901760, %v9147_v32 }
 0x2dc   :  { %7463 = vmatprep.subr.bf16.mxu0 %v8317_v0  ;;  %v1761_v33 = vand.u32 4294901760, %v1760_v21  ;;  %v9090_v21 = vsub.f32 %v8984_v62, %v1659_v43  ;;  %v1796_v27 = vand.u32 4294901760, %v1795_v15  ;;  %v9976_v40 = vand.u32 4294901760, %v9045_v16 }
 0x2dd   :  { %7588 = vmatpush3.bf16.msra.mxu1 %v8922_v20  ;;  %v1711_v52 = vsub.f32 %v9147_v32, %v1710_v29  ;;  %v9977_v61 = vand.u32 4294901760, %v9059_v36  ;;  %v9978_v35 = vand.u32 4294901760, %v9062_v46  ;;  %v9979_v31 = vand.u32 4294901760, %v9077_v45 }
 0x2de   :  { %7589 = vmatprep.subr.bf16.mxu1 %v8317_v0  ;;  %v9064_v51 = vpack.c.bf16 %v1761_v33, %v1754_v25  ;;  %v9949_v57 = vand.u32 4294901760, %v9090_v21  ;;  %v9948_v25 = vand.u32 4294901760, %v9093_v54  ;;  %v1803_v33 = vand.u32 4294901760, %v1802_v23  ;;  %v4851_v23 = vld [vmem:[#allocation7 + $0x3] ss:$0 sm:$0xff] }
 0x2df   :  { %v9136_v15 = vpack.c.bf16 %v9093_v54, %v9090_v21  ;;  %v7551_v22 = vpack.c.bf16 %v9978_v35, %v9977_v61  ;;  %v9981_v16 = vand.u32 4294901760, %v9090_v21  ;;  %v9421_v61 = vld [vmem:[#allocation5 + $0x2a0] sm:$0xff]  ;;  %v9423_v35 = vld [vmem:[#allocation5 + $0x2a8] sm:$0xff] }
 0x2e0   :  { %v1809_v34 = vsub.f32 %v9090_v21, %v9949_v57  ;;  %v1816_v62 = vsub.f32 %v9093_v54, %v9948_v25  ;;  %v9106_v42 = vpack.c.bf16 %v1803_v33, %v1796_v27 }
 0x2e1   :  { %7591 = vmatpush3.bf16.msra.mxu1 %v8934_v30 }
 0x2e2   :  { %7592 = vmatprep.subr.bf16.mxu1 %v8317_v0  ;;  %v1810_v43 = vand.u32 4294901760, %v1809_v34  ;;  %v1817_v48 = vand.u32 4294901760, %v1816_v62 }
 0x2e4   :  { %v9108_v17 = vpack.c.bf16 %v1817_v48, %v1810_v43 }
 0x2e5   :  { %7594 = vmatpush3.bf16.msra.mxu1 %v8946_v41 }
 0x2e6   :  { %7595 = vmatprep.subr.bf16.mxu1 %v8317_v0 }
 0x2e9   :  { %7597 = vmatpush3.bf16.msra.mxu1 %v8958_v4 }
 0x2ea   :  { %7598 = vmatprep.subr.bf16.mxu1 %v8317_v0 }
 0x2ed   :  { %7600 = vmatpush3.bf16.msra.mxu1 %v8970_v53 }
 0x2ee   :  { %7601 = vmatprep.subr.bf16.mxu1 %v8317_v0 }
 0x2f1   :  { %7603 = vmatpush3.bf16.msra.mxu1 %v8982_v58 }
 0x2f2   :  { %7604 = vmatprep.subr.bf16.mxu1 %v8317_v0 }
 0x2f5   :  { %7606 = vmatpush3.bf16.msra.mxu1 %v8993_v49 }
 0x2f6   :  { %7607 = vmatprep.subr.bf16.mxu1 %v8317_v0 }
 0x3ab   :  { %v1578_v27 = vpop.f32.mrb[2].mxu1 }
 0x3ac   :  { %v1579_v33 = vadd.f32 %v4851_v23, %v1578_v27  ;;  %v6087_v34 = vpop.f32.mrb[3].mxu1  ;;  %v9152_v23 = vsub.f32 %v8901_v55, %v1620_v28 }
 0x3ae   :  { %v9138_v62 = vmax.f32 %v1579_v33, 0.0 }
 0x3b0   :  { %v1585_v43 = vrot.slane %v9138_v62, 4  ;;  %v1592_v48 = vmul.f32 %v9138_v62, %v9138_v62 }
 0x3b2   :  { %v1586_v25 = vadd.f32 %v1585_v43, %v9138_v62  ;;  %v1593_v57 = vrot.slane %v1592_v48, 4  ;;  %v1717_v43 = vand.u32 4294901760, %v9152_v23 }
 0x3b4   :  { %v1587_v47 = vrot.slane %v1586_v25, 2  ;;  %v1594_v10 = vadd.f32 %v1593_v57, %v1592_v48  ;;  %v1718_v55 = vsub.f32 %v9152_v23, %v1717_v43 }
 0x3b6   :  { %v1588_v27 = vadd.f32 %v1587_v47, %v1586_v25  ;;  %v1595_v33 = vrot.slane %v1594_v10, 2  ;;  %v1712_v25 = vand.u32 4294901760, %v1711_v52 }
 0x3b8   :  { %v1589_v34 = vrot.slane %v1588_v27, 1  ;;  %v1596_v24 = vadd.f32 %v1595_v33, %v1594_v10 }
 0x3ba   :  { %v1590_v26 = vadd.f32 %v1589_v34, %v1588_v27  ;;  %v1597_v57 = vrot.slane %v1596_v24, 1  ;;  %v1719_v27 = vand.u32 4294901760, %v1718_v55 }
 0x3bc   :  { %v1591_v48 = vmul.f32 0.125, %v1590_v26  ;;  %v1598_v7 = vadd.f32 %v1597_v57, %v1596_v24  ;;  %v7464_v57 = vpack.c.bf16 %v1719_v27, %v1712_v25 }
 0x3be   :  { %v9162_v19 = vand.u32 4294901760, %v1591_v48  ;;  %v1599_v28 = vmul.f32 0.125, %v1598_v7 }
 0x3c0   :  { %v9165_v10 = vsub.f32 %v1591_v48, %v9162_v19  ;;  %v9167_v47 = vand.u32 4294901760, %v1599_v28 }
 0x3c2   :  { %v1699_v26 = vand.u32 4294901760, %v9165_v10  ;;  %v9171_v24 = vsub.f32 %v1599_v28, %v9167_v47 }
 0x3c4   :  { %v1700_v33 = vsub.f32 %v9165_v10, %v1699_v26  ;;  %v2340_v34 = vand.u32 4294901760, %v9171_v24 }
 0x3c6   :  { %v1701_v7 = vand.u32 4294901760, %v1700_v33  ;;  %v2341_v48 = vsub.f32 %v9171_v24, %v2340_v34 }
 0x3c8   :  { %6121 = vmatmul.mubr.f32.vlgmr.msra.gmra.mrb[4].mxu0 %v1701_v7  ;;  %v2342_v52 = vand.u32 4294901760, %v2341_v48  ;;  %v4852_v7 = vld [vmem:[#allocation7 + $0x4] ss:$0 sm:$0xff] }
 0x3c9   :  { %7465 = vmatpush3.bf16.msra.mxu0 %v7464_v57  ;;  %6155 = vmatprep.mubr.msk.f32.mxu0 %vm8318_vm0, %v8319_v1 }
 0x3ca   :  { %6331 = vmatmul.mubr.f32.vlgmr.msra.gmra.mrb[4].mxu1 %v2342_v52  ;;  %7466 = vmatprep.subr.bf16.mxu0 %v8317_v0 }
 0x3cb   :  { %7609 = vmatpush3.bf16.msra.mxu1 %v7464_v57  ;;  %6365 = vmatprep.mubr.msk.f32.mxu1 %vm8318_vm0, %v8319_v1 }
 0x3cc   :  { %7610 = vmatprep.subr.bf16.mxu1 %v8317_v0 }
 0x3cd   :  { %7468 = vmatpush3.bf16.msra.mxu0 %v9020_v38 }
 0x3ce   :  { %7469 = vmatprep.subr.bf16.mxu0 %v8317_v0 }
 0x3cf   :  { %7612 = vmatpush3.bf16.msra.mxu1 %v9020_v38  ;;  %v7488_v38 = vpack.c.bf16 %v9152_v23, %v9147_v32  ;;  %v2930_v32 = vld [vmem:[#allocation5 + $0x230] sm:$0xff]  ;;  %v9400_v23 = vld [vmem:[#allocation5 + $0x288] sm:$0xff] }
 0x3d0   :  { %7613 = vmatprep.subr.bf16.mxu1 %v8317_v0  ;;  %v3053_v55 = vand.u32 4294901760, %v9400_v23 }
 0x3d1   :  { %7471 = vmatpush3.bf16.msra.mxu0 %v9036_v8 }
 0x3d2   :  { %7472 = vmatprep.subr.bf16.mxu0 %v8317_v0 }
 0x3d3   :  { %7615 = vmatpush3.bf16.msra.mxu1 %v9036_v8  ;;  %v7536_v8 = vpack.c.bf16 %v1717_v43, %v1710_v29  ;;  %v9982_v29 = vand.u32 4294901760, %v9093_v54  ;;  %v2934_v54 = vld [vmem:[#allocation5 + $0x250] sm:$0xff] }
 0x3d4   :  { %7616 = vmatprep.subr.bf16.mxu1 %v8317_v0 }
 0x3d5   :  { %7474 = vmatpush3.bf16.msra.mxu0 %v9064_v51  ;;  %v7557_v36 = vpack.c.bf16 %v9982_v29, %v9981_v16  ;;  %v9435_v16 = vld [vmem:[#allocation5 + $0x2b8] sm:$0xff] }
 0x3d6   :  { %7475 = vmatprep.subr.bf16.mxu0 %v8317_v0 }
 0x3d7   :  { %7618 = vmatpush3.bf16.msra.mxu1 %v9064_v51  ;;  %v7539_v51 = vpack.c.bf16 %v1731_v14, %v1724_v12  ;;  %v7545_v12 = vpack.c.bf16 %v9974_v11, %v1752_v6  ;;  %v9975_v14 = vand.u32 4294901760, %v9042_v59  ;;  %v9980_v6 = vand.u32 4294901760, %v9080_v50  ;;  %v2932_v50 = vld [vmem:[#allocation5 + $0x240] sm:$0xff] }
 0x3d8   :  { %7619 = vmatprep.subr.bf16.mxu1 %v8317_v0 }
 0x3d9   :  { %7477 = vmatpush3.bf16.msra.mxu0 %v9068_v39  ;;  %v7548_v60 = vpack.c.bf16 %v9976_v40, %v9975_v14  ;;  %v7554_v59 = vpack.c.bf16 %v9980_v6, %v9979_v31  ;;  %v3036_v14 = vld [vmem:[#allocation5 + $0x298] sm:$0xff]  ;;  %v3065_v31 = vand.u32 4294901760, %v9423_v35 }
 0x3da   :  { %7478 = vmatprep.subr.bf16.mxu0 %v8317_v0  ;;  %v3059_v40 = vand.u32 4294901760, %v3036_v14 }
 0x3db   :  { %7621 = vmatpush3.bf16.msra.mxu1 %v9068_v39  ;;  %v2931_v39 = vld [vmem:[#allocation5 + $0x238] sm:$0xff] }
 0x3dc   :  { %7622 = vmatprep.subr.bf16.mxu1 %v8317_v0  ;;  %v7737_v45 = vpack.c.bf16 %v2931_v39, %v2930_v32 }
 0x3dd   :  { %7480 = vmatpush3.bf16.msra.mxu0 %v9084_v5 }
 0x3de   :  { %7481 = vmatprep.subr.bf16.mxu0 %v8317_v0 }
 0x3df   :  { %7624 = vmatpush3.bf16.msra.mxu1 %v9084_v5  ;;  %v2933_v5 = vld [vmem:[#allocation5 + $0x248] sm:$0xff] }
 0x3e0   :  { %7625 = vmatprep.subr.bf16.mxu1 %v8317_v0  ;;  %v7740_v21 = vpack.c.bf16 %v2933_v5, %v2932_v50  ;;  %v9471_v50 = vld [vmem:[#allocation5 + $0x2e8] sm:$0xff] }
 0x3e1   :  { %7483 = vmatpush3.bf16.msra.mxu0 %v9106_v42 }
 0x3e2   :  { %7484 = vmatprep.subr.bf16.mxu0 %v8317_v0 }
 0x3e3   :  { %7627 = vmatpush3.bf16.msra.mxu1 %v9106_v42  ;;  %v2935_v42 = vld [vmem:[#allocation5 + $0x258] sm:$0xff] }
 0x3e4   :  { %7628 = vmatprep.subr.bf16.mxu1 %v8317_v0 }
 0x3e5   :  { %7486 = vmatpush3.bf16.msra.mxu0 %v9108_v17 }
 0x3e6   :  { %7487 = vmatprep.subr.bf16.mxu0 %v8317_v0 }
 0x3e7   :  { %7630 = vmatpush3.bf16.msra.mxu1 %v9108_v17  ;;  %v7743_v17 = vpack.c.bf16 %v2935_v42, %v2934_v54  ;;  %v9481_v42 = vld [vmem:[#allocation5 + $0x2f0] sm:$0xff] }
 0x3e8   :  { %6156 = vmatmul.mubr.f32.vlgmr.msra.gmra.mrb[4].mxu0 %v9162_v19  ;;  %7631 = vmatprep.subr.bf16.mxu1 %v8317_v0 }
 0x3e9   :  { %7489 = vmatpush3.bf16.msra.mxu0 %v7488_v38  ;;  %6190 = vmatprep.mubr.msk.f32.mxu0 %vm8318_vm0, %v8319_v1 }
 0x3ea   :  { %6366 = vmatmul.mubr.f32.vlgmr.msra.gmra.mrb[4].mxu1 %v9167_v47  ;;  %7490 = vmatprep.subr.bf16.mxu0 %v8317_v0 }
 0x3eb   :  { %7633 = vmatpush3.bf16.msra.mxu1 %v7488_v38  ;;  %6400 = vmatprep.mubr.msk.f32.mxu1 %vm8318_vm0, %v8319_v1 }
 0x3ec   :  { %7634 = vmatprep.subr.bf16.mxu1 %v8317_v0 }
 0x3ed   :  { %7492 = vmatpush3.bf16.msra.mxu0 %v9112_v56 }
 0x3ee   :  { %7493 = vmatprep.subr.bf16.mxu0 %v8317_v0 }
 0x3ef   :  { %7636 = vmatpush3.bf16.msra.mxu1 %v9112_v56  ;;  %v2936_v56 = vld [vmem:[#allocation5 + $0x260] sm:$0xff] }
 0x3f0   :  { %7637 = vmatprep.subr.bf16.mxu1 %v8317_v0 }
 0x3f1   :  { %7495 = vmatpush3.bf16.msra.mxu0 %v9116_v3 }
 0x3f2   :  { %7496 = vmatprep.subr.bf16.mxu0 %v8317_v0 }
 0x3f3   :  { %7639 = vmatpush3.bf16.msra.mxu1 %v9116_v3  ;;  %v2937_v3 = vld [vmem:[#allocation5 + $0x268] sm:$0xff] }
 0x3f4   :  { %7640 = vmatprep.subr.bf16.mxu1 %v8317_v0 }
 0x3f5   :  { %7498 = vmatpush3.bf16.msra.mxu0 %v9120_v9 }
 0x3f6   :  { %7499 = vmatprep.subr.bf16.mxu0 %v8317_v0 }
 0x3f7   :  { %7642 = vmatpush3.bf16.msra.mxu1 %v9120_v9  ;;  %v7746_v9 = vpack.c.bf16 %v2937_v3, %v2936_v56  ;;  %v3092_v56 = vand.u32 4294901760, %v9481_v42 }
 0x3f8   :  { %7643 = vmatprep.subr.bf16.mxu1 %v8317_v0 }
 0x3f9   :  { %7501 = vmatpush3.bf16.msra.mxu0 %v9124_v44 }
 0x3fa   :  { %7502 = vmatprep.subr.bf16.mxu0 %v8317_v0 }
 0x3fb   :  { %7645 = vmatpush3.bf16.msra.mxu1 %v9124_v44  ;;  %v2938_v44 = vld [vmem:[#allocation5 + $0x270] sm:$0xff] }
 0x3fc   :  { %7646 = vmatprep.subr.bf16.mxu1 %v8317_v0 }
 0x3fd   :  { %7504 = vmatpush3.bf16.msra.mxu0 %v9128_v13 }
 0x3fe   :  { %7505 = vmatprep.subr.bf16.mxu0 %v8317_v0 }
 0x3ff   :  { %7648 = vmatpush3.bf16.msra.mxu1 %v9128_v13  ;;  %v2939_v13 = vld [vmem:[#allocation5 + $0x278] sm:$0xff] }
 0x400   :  { %7649 = vmatprep.subr.bf16.mxu1 %v8317_v0 }
 0x401   :  { %7507 = vmatpush3.bf16.msra.mxu0 %v9132_v2 }
 0x402   :  { %7508 = vmatprep.subr.bf16.mxu0 %v8317_v0 }
 0x403   :  { %7651 = vmatpush3.bf16.msra.mxu1 %v9132_v2  ;;  %v7749_v2 = vpack.c.bf16 %v2939_v13, %v2938_v44  ;;  %v9495_v13 = vsub.f32 %v3036_v14, %v3059_v40 }
 0x404   :  { %7652 = vmatprep.subr.bf16.mxu1 %v8317_v0 }
 0x405   :  { %7510 = vmatpush3.bf16.msra.mxu0 %v9136_v15 }
 0x406   :  { %7511 = vmatprep.subr.bf16.mxu0 %v8317_v0 }
 0x407   :  { %7654 = vmatpush3.bf16.msra.mxu1 %v9136_v15  ;;  %v9398_v15 = vld [vmem:[#allocation5 + $0x280] sm:$0xff] }
 0x408   :  { %6191 = vmatmul.mubr.f32.vlgmr.msra.gmra.mrb[4].mxu0 %v9165_v10  ;;  %7655 = vmatprep.subr.bf16.mxu1 %v8317_v0  ;;  %v3050_v43 = vand.u32 4294901760, %v9398_v15 }
 0x409   :  { %7513 = vmatpush3.bf16.msra.mxu0 %v8909_v63  ;;  %6225 = vmatprep.mubr.msk.f32.mxu0 %vm8318_vm0, %v8319_v1 }
 0x40a   :  { %6401 = vmatmul.mubr.f32.vlgmr.msra.gmra.mrb[4].mxu1 %v9171_v24  ;;  %7514 = vmatprep.subr.bf16.mxu0 %v8317_v0 }
 0x40b   :  { %7657 = vmatpush3.bf16.msra.mxu1 %v8909_v63  ;;  %6435 = vmatprep.mubr.msk.f32.mxu1 %vm8318_vm0, %v8319_v1 }
 0x40c   :  { %7658 = vmatprep.subr.bf16.mxu1 %v8317_v0 }
 0x40d   :  { %7516 = vmatpush3.bf16.msra.mxu0 %v8922_v20 }
 0x40e   :  { %7517 = vmatprep.subr.bf16.mxu0 %v8317_v0 }
 0x40f   :  { %7660 = vmatpush3.bf16.msra.mxu1 %v8922_v20 }
 0x410   :  { %7661 = vmatprep.subr.bf16.mxu1 %v8317_v0 }
 0x411   :  { %7519 = vmatpush3.bf16.msra.mxu0 %v8934_v30 }
 0x412   :  { %7520 = vmatprep.subr.bf16.mxu0 %v8317_v0 }
 0x413   :  { %7663 = vmatpush3.bf16.msra.mxu1 %v8934_v30 }
 0x414   :  { %7664 = vmatprep.subr.bf16.mxu1 %v8317_v0 }
 0x415   :  { %7522 = vmatpush3.bf16.msra.mxu0 %v8946_v41 }
 0x416   :  { %7523 = vmatprep.subr.bf16.mxu0 %v8317_v0 }
 0x417   :  { %7666 = vmatpush3.bf16.msra.mxu1 %v8946_v41 }
 0x418   :  { %7667 = vmatprep.subr.bf16.mxu1 %v8317_v0 }
 0x419   :  { %7525 = vmatpush3.bf16.msra.mxu0 %v8958_v4 }
 0x41a   :  { %7526 = vmatprep.subr.bf16.mxu0 %v8317_v0 }
 0x41b   :  { %7669 = vmatpush3.bf16.msra.mxu1 %v8958_v4 }
 0x41c   :  { %7670 = vmatprep.subr.bf16.mxu1 %v8317_v0 }
 0x41d   :  { %7528 = vmatpush3.bf16.msra.mxu0 %v8970_v53 }
 0x41e   :  { %7529 = vmatprep.subr.bf16.mxu0 %v8317_v0 }
 0x41f   :  { %7672 = vmatpush3.bf16.msra.mxu1 %v8970_v53 }
 0x420   :  { %7673 = vmatprep.subr.bf16.mxu1 %v8317_v0 }
 0x421   :  { %7531 = vmatpush3.bf16.msra.mxu0 %v8982_v58 }
 0x422   :  { %7532 = vmatprep.subr.bf16.mxu0 %v8317_v0 }
 0x423   :  { %7675 = vmatpush3.bf16.msra.mxu1 %v8982_v58 }
 0x424   :  { %7676 = vmatprep.subr.bf16.mxu1 %v8317_v0 }
 0x425   :  { %7534 = vmatpush3.bf16.msra.mxu0 %v8993_v49 }
 0x426   :  { %7535 = vmatprep.subr.bf16.mxu0 %v8317_v0 }
 0x427   :  { %7678 = vmatpush3.bf16.msra.mxu1 %v8993_v49 }
 0x428   :  { %6226 = vmatmul.mubr.f32.vlgmr.msra.gmra.mrb[4].mxu0 %v1699_v26  ;;  %7679 = vmatprep.subr.bf16.mxu1 %v8317_v0 }
 0x429   :  { %7537 = vmatpush3.bf16.msra.mxu0 %v7536_v8  ;;  %6260 = vmatprep.mubr.msk.f32.mxu0 %vm8318_vm0, %v8319_v1 }
 0x42a   :  { %6436 = vmatmul.mubr.f32.vlgmr.msra.gmra.mrb[4].mxu1 %v2340_v34  ;;  %7538 = vmatprep.subr.bf16.mxu0 %v8317_v0 }
 0x42b   :  { %7681 = vmatpush3.bf16.msra.mxu1 %v7536_v8  ;;  %6470 = vmatprep.mubr.msk.f32.mxu1 %vm8318_vm0, %v8319_v1  ;;  %v4853_v8 = vld [vmem:[#allocation7 + $0x5] ss:$0 sm:$0xff] }
 0x42c   :  { %7682 = vmatprep.subr.bf16.mxu1 %v8317_v0 }
 0x42d   :  { %7540 = vmatpush3.bf16.msra.mxu0 %v7539_v51 }
 0x42e   :  { %7541 = vmatprep.subr.bf16.mxu0 %v8317_v0 }
 0x42f   :  { %7684 = vmatpush3.bf16.msra.mxu1 %v7539_v51 }
 0x430   :  { %7685 = vmatprep.subr.bf16.mxu1 %v8317_v0 }
 0x431   :  { %7543 = vmatpush3.bf16.msra.mxu0 %v7542_v18 }
 0x432   :  { %7544 = vmatprep.subr.bf16.mxu0 %v8317_v0 }
 0x433   :  { %7687 = vmatpush3.bf16.msra.mxu1 %v7542_v18 }
 0x434   :  { %7688 = vmatprep.subr.bf16.mxu1 %v8317_v0 }
 0x435   :  { %7546 = vmatpush3.bf16.msra.mxu0 %v7545_v12 }
 0x436   :  { %7547 = vmatprep.subr.bf16.mxu0 %v8317_v0 }
 0x437   :  { %7690 = vmatpush3.bf16.msra.mxu1 %v7545_v12  ;;  %v3035_v12 = vld [vmem:[#allocation5 + $0x290] sm:$0xff] }
 0x438   :  { %7691 = vmatprep.subr.bf16.mxu1 %v8317_v0 }
 0x439   :  { %7549 = vmatpush3.bf16.msra.mxu0 %v7548_v60 }
 0x43a   :  { %7550 = vmatprep.subr.bf16.mxu0 %v8317_v0 }
 0x43b   :  { %7693 = vmatpush3.bf16.msra.mxu1 %v7548_v60 }
 0x43c   :  { %7694 = vmatprep.subr.bf16.mxu1 %v8317_v0 }
 0x43d   :  { %7552 = vmatpush3.bf16.msra.mxu0 %v7551_v22 }
 0x43e   :  { %7553 = vmatprep.subr.bf16.mxu0 %v8317_v0 }
 0x43f   :  { %7696 = vmatpush3.bf16.msra.mxu1 %v7551_v22  ;;  %v3062_v22 = vand.u32 4294901760, %v9421_v61 }
 0x440   :  { %7697 = vmatprep.subr.bf16.mxu1 %v8317_v0 }
 0x441   :  { %7555 = vmatpush3.bf16.msra.mxu0 %v7554_v59  ;;  %v9431_v6 = vpack.c.bf16 %v3065_v31, %v3062_v22 }
 0x442   :  { %7556 = vmatprep.subr.bf16.mxu0 %v8317_v0 }
 0x443   :  { %7699 = vmatpush3.bf16.msra.mxu1 %v7554_v59  ;;  %v9433_v59 = vld [vmem:[#allocation5 + $0x2b0] sm:$0xff] }
 0x444   :  { %7700 = vmatprep.subr.bf16.mxu1 %v8317_v0  ;;  %v3068_v29 = vand.u32 4294901760, %v9433_v59 }
 0x445   :  { %7558 = vmatpush3.bf16.msra.mxu0 %v7557_v36 }
 0x446   :  { %7559 = vmatprep.subr.bf16.mxu0 %v8317_v0 }
 0x447   :  { %7702 = vmatpush3.bf16.msra.mxu1 %v7557_v36  ;;  %v3071_v36 = vand.u32 4294901760, %v9435_v16 }
 0x448   :  { %6261 = vmatmul.mubr.f32.vlgmr.msra.gmra.mrb[4].mxu0 %v9162_v19  ;;  %7703 = vmatprep.subr.bf16.mxu1 %v8317_v0 }
 0x449   :  { %7561 = vmatpush3.bf16.msra.mxu0 %v8909_v63  ;;  %6295 = vmatprep.mubr.msk.f32.mxu0 %vm8318_vm0, %v8319_v1 }
 0x44a   :  { %6471 = vmatmul.mubr.f32.vlgmr.msra.gmra.mrb[4].mxu1 %v9167_v47  ;;  %7562 = vmatprep.subr.bf16.mxu0 %v8317_v0 }
 0x44b   :  { %7705 = vmatpush3.bf16.msra.mxu1 %v8909_v63  ;;  %6505 = vmatprep.mubr.msk.f32.mxu1 %vm8318_vm0, %v8319_v1  ;;  %v2924_v63 = vld [vmem:[#allocation5 + $0x200] sm:$0xff] }
 0x44c   :  { %7706 = vmatprep.subr.bf16.mxu1 %v8317_v0 }
 0x44d   :  { %7564 = vmatpush3.bf16.msra.mxu0 %v8922_v20 }
 0x44e   :  { %7565 = vmatprep.subr.bf16.mxu0 %v8317_v0 }
 0x44f   :  { %7708 = vmatpush3.bf16.msra.mxu1 %v8922_v20  ;;  %v2925_v20 = vld [vmem:[#allocation5 + $0x208] sm:$0xff] }
 0x450   :  { %7709 = vmatprep.subr.bf16.mxu1 %v8317_v0 }
 0x451   :  { %7567 = vmatpush3.bf16.msra.mxu0 %v8934_v30 }
 0x452   :  { %7568 = vmatprep.subr.bf16.mxu0 %v8317_v0 }
 0x453   :  { %7711 = vmatpush3.bf16.msra.mxu1 %v8934_v30  ;;  %v7728_v30 = vpack.c.bf16 %v2925_v20, %v2924_v63  ;;  %v9443_v63 = vpack.c.bf16 %v3071_v36, %v3068_v29  ;;  %v9445_v20 = vld [vmem:[#allocation5 + $0x2c0] sm:$0xff] }
 0x454   :  { %7712 = vmatprep.subr.bf16.mxu1 %v8317_v0 }
 0x455   :  { %7570 = vmatpush3.bf16.msra.mxu0 %v8946_v41 }
 0x456   :  { %7571 = vmatprep.subr.bf16.mxu0 %v8317_v0 }
 0x457   :  { %7714 = vmatpush3.bf16.msra.mxu1 %v8946_v41  ;;  %v2926_v41 = vld [vmem:[#allocation5 + $0x210] sm:$0xff] }
 0x458   :  { %7715 = vmatprep.subr.bf16.mxu1 %v8317_v0 }
 0x459   :  { %7573 = vmatpush3.bf16.msra.mxu0 %v8958_v4 }
 0x45a   :  { %7574 = vmatprep.subr.bf16.mxu0 %v8317_v0 }
 0x45b   :  { %7717 = vmatpush3.bf16.msra.mxu1 %v8958_v4  ;;  %v2927_v4 = vld [vmem:[#allocation5 + $0x218] sm:$0xff] }
 0x45c   :  { %7718 = vmatprep.subr.bf16.mxu1 %v8317_v0 }
 0x45d   :  { %7576 = vmatpush3.bf16.msra.mxu0 %v8970_v53 }
 0x45e   :  { %7577 = vmatprep.subr.bf16.mxu0 %v8317_v0 }
 0x45f   :  { %7720 = vmatpush3.bf16.msra.mxu1 %v8970_v53  ;;  %v7731_v53 = vpack.c.bf16 %v2927_v4, %v2926_v41  ;;  %v3074_v41 = vand.u32 4294901760, %v9445_v20 }
 0x460   :  { %7721 = vmatprep.subr.bf16.mxu1 %v8317_v0 }
 0x461   :  { %7579 = vmatpush3.bf16.msra.mxu0 %v8982_v58 }
 0x462   :  { %7580 = vmatprep.subr.bf16.mxu0 %v8317_v0 }
 0x463   :  { %7723 = vmatpush3.bf16.msra.mxu1 %v8982_v58  ;;  %v2928_v58 = vld [vmem:[#allocation5 + $0x220] sm:$0xff] }
 0x464   :  { %7724 = vmatprep.subr.bf16.mxu1 %v8317_v0 }
 0x465   :  { %7582 = vmatpush3.bf16.msra.mxu0 %v8993_v49 }
 0x466   :  { %7727 = vmatprep.subr.bf16.mxu0 %v8317_v0 }
 0x467   :  { %7726 = vmatpush3.bf16.msra.mxu1 %v8993_v49  ;;  %v2929_v49 = vld [vmem:[#allocation5 + $0x228] sm:$0xff] }
 0x468   :  { %6296 = vmatmul.mubr.f32.vlgmr.msra.gmra.mrb[4].mxu0 %v9162_v19  ;;  %7751 = vmatprep.subr.bf16.mxu1 %v8317_v0  ;;  %v7734_v46 = vpack.c.bf16 %v2929_v49, %v2928_v58  ;;  %v9408_v19 = vpack.c.bf16 %v3053_v55, %v3050_v43  ;;  %v9457_v58 = vld [vmem:[#allocation5 + $0x2d0] sm:$0xff]  ;;  %v9459_v49 = vld [vmem:[#allocation5 + $0x2d8] sm:$0xff] }
 0x469   :  { %7729 = vmatpush3.bf16.msra.mxu0 %v7728_v30  ;;  %6540 = vmatprep.mubr.msk.f32.mxu0 %vm8318_vm0, %v8319_v1  ;;  %v9447_v30 = vld [vmem:[#allocation5 + $0x2c8] sm:$0xff]  ;;  %v3083_v32 = vand.u32 4294901760, %v9459_v49 }
 0x46a   :  { %6506 = vmatmul.mubr.f32.vlgmr.msra.gmra.mrb[4].mxu1 %v9167_v47  ;;  %7730 = vmatprep.subr.bf16.mxu0 %v8317_v0  ;;  %v3077_v4 = vand.u32 4294901760, %v9447_v30 }
 0x46b   :  { %6575 = vmatprep.mubr.msk.f32.mxu1 %vm8318_vm0, %v8319_v1  ;;  %7753 = vmatpush3.bf16.msra.mxu1 %v9408_v19 }
 0x46c   :  { %7754 = vmatprep.subr.bf16.mxu1 %v8317_v0 }
 0x46d   :  { %7732 = vmatpush3.bf16.msra.mxu0 %v7731_v53  ;;  %v9455_v53 = vpack.c.bf16 %v3077_v4, %v3074_v41 }
 0x46e   :  { %7733 = vmatprep.subr.bf16.mxu0 %v8317_v0 }
 0x471   :  { %7735 = vmatpush3.bf16.msra.mxu0 %v7734_v46  ;;  %v3080_v46 = vand.u32 4294901760, %v9457_v58 }
 0x472   :  { %7736 = vmatprep.subr.bf16.mxu0 %v8317_v0 }
 0x473   :  { %v9467_v39 = vpack.c.bf16 %v3083_v32, %v3080_v46 }
 0x475   :  { %7738 = vmatpush3.bf16.msra.mxu0 %v7737_v45  ;;  %v9469_v45 = vld [vmem:[#allocation5 + $0x2e0] sm:$0xff] }
 0x476   :  { %7739 = vmatprep.subr.bf16.mxu0 %v8317_v0  ;;  %v3086_v5 = vand.u32 4294901760, %v9469_v45 }
 0x479   :  { %7741 = vmatpush3.bf16.msra.mxu0 %v7740_v21  ;;  %v3089_v21 = vand.u32 4294901760, %v9471_v50 }
 0x47a   :  { %7742 = vmatprep.subr.bf16.mxu0 %v8317_v0 }
 0x47b   :  { %v9479_v54 = vpack.c.bf16 %v3089_v21, %v3086_v5 }
 0x47d   :  { %7744 = vmatpush3.bf16.msra.mxu0 %v7743_v17  ;;  %v9483_v17 = vld [vmem:[#allocation5 + $0x2f8] sm:$0xff] }
 0x47e   :  { %7745 = vmatprep.subr.bf16.mxu0 %v8317_v0  ;;  %v3095_v3 = vand.u32 4294901760, %v9483_v17 }
 0x481   :  { %7747 = vmatpush3.bf16.msra.mxu0 %v7746_v9  ;;  %v9490_v9 = vpack.c.bf16 %v3095_v3, %v3092_v56 }
 0x482   :  { %7748 = vmatprep.subr.bf16.mxu0 %v8317_v0 }
 0x485   :  { %7750 = vmatpush3.bf16.msra.mxu0 %v7749_v2 }
 0x486   :  { %7895 = vmatprep.subr.bf16.mxu0 %v8317_v0 }
 0x53b   :  { %v2253_v28 = vpop.f32.mrb[4].mxu0 }
 0x53c   :  { %v2898_v10 = vmul.f32 %v2253_v28, %v2253_v28  ;;  %v6297_v47 = vpop.f32.mrb[5].mxu0  ;;  %v2904_v34 = vrot.slane %v2253_v28, %v8913_v37  ;;  %v3164_v28 = vand.u32 4294901760, %v9495_v13 }
 0x53d   :  { %v2894_v25 = vpop.f32.mrb[4].mxu1 }
 0x53e   :  { %v2899_v27 = vsub.f32 %v2894_v25, %v2898_v10  ;;  %v6507_v26 = vpop.f32.mrb[5].mxu1  ;;  %v2905_v57 = vsub.f32 %v9138_v62, %v2904_v34  ;;  %v3056_v62 = vand.u32 4294901760, %v3035_v12  ;;  %v3165_v47 = vsub.f32 %v9495_v13, %v3164_v28 }
 0x53f   :  { %v9510_v25 = vsub.f32 %v9421_v61, %v3062_v22 }
 0x540   :  { %v2900_v24 = vmax.f32 %v2899_v27, 0.0  ;;  %v2910_v52 = vmul.f32 %v4852_v7, %v2905_v57  ;;  %v9419_v60 = vpack.c.bf16 %v3059_v40, %v3056_v62  ;;  %v9493_v44 = vsub.f32 %v3035_v12, %v3056_v62 }
 0x541   :  { %v9513_v27 = vsub.f32 %v9423_v35, %v3065_v31  ;;  %v9539_v62 = vsub.f32 %v9445_v20, %v3074_v41  ;;  %v9542_v40 = vsub.f32 %v9447_v30, %v3077_v4  ;;  %v9559_v20 = vsub.f32 %v9459_v49, %v3083_v32 }
 0x542   :  { %v2911_v33 = vadd.f32 1e-05, %v2900_v24  ;;  %7756 = vmatpush3.bf16.msra.mxu1 %v9419_v60  ;;  %v3157_v2 = vand.u32 4294901760, %v9493_v44  ;;  %v3166_v24 = vand.u32 4294901760, %v3165_v47  ;;  %v9574_v49 = vsub.f32 %v9469_v45, %v3086_v5 }
 0x543   :  { %7757 = vmatprep.subr.bf16.mxu1 %v8317_v0  ;;  %v3178_v34 = vand.u32 4294901760, %v9513_v27  ;;  %v9964_v22 = vand.u32 4294901760, %v9539_v62  ;;  %v9963_v31 = vand.u32 4294901760, %v9542_v40  ;;  %v9961_v47 = vand.u32 4294901760, %v9559_v20 }
 0x544   :  { %8206 = vrsqrt.f32 %v2911_v33  ;;  %v3158_v10 = vsub.f32 %v9493_v44, %v3157_v2  ;;  %v3171_v33 = vand.u32 4294901760, %v9510_v25  ;;  %v9590_v45 = vsub.f32 %v9483_v17, %v3095_v3 }
 0x546   :  { %7759 = vmatpush3.bf16.msra.mxu1 %v9431_v6  ;;  %v3159_v26 = vand.u32 4294901760, %v3158_v10  ;;  %v3172_v7 = vsub.f32 %v9510_v25, %v3171_v33 }
 0x547   :  { %7760 = vmatprep.subr.bf16.mxu1 %v8317_v0 }
 0x548   :  { %v9517_v57 = vpack.c.bf16 %v3166_v24, %v3159_v26 }
 0x54a   :  { %7762 = vmatpush3.bf16.msra.mxu1 %v9443_v63 }
 0x54b   :  { %7763 = vmatprep.subr.bf16.mxu1 %v8317_v0 }
 0x54e   :  { %v8207_v48 = vpop.eup %8206  ;;  %7765 = vmatpush3.bf16.msra.mxu1 %v9455_v53 }
 0x54f   :  { %v2916_v38 = vrot.slane %v8207_v48, %v8913_v37  ;;  %7766 = vmatprep.subr.bf16.mxu1 %v8317_v0  ;;  %v3179_v48 = vsub.f32 %v9513_v27, %v3178_v34 }
 0x551   :  { %v2917_v51 = vmul.f32 %v2916_v38, %v2910_v52  ;;  %v9526_v52 = vsub.f32 %v9433_v59, %v3068_v29  ;;  %v9529_v38 = vsub.f32 %v9435_v16, %v3071_v36  ;;  %v3200_v16 = vsub.f32 %v9539_v62, %v9964_v22 }
 0x552   :  { %7768 = vmatpush3.bf16.msra.mxu1 %v9467_v39  ;;  %v3207_v29 = vsub.f32 %v9542_v40, %v9963_v31  ;;  %v9556_v36 = vsub.f32 %v9457_v58, %v3080_v46  ;;  %v3221_v58 = vsub.f32 %v9559_v20, %v9961_v47  ;;  %v9577_v46 = vsub.f32 %v9471_v50, %v3089_v21 }
 0x553   :  { %v2922_v18 = vadd.f32 %v4853_v8, %v2917_v51  ;;  %7769 = vmatprep.subr.bf16.mxu1 %v8317_v0  ;;  %v3173_v8 = vand.u32 4294901760, %v3172_v7  ;;  %v3180_v51 = vand.u32 4294901760, %v3179_v48  ;;  %v3201_v41 = vand.u32 4294901760, %v3200_v16 }
 0x554   :  { %v3208_v4 = vand.u32 4294901760, %v3207_v29  ;;  %v9962_v10 = vand.u32 4294901760, %v9556_v36  ;;  %v3222_v7 = vand.u32 4294901760, %v3221_v58  ;;  %v9960_v48 = vand.u32 4294901760, %v9574_v49 }
 0x555   :  { %v2923_v11 = vmax.f32 %v2922_v18, 0.0  ;;  %v3185_v18 = vand.u32 4294901760, %v9526_v52  ;;  %v9533_v12 = vpack.c.bf16 %v3180_v51, %v3173_v8  ;;  %v9959_v8 = vand.u32 4294901760, %v9577_v46 }
 0x556   :  { %7771 = vmatpush3.bf16.msra.mxu1 %v9479_v54  ;;  %v9565_v26 = vpack.c.bf16 %v3208_v4, %v3201_v41  ;;  %v3214_v24 = vsub.f32 %v9556_v36, %v9962_v10  ;;  %v9609_v41 = vpack.c.bf16 %v9495_v13, %v9493_v44  ;;  %v9613_v4 = vpack.c.bf16 %v9513_v27, %v9510_v25 }
 0x557   :  { %6541 = vmatmul.mubr.f32.vlgmr.msra.gmra.mrb[6].mxu0 %v2923_v11  ;;  %7772 = vmatprep.subr.bf16.mxu1 %v8317_v0  ;;  %v9965_v11 = vand.u32 4294901760, %v9529_v38  ;;  %v3186_v14 = vsub.f32 %v9526_v52, %v3185_v18  ;;  %v3235_v50 = vsub.f32 %v9577_v46, %v9959_v8  ;;  %v9621_v58 = vpack.c.bf16 %v9542_v40, %v9539_v62 }
 0x558   :  { %7897 = vmatpush3.bf16.msra.mxu0 %v9408_v19  ;;  %6785 = vmatprep.mubr.msk.f32.mxu0 %vm8318_vm0, %v8319_v1  ;;  %v3215_v32 = vand.u32 4294901760, %v3214_v24  ;;  %v9617_v24 = vpack.c.bf16 %v9529_v38, %v9526_v52  ;;  %v9644_v47 = vsub.f32 %v9398_v15, %v3050_v43  ;;  %v7854_v44 = vpack.c.bf16 %v3178_v34, %v3171_v33 }
 0x559   :  { %7898 = vmatprep.subr.bf16.mxu0 %v8317_v0  ;;  %v3193_v61 = vsub.f32 %v9529_v38, %v9965_v11  ;;  %v3187_v35 = vand.u32 4294901760, %v3186_v14  ;;  %v3228_v14 = vsub.f32 %v9574_v49, %v9960_v48  ;;  %v9983_v13 = vand.u32 4294901760, %v9529_v38 }
 0x55a   :  { %7774 = vmatpush3.bf16.msra.mxu1 %v9490_v9  ;;  %v9581_v51 = vpack.c.bf16 %v3222_v7, %v3215_v32  ;;  %v9625_v32 = vpack.c.bf16 %v9559_v20, %v9556_v36  ;;  %v9629_v7 = vpack.c.bf16 %v9577_v46, %v9574_v49  ;;  %v3143_v31 = vand.u32 4294901760, %v9644_v47 }
 0x55b   :  { %7775 = vmatprep.subr.bf16.mxu1 %v8317_v0  ;;  %v3194_v59 = vand.u32 4294901760, %v3193_v61  ;;  %v9587_v61 = vsub.f32 %v9481_v42, %v3092_v56  ;;  %v3229_v5 = vand.u32 4294901760, %v3228_v14  ;;  %v9985_v25 = vand.u32 4294901760, %v9542_v40 }
 0x55c   :  { %7900 = vmatpush3.bf16.msra.mxu0 %v9419_v60  ;;  %v3144_v15 = vsub.f32 %v9644_v47, %v3143_v31  ;;  %v9986_v33 = vand.u32 4294901760, %v9556_v36  ;;  %v9987_v34 = vand.u32 4294901760, %v9559_v20  ;;  %v9988_v38 = vand.u32 4294901760, %v9574_v49 }
 0x55d   :  { %7901 = vmatprep.subr.bf16.mxu0 %v8317_v0  ;;  %v9561_v30 = vpack.c.bf16 %v3194_v59, %v3187_v35  ;;  %v9958_v21 = vand.u32 4294901760, %v9587_v61  ;;  %v9957_v35 = vand.u32 4294901760, %v9590_v45  ;;  %v3236_v59 = vand.u32 4294901760, %v3235_v50  ;;  %v4854_v50 = vld [vmem:[#allocation7 + $0x6] ss:$0 sm:$0xff] }
 0x55e   :  { %v9633_v14 = vpack.c.bf16 %v9590_v45, %v9587_v61  ;;  %v7863_v52 = vpack.c.bf16 %v9987_v34, %v9986_v33  ;;  %v9990_v40 = vand.u32 4294901760, %v9587_v61  ;;  %v4492_v34 = vld [vmem:[#allocation5 + $0x3c0] sm:$0xff] }
 0x55f   :  { %v3242_v16 = vsub.f32 %v9587_v61, %v9958_v21  ;;  %v3249_v42 = vsub.f32 %v9590_v45, %v9957_v35  ;;  %v9603_v17 = vpack.c.bf16 %v3236_v59, %v3229_v5 }
 0x560   :  { %7903 = vmatpush3.bf16.msra.mxu0 %v9431_v6 }
 0x561   :  { %7904 = vmatprep.subr.bf16.mxu0 %v8317_v0  ;;  %v3243_v56 = vand.u32 4294901760, %v3242_v16  ;;  %v3250_v3 = vand.u32 4294901760, %v3249_v42 }
 0x563   :  { %v9605_v29 = vpack.c.bf16 %v3250_v3, %v3243_v56 }
 0x564   :  { %7906 = vmatpush3.bf16.msra.mxu0 %v9443_v63 }
 0x565   :  { %7907 = vmatprep.subr.bf16.mxu0 %v8317_v0 }
 0x568   :  { %7909 = vmatpush3.bf16.msra.mxu0 %v9455_v53 }
 0x569   :  { %7910 = vmatprep.subr.bf16.mxu0 %v8317_v0 }
 0x56c   :  { %7912 = vmatpush3.bf16.msra.mxu0 %v9467_v39 }
 0x56d   :  { %7913 = vmatprep.subr.bf16.mxu0 %v8317_v0 }
 0x570   :  { %7915 = vmatpush3.bf16.msra.mxu0 %v9479_v54 }
 0x571   :  { %7916 = vmatprep.subr.bf16.mxu0 %v8317_v0 }
 0x574   :  { %7918 = vmatpush3.bf16.msra.mxu0 %v9490_v9 }
 0x575   :  { %7919 = vmatprep.subr.bf16.mxu0 %v8317_v0 }
 0x62a   :  { %v3011_v5 = vpop.f32.mrb[6].mxu0 }
 0x62b   :  { %v3012_v59 = vadd.f32 %v4854_v50, %v3011_v5  ;;  %v6542_v16 = vpop.f32.mrb[7].mxu0  ;;  %v9649_v50 = vsub.f32 %v9400_v23, %v3053_v55 }
 0x62d   :  { %v9635_v42 = vmax.f32 %v3012_v59, 0.0 }
 0x62f   :  { %v3018_v56 = vrot.slane %v9635_v42, 4  ;;  %v3025_v3 = vmul.f32 %v9635_v42, %v9635_v42 }
 0x631   :  { %v3019_v35 = vadd.f32 %v3018_v56, %v9635_v42  ;;  %v3026_v21 = vrot.slane %v3025_v3, 4  ;;  %v3150_v56 = vand.u32 4294901760, %v9649_v50 }
 0x633   :  { %v3020_v8 = vrot.slane %v3019_v35, 2  ;;  %v3027_v48 = vadd.f32 %v3026_v21, %v3025_v3  ;;  %v3151_v23 = vsub.f32 %v9649_v50, %v3150_v56 }
 0x635   :  { %v3021_v5 = vadd.f32 %v3020_v8, %v3019_v35  ;;  %v3028_v59 = vrot.slane %v3027_v48, 2  ;;  %v3145_v35 = vand.u32 4294901760, %v3144_v15 }
 0x637   :  { %v3022_v16 = vrot.slane %v3021_v5, 1  ;;  %v3029_v10 = vadd.f32 %v3028_v59, %v3027_v48 }
 0x639   :  { %v3023_v22 = vadd.f32 %v3022_v16, %v3021_v5  ;;  %v3030_v21 = vrot.slane %v3029_v10, 1  ;;  %v3152_v5 = vand.u32 4294901760, %v3151_v23 }
 0x63b   :  { %v3024_v3 = vmul.f32 0.125, %v3023_v22  ;;  %v3031_v11 = vadd.f32 %v3030_v21, %v3029_v10  ;;  %v7776_v21 = vpack.c.bf16 %v3152_v5, %v3145_v35 }
 0x63d   :  { %v9659_v43 = vand.u32 4294901760, %v3024_v3  ;;  %v3032_v55 = vmul.f32 0.125, %v3031_v11 }
 0x63f   :  { %v9662_v48 = vsub.f32 %v3024_v3, %v9659_v43  ;;  %v9664_v8 = vand.u32 4294901760, %v3032_v55 }
 0x641   :  { %v3132_v22 = vand.u32 4294901760, %v9662_v48  ;;  %v9668_v10 = vsub.f32 %v3032_v55, %v9664_v8 }
 0x643   :  { %v3133_v59 = vsub.f32 %v9662_v48, %v3132_v22  ;;  %v3773_v16 = vand.u32 4294901760, %v9668_v10 }
 0x645   :  { %v3134_v11 = vand.u32 4294901760, %v3133_v59  ;;  %v3774_v3 = vsub.f32 %v9668_v10, %v3773_v16 }
 0x647   :  { %6576 = vmatmul.mubr.f32.vlgmr.msra.gmra.mrb[6].mxu1 %v3134_v11  ;;  %v3775_v15 = vand.u32 4294901760, %v3774_v3 }
 0x648   :  { %7777 = vmatpush3.bf16.msra.mxu1 %v7776_v21  ;;  %6610 = vmatprep.mubr.msk.f32.mxu1 %vm8318_vm0, %v8319_v1 }
 0x649   :  { %6786 = vmatmul.mubr.f32.vlgmr.msra.gmra.mrb[8].mxu0 %v3775_v15  ;;  %7778 = vmatprep.subr.bf16.mxu1 %v8317_v0 }
 0x64a   :  { %7921 = vmatpush3.bf16.msra.mxu0 %v7776_v21  ;;  %6820 = vmatprep.mubr.msk.f32.mxu0 %vm8318_vm0, %v8319_v1  ;;  %v4856_v21 = vld [vmem:[#allocation7 + $0x8] ss:$0 sm:$0xff] }
 0x64b   :  { %7922 = vmatprep.subr.bf16.mxu0 %v8317_v0 }
 0x64c   :  { %7780 = vmatpush3.bf16.msra.mxu1 %v9517_v57 }
 0x64d   :  { %7781 = vmatprep.subr.bf16.mxu1 %v8317_v0 }
 0x64e   :  { %7924 = vmatpush3.bf16.msra.mxu0 %v9517_v57  ;;  %v7800_v57 = vpack.c.bf16 %v9649_v50, %v9644_v47  ;;  %v4363_v47 = vld [vmem:[#allocation5 + $0x330] sm:$0xff] }
 0x64f   :  { %7925 = vmatprep.subr.bf16.mxu0 %v8317_v0 }
 0x650   :  { %7783 = vmatpush3.bf16.msra.mxu1 %v9533_v12 }
 0x651   :  { %7784 = vmatprep.subr.bf16.mxu1 %v8317_v0 }
 0x652   :  { %7927 = vmatpush3.bf16.msra.mxu0 %v9533_v12  ;;  %v7848_v12 = vpack.c.bf16 %v3150_v56, %v3143_v31  ;;  %v9991_v31 = vand.u32 4294901760, %v9590_v45  ;;  %v4367_v45 = vld [vmem:[#allocation5 + $0x350] sm:$0xff] }
 0x653   :  { %7928 = vmatprep.subr.bf16.mxu0 %v8317_v0 }
 0x654   :  { %7786 = vmatpush3.bf16.msra.mxu1 %v9561_v30  ;;  %v7869_v36 = vpack.c.bf16 %v9991_v31, %v9990_v40  ;;  %v4496_v31 = vld [vmem:[#allocation5 + $0x3e0] sm:$0xff] }
 0x655   :  { %7787 = vmatprep.subr.bf16.mxu1 %v8317_v0 }
 0x656   :  { %7930 = vmatpush3.bf16.msra.mxu0 %v9561_v30  ;;  %v7851_v30 = vpack.c.bf16 %v3164_v28, %v3157_v2  ;;  %v7857_v2 = vpack.c.bf16 %v9983_v13, %v3185_v18  ;;  %v9984_v28 = vand.u32 4294901760, %v9539_v62  ;;  %v9989_v18 = vand.u32 4294901760, %v9577_v46  ;;  %v4365_v46 = vld [vmem:[#allocation5 + $0x340] sm:$0xff] }
 0x657   :  { %7931 = vmatprep.subr.bf16.mxu0 %v8317_v0 }
 0x658   :  { %7789 = vmatpush3.bf16.msra.mxu1 %v9565_v26  ;;  %v7860_v27 = vpack.c.bf16 %v9985_v25, %v9984_v28  ;;  %v7866_v62 = vpack.c.bf16 %v9989_v18, %v9988_v38  ;;  %v4490_v25 = vld [vmem:[#allocation5 + $0x3b0] sm:$0xff] }
 0x659   :  { %7790 = vmatprep.subr.bf16.mxu1 %v8317_v0  ;;  %v4494_v18 = vld [vmem:[#allocation5 + $0x3d0] sm:$0xff] }
 0x65a   :  { %7933 = vmatpush3.bf16.msra.mxu0 %v9565_v26  ;;  %v4364_v26 = vld [vmem:[#allocation5 + $0x338] sm:$0xff] }
 0x65b   :  { %7934 = vmatprep.subr.bf16.mxu0 %v8317_v0  ;;  %v8049_v49 = vpack.c.bf16 %v4364_v26, %v4363_v47 }
 0x65c   :  { %7792 = vmatpush3.bf16.msra.mxu1 %v9581_v51 }
 0x65d   :  { %7793 = vmatprep.subr.bf16.mxu1 %v8317_v0 }
 0x65e   :  { %7936 = vmatpush3.bf16.msra.mxu0 %v9581_v51  ;;  %v4366_v51 = vld [vmem:[#allocation5 + $0x348] sm:$0xff] }
 0x65f   :  { %7937 = vmatprep.subr.bf16.mxu0 %v8317_v0  ;;  %v8052_v61 = vpack.c.bf16 %v4366_v51, %v4365_v46 }
 0x660   :  { %7795 = vmatpush3.bf16.msra.mxu1 %v9603_v17 }
 0x661   :  { %7796 = vmatprep.subr.bf16.mxu1 %v8317_v0 }
 0x662   :  { %7939 = vmatpush3.bf16.msra.mxu0 %v9603_v17  ;;  %v4368_v17 = vld [vmem:[#allocation5 + $0x358] sm:$0xff] }
 0x663   :  { %7940 = vmatprep.subr.bf16.mxu0 %v8317_v0 }
 0x664   :  { %7798 = vmatpush3.bf16.msra.mxu1 %v9605_v29 }
 0x665   :  { %7799 = vmatprep.subr.bf16.mxu1 %v8317_v0 }
 0x666   :  { %7942 = vmatpush3.bf16.msra.mxu0 %v9605_v29  ;;  %v8055_v29 = vpack.c.bf16 %v4368_v17, %v4367_v45 }
 0x667   :  { %6611 = vmatmul.mubr.f32.vlgmr.msra.gmra.mrb[6].mxu1 %v9659_v43  ;;  %7943 = vmatprep.subr.bf16.mxu0 %v8317_v0 }
 0x668   :  { %7801 = vmatpush3.bf16.msra.mxu1 %v7800_v57  ;;  %6645 = vmatprep.mubr.msk.f32.mxu1 %vm8318_vm0, %v8319_v1 }
 0x669   :  { %6821 = vmatmul.mubr.f32.vlgmr.msra.gmra.mrb[8].mxu0 %v9664_v8  ;;  %7802 = vmatprep.subr.bf16.mxu1 %v8317_v0 }
 0x66a   :  { %7945 = vmatpush3.bf16.msra.mxu0 %v7800_v57  ;;  %6855 = vmatprep.mubr.msk.f32.mxu0 %vm8318_vm0, %v8319_v1  ;;  %v4484_v57 = vld [vmem:[#allocation5 + $0x380] sm:$0xff] }
 0x66b   :  { %7946 = vmatprep.subr.bf16.mxu0 %v8317_v0 }
 0x66c   :  { %7804 = vmatpush3.bf16.msra.mxu1 %v9609_v41 }
 0x66d   :  { %7805 = vmatprep.subr.bf16.mxu1 %v8317_v0 }
 0x66e   :  { %7948 = vmatpush3.bf16.msra.mxu0 %v9609_v41  ;;  %v4369_v41 = vld [vmem:[#allocation5 + $0x360] sm:$0xff] }
 0x66f   :  { %7949 = vmatprep.subr.bf16.mxu0 %v8317_v0 }
 0x670   :  { %7807 = vmatpush3.bf16.msra.mxu1 %v9613_v4 }
 0x671   :  { %7808 = vmatprep.subr.bf16.mxu1 %v8317_v0 }
 0x672   :  { %7951 = vmatpush3.bf16.msra.mxu0 %v9613_v4  ;;  %v4370_v4 = vld [vmem:[#allocation5 + $0x368] sm:$0xff] }
 0x673   :  { %7952 = vmatprep.subr.bf16.mxu0 %v8317_v0 }
 0x674   :  { %7810 = vmatpush3.bf16.msra.mxu1 %v9617_v24 }
 0x675   :  { %7811 = vmatprep.subr.bf16.mxu1 %v8317_v0 }
 0x676   :  { %7954 = vmatpush3.bf16.msra.mxu0 %v9617_v24  ;;  %v8058_v24 = vpack.c.bf16 %v4370_v4, %v4369_v41 }
 0x677   :  { %7955 = vmatprep.subr.bf16.mxu0 %v8317_v0 }
 0x678   :  { %7813 = vmatpush3.bf16.msra.mxu1 %v9621_v58 }
 0x679   :  { %7814 = vmatprep.subr.bf16.mxu1 %v8317_v0 }
 0x67a   :  { %7957 = vmatpush3.bf16.msra.mxu0 %v9621_v58  ;;  %v4371_v58 = vld [vmem:[#allocation5 + $0x370] sm:$0xff] }
 0x67b   :  { %7958 = vmatprep.subr.bf16.mxu0 %v8317_v0 }
 0x67c   :  { %7816 = vmatpush3.bf16.msra.mxu1 %v9625_v32 }
 0x67d   :  { %7817 = vmatprep.subr.bf16.mxu1 %v8317_v0 }
 0x67e   :  { %7960 = vmatpush3.bf16.msra.mxu0 %v9625_v32  ;;  %v4372_v32 = vld [vmem:[#allocation5 + $0x378] sm:$0xff] }
 0x67f   :  { %7961 = vmatprep.subr.bf16.mxu0 %v8317_v0 }
 0x680   :  { %7819 = vmatpush3.bf16.msra.mxu1 %v9629_v7 }
 0x681   :  { %7820 = vmatprep.subr.bf16.mxu1 %v8317_v0 }
 0x682   :  { %7963 = vmatpush3.bf16.msra.mxu0 %v9629_v7  ;;  %v8061_v7 = vpack.c.bf16 %v4372_v32, %v4371_v58 }
 0x683   :  { %7964 = vmatprep.subr.bf16.mxu0 %v8317_v0 }
 0x684   :  { %7822 = vmatpush3.bf16.msra.mxu1 %v9633_v14 }
 0x685   :  { %7823 = vmatprep.subr.bf16.mxu1 %v8317_v0 }
 0x686   :  { %7966 = vmatpush3.bf16.msra.mxu0 %v9633_v14 }
 0x687   :  { %6646 = vmatmul.mubr.f32.vlgmr.msra.gmra.mrb[6].mxu1 %v9662_v48  ;;  %7967 = vmatprep.subr.bf16.mxu0 %v8317_v0 }
 0x688   :  { %7825 = vmatpush3.bf16.msra.mxu1 %v9408_v19  ;;  %6680 = vmatprep.mubr.msk.f32.mxu1 %vm8318_vm0, %v8319_v1 }
 0x689   :  { %6856 = vmatmul.mubr.f32.vlgmr.msra.gmra.mrb[8].mxu0 %v9668_v10  ;;  %7826 = vmatprep.subr.bf16.mxu1 %v8317_v0 }
 0x68a   :  { %7969 = vmatpush3.bf16.msra.mxu0 %v9408_v19  ;;  %6890 = vmatprep.mubr.msk.f32.mxu0 %vm8318_vm0, %v8319_v1 }
 0x68b   :  { %7970 = vmatprep.subr.bf16.mxu0 %v8317_v0 }
 0x68c   :  { %7828 = vmatpush3.bf16.msra.mxu1 %v9419_v60 }
 0x68d   :  { %7829 = vmatprep.subr.bf16.mxu1 %v8317_v0 }
 0x68e   :  { %7972 = vmatpush3.bf16.msra.mxu0 %v9419_v60 }
 0x68f   :  { %7973 = vmatprep.subr.bf16.mxu0 %v8317_v0 }
 0x690   :  { %7831 = vmatpush3.bf16.msra.mxu1 %v9431_v6 }
 0x691   :  { %7832 = vmatprep.subr.bf16.mxu1 %v8317_v0 }
 0x692   :  { %7975 = vmatpush3.bf16.msra.mxu0 %v9431_v6 }
 0x693   :  { %7976 = vmatprep.subr.bf16.mxu0 %v8317_v0 }
 0x694   :  { %7834 = vmatpush3.bf16.msra.mxu1 %v9443_v63 }
 0x695   :  { %7835 = vmatprep.subr.bf16.mxu1 %v8317_v0 }
 0x696   :  { %7978 = vmatpush3.bf16.msra.mxu0 %v9443_v63 }
 0x697   :  { %7979 = vmatprep.subr.bf16.mxu0 %v8317_v0 }
 0x698   :  { %7837 = vmatpush3.bf16.msra.mxu1 %v9455_v53 }
 0x699   :  { %7838 = vmatprep.subr.bf16.mxu1 %v8317_v0 }
 0x69a   :  { %7981 = vmatpush3.bf16.msra.mxu0 %v9455_v53 }
 0x69b   :  { %7982 = vmatprep.subr.bf16.mxu0 %v8317_v0 }
 0x69c   :  { %7840 = vmatpush3.bf16.msra.mxu1 %v9467_v39 }
 0x69d   :  { %7841 = vmatprep.subr.bf16.mxu1 %v8317_v0 }
 0x69e   :  { %7984 = vmatpush3.bf16.msra.mxu0 %v9467_v39 }
 0x69f   :  { %7985 = vmatprep.subr.bf16.mxu0 %v8317_v0 }
 0x6a0   :  { %7843 = vmatpush3.bf16.msra.mxu1 %v9479_v54 }
 0x6a1   :  { %7844 = vmatprep.subr.bf16.mxu1 %v8317_v0 }
 0x6a2   :  { %7987 = vmatpush3.bf16.msra.mxu0 %v9479_v54 }
 0x6a3   :  { %7988 = vmatprep.subr.bf16.mxu0 %v8317_v0 }
 0x6a4   :  { %7846 = vmatpush3.bf16.msra.mxu1 %v9490_v9 }
 0x6a5   :  { %7847 = vmatprep.subr.bf16.mxu1 %v8317_v0 }
 0x6a6   :  { %7990 = vmatpush3.bf16.msra.mxu0 %v9490_v9 }
 0x6a7   :  { %6681 = vmatmul.mubr.f32.vlgmr.msra.gmra.mrb[6].mxu1 %v3132_v22  ;;  %7991 = vmatprep.subr.bf16.mxu0 %v8317_v0  ;;  %v4855_v22 = vld [vmem:[#allocation7 + $0x7] ss:$0 sm:$0xff] }
 0x6a8   :  { %7849 = vmatpush3.bf16.msra.mxu1 %v7848_v12  ;;  %6715 = vmatprep.mubr.msk.f32.mxu1 %vm8318_vm0, %v8319_v1 }
 0x6a9   :  { %6891 = vmatmul.mubr.f32.vlgmr.msra.gmra.mrb[8].mxu0 %v3773_v16  ;;  %7850 = vmatprep.subr.bf16.mxu1 %v8317_v0 }
 0x6aa   :  { %7993 = vmatpush3.bf16.msra.mxu0 %v7848_v12  ;;  %6925 = vmatprep.mubr.msk.f32.mxu0 %vm8318_vm0, %v8319_v1  ;;  %v4485_v12 = vld [vmem:[#allocation5 + $0x388] sm:$0xff] }
 0x6ab   :  { %7994 = vmatprep.subr.bf16.mxu0 %v8317_v0 }
 0x6ac   :  { %7852 = vmatpush3.bf16.msra.mxu1 %v7851_v30 }
 0x6ad   :  { %7853 = vmatprep.subr.bf16.mxu1 %v8317_v0 }
 0x6ae   :  { %7996 = vmatpush3.bf16.msra.mxu0 %v7851_v30  ;;  %v8064_v30 = vpack.c.bf16 %v4485_v12, %v4484_v57  ;;  %v4615_v57 = vld [vmem:[#allocation5 + $0x420] sm:$0xff]  ;;  %v4616_v12 = vld [vmem:[#allocation5 + $0x428] sm:$0xff] }
 0x6af   :  { %7997 = vmatprep.subr.bf16.mxu0 %v8317_v0 }
 0x6b0   :  { %7855 = vmatpush3.bf16.msra.mxu1 %v7854_v44 }
 0x6b1   :  { %7856 = vmatprep.subr.bf16.mxu1 %v8317_v0 }
 0x6b2   :  { %7999 = vmatpush3.bf16.msra.mxu0 %v7854_v44  ;;  %v4487_v44 = vld [vmem:[#allocation5 + $0x398] sm:$0xff] }
 0x6b3   :  { %8000 = vmatprep.subr.bf16.mxu0 %v8317_v0 }
 0x6b4   :  { %7858 = vmatpush3.bf16.msra.mxu1 %v7857_v2 }
 0x6b5   :  { %7859 = vmatprep.subr.bf16.mxu1 %v8317_v0 }
 0x6b6   :  { %8002 = vmatpush3.bf16.msra.mxu0 %v7857_v2  ;;  %v4489_v2 = vld [vmem:[#allocation5 + $0x3a8] sm:$0xff] }
 0x6b7   :  { %8003 = vmatprep.subr.bf16.mxu0 %v8317_v0 }
 0x6b8   :  { %7861 = vmatpush3.bf16.msra.mxu1 %v7860_v27 }
 0x6b9   :  { %7862 = vmatprep.subr.bf16.mxu1 %v8317_v0 }
 0x6ba   :  { %8005 = vmatpush3.bf16.msra.mxu0 %v7860_v27  ;;  %v4491_v27 = vld [vmem:[#allocation5 + $0x3b8] sm:$0xff] }
 0x6bb   :  { %8006 = vmatprep.subr.bf16.mxu0 %v8317_v0  ;;  %v8073_v33 = vpack.c.bf16 %v4491_v27, %v4490_v25  ;;  %v4622_v25 = vld [vmem:[#allocation5 + $0x458] sm:$0xff] }
 0x6bc   :  { %7864 = vmatpush3.bf16.msra.mxu1 %v7863_v52 }
 0x6bd   :  { %7865 = vmatprep.subr.bf16.mxu1 %v8317_v0 }
 0x6be   :  { %8008 = vmatpush3.bf16.msra.mxu0 %v7863_v52  ;;  %v4493_v52 = vld [vmem:[#allocation5 + $0x3c8] sm:$0xff] }
 0x6bf   :  { %8009 = vmatprep.subr.bf16.mxu0 %v8317_v0  ;;  %v8076_v38 = vpack.c.bf16 %v4493_v52, %v4492_v34  ;;  %v4624_v34 = vld [vmem:[#allocation5 + $0x468] sm:$0xff] }
 0x6c0   :  { %7867 = vmatpush3.bf16.msra.mxu1 %v7866_v62 }
 0x6c1   :  { %7868 = vmatprep.subr.bf16.mxu1 %v8317_v0 }
 0x6c2   :  { %8011 = vmatpush3.bf16.msra.mxu0 %v7866_v62  ;;  %v4495_v62 = vld [vmem:[#allocation5 + $0x3d8] sm:$0xff] }
 0x6c3   :  { %8012 = vmatprep.subr.bf16.mxu0 %v8317_v0  ;;  %v8079_v40 = vpack.c.bf16 %v4495_v62, %v4494_v18  ;;  %v4626_v18 = vld [vmem:[#allocation5 + $0x478] sm:$0xff] }
 0x6c4   :  { %7870 = vmatpush3.bf16.msra.mxu1 %v7869_v36 }
 0x6c5   :  { %7871 = vmatprep.subr.bf16.mxu1 %v8317_v0 }
 0x6c6   :  { %8014 = vmatpush3.bf16.msra.mxu0 %v7869_v36  ;;  %v4497_v36 = vld [vmem:[#allocation5 + $0x3e8] sm:$0xff] }
 0x6c7   :  { %6716 = vmatmul.mubr.f32.vlgmr.msra.gmra.mrb[6].mxu1 %v9659_v43  ;;  %8015 = vmatprep.subr.bf16.mxu0 %v8317_v0 }
 0x6c8   :  { %7873 = vmatpush3.bf16.msra.mxu1 %v9408_v19  ;;  %6750 = vmatprep.mubr.msk.f32.mxu1 %vm8318_vm0, %v8319_v1 }
 0x6c9   :  { %6926 = vmatmul.mubr.f32.vlgmr.msra.gmra.mrb[8].mxu0 %v9664_v8  ;;  %7874 = vmatprep.subr.bf16.mxu1 %v8317_v0 }
 0x6ca   :  { %8017 = vmatpush3.bf16.msra.mxu0 %v9408_v19  ;;  %6960 = vmatprep.mubr.msk.f32.mxu0 %vm8318_vm0, %v8319_v1  ;;  %v4357_v19 = vld [vmem:[#allocation5 + $0x300] sm:$0xff] }
 0x6cb   :  { %8018 = vmatprep.subr.bf16.mxu0 %v8317_v0 }
 0x6cc   :  { %7876 = vmatpush3.bf16.msra.mxu1 %v9419_v60 }
 0x6cd   :  { %7877 = vmatprep.subr.bf16.mxu1 %v8317_v0 }
 0x6ce   :  { %8020 = vmatpush3.bf16.msra.mxu0 %v9419_v60  ;;  %v4358_v60 = vld [vmem:[#allocation5 + $0x308] sm:$0xff] }
 0x6cf   :  { %8021 = vmatprep.subr.bf16.mxu0 %v8317_v0 }
 0x6d0   :  { %7879 = vmatpush3.bf16.msra.mxu1 %v9431_v6 }
 0x6d1   :  { %7880 = vmatprep.subr.bf16.mxu1 %v8317_v0 }
 0x6d2   :  { %8023 = vmatpush3.bf16.msra.mxu0 %v9431_v6  ;;  %v8040_v6 = vpack.c.bf16 %v4358_v60, %v4357_v19  ;;  %v8082_v19 = vpack.c.bf16 %v4497_v36, %v4496_v31  ;;  %v4498_v60 = vld [vmem:[#allocation5 + $0x3f0] sm:$0xff] }
 0x6d3   :  { %8024 = vmatprep.subr.bf16.mxu0 %v8317_v0 }
 0x6d4   :  { %7882 = vmatpush3.bf16.msra.mxu1 %v9443_v63 }
 0x6d5   :  { %7883 = vmatprep.subr.bf16.mxu1 %v8317_v0 }
 0x6d6   :  { %8026 = vmatpush3.bf16.msra.mxu0 %v9443_v63  ;;  %v4359_v63 = vld [vmem:[#allocation5 + $0x310] sm:$0xff] }
 0x6d7   :  { %8027 = vmatprep.subr.bf16.mxu0 %v8317_v0 }
 0x6d8   :  { %7885 = vmatpush3.bf16.msra.mxu1 %v9455_v53 }
 0x6d9   :  { %7886 = vmatprep.subr.bf16.mxu1 %v8317_v0 }
 0x6da   :  { %8029 = vmatpush3.bf16.msra.mxu0 %v9455_v53  ;;  %v4360_v53 = vld [vmem:[#allocation5 + $0x318] sm:$0xff] }
 0x6db   :  { %8030 = vmatprep.subr.bf16.mxu0 %v8317_v0 }
 0x6dc   :  { %7888 = vmatpush3.bf16.msra.mxu1 %v9467_v39 }
 0x6dd   :  { %7889 = vmatprep.subr.bf16.mxu1 %v8317_v0 }
 0x6de   :  { %8032 = vmatpush3.bf16.msra.mxu0 %v9467_v39  ;;  %v8043_v39 = vpack.c.bf16 %v4360_v53, %v4359_v63  ;;  %v4857_v53 = vld [vmem:[#allocation7 + $0x9] ss:$0 sm:$0xff] }
 0x6df   :  { %8033 = vmatprep.subr.bf16.mxu0 %v8317_v0 }
 0x6e0   :  { %7891 = vmatpush3.bf16.msra.mxu1 %v9479_v54 }
 0x6e1   :  { %7892 = vmatprep.subr.bf16.mxu1 %v8317_v0 }
 0x6e2   :  { %8035 = vmatpush3.bf16.msra.mxu0 %v9479_v54  ;;  %v4361_v54 = vld [vmem:[#allocation5 + $0x320] sm:$0xff] }
 0x6e3   :  { %8036 = vmatprep.subr.bf16.mxu0 %v8317_v0 }
 0x6e4   :  { %7894 = vmatpush3.bf16.msra.mxu1 %v9490_v9 }
 0x6e5   :  { %8039 = vmatprep.subr.bf16.mxu1 %v8317_v0 }
 0x6e6   :  { %8038 = vmatpush3.bf16.msra.mxu0 %v9490_v9  ;;  %v4362_v9 = vld [vmem:[#allocation5 + $0x328] sm:$0xff] }
 0x6e7   :  { %6751 = vmatmul.mubr.f32.vlgmr.msra.gmra.mrb[6].mxu1 %v9659_v43  ;;  %8063 = vmatprep.subr.bf16.mxu0 %v8317_v0  ;;  %v8046_v20 = vpack.c.bf16 %v4362_v9, %v4361_v54 }
 0x6e8   :  { %8041 = vmatpush3.bf16.msra.mxu1 %v8040_v6  ;;  %6995 = vmatprep.mubr.msk.f32.mxu1 %vm8318_vm0, %v8319_v1  ;;  %v4499_v6 = vld [vmem:[#allocation5 + $0x3f8] sm:$0xff] }
 0x6e9   :  { %6961 = vmatmul.mubr.f32.vlgmr.msra.gmra.mrb[8].mxu0 %v9664_v8  ;;  %8042 = vmatprep.subr.bf16.mxu1 %v8317_v0  ;;  %v8085_v63 = vpack.c.bf16 %v4499_v6, %v4498_v60 }
 0x6ea   :  { %7030 = vmatprep.mubr.msk.f32.mxu0 %vm8318_vm0, %v8319_v1  ;;  %8065 = vmatpush3.bf16.msra.mxu0 %v8064_v30  ;;  %v8094_v30 = vpack.c.bf16 %v4616_v12, %v4615_v57  ;;  %v4747_v57 = vld [vmem:[#allocation5 + $0x4c8] sm:$0xff] }
 0x6eb   :  { %8066 = vmatprep.subr.bf16.mxu0 %v8317_v0 }
 0x6ec   :  { %8044 = vmatpush3.bf16.msra.mxu1 %v8043_v39 }
 0x6ed   :  { %8045 = vmatprep.subr.bf16.mxu1 %v8317_v0 }
 0x6f0   :  { %8047 = vmatpush3.bf16.msra.mxu1 %v8046_v20 }
 0x6f1   :  { %8048 = vmatprep.subr.bf16.mxu1 %v8317_v0 }
 0x6f4   :  { %8050 = vmatpush3.bf16.msra.mxu1 %v8049_v49 }
 0x6f5   :  { %8051 = vmatprep.subr.bf16.mxu1 %v8317_v0 }
 0x6f8   :  { %8053 = vmatpush3.bf16.msra.mxu1 %v8052_v61 }
 0x6f9   :  { %8054 = vmatprep.subr.bf16.mxu1 %v8317_v0 }
 0x6fc   :  { %8056 = vmatpush3.bf16.msra.mxu1 %v8055_v29 }
 0x6fd   :  { %8057 = vmatprep.subr.bf16.mxu1 %v8317_v0 }
 0x700   :  { %8059 = vmatpush3.bf16.msra.mxu1 %v8058_v24 }
 0x701   :  { %8060 = vmatprep.subr.bf16.mxu1 %v8317_v0 }
 0x704   :  { %8062 = vmatpush3.bf16.msra.mxu1 %v8061_v7 }
 0x705   :  { %8087 = vmatprep.subr.bf16.mxu1 %v8317_v0 }
 0x7ba   :  { %v3686_v14 = vpop.f32.mrb[6].mxu1 }
 0x7bb   :  { %v4331_v50 = vmul.f32 %v3686_v14, %v3686_v14  ;;  %v6752_v56 = vpop.f32.mrb[7].mxu1  ;;  %v4337_v35 = vrot.slane %v3686_v14, %v8913_v37 }
 0x7bc   :  { %v4327_v23 = vpop.f32.mrb[8].mxu0 }
 0x7bd   :  { %v4332_v43 = vsub.f32 %v4327_v23, %v4331_v50  ;;  %v6962_v55 = vpop.f32.mrb[9].mxu0  ;;  %v4338_v5 = vsub.f32 %v9635_v42, %v4337_v35  ;;  %v4486_v42 = vld [vmem:[#allocation5 + $0x390] sm:$0xff]  ;;  %v4859_v35 = vld [vmem:[#allocation7 + $0xb] ss:$0 sm:$0xff] }
 0x7be   :  { %v8067_v13 = vpack.c.bf16 %v4487_v44, %v4486_v42  ;;  %v4858_v55 = vld [vmem:[#allocation7 + $0xa] ss:$0 sm:$0xff]  ;;  %v4617_v42 = vld [vmem:[#allocation5 + $0x430] sm:$0xff] }
 0x7bf   :  { %v4333_v48 = vmax.f32 %v4332_v43, 0.0  ;;  %v4343_v59 = vmul.f32 %v4855_v22, %v4338_v5 }
 0x7c0   :  { %8068 = vmatpush3.bf16.msra.mxu0 %v8067_v13  ;;  %v4619_v13 = vld [vmem:[#allocation5 + $0x440] sm:$0xff] }
 0x7c1   :  { %v4344_v8 = vadd.f32 1e-05, %v4333_v48  ;;  %8069 = vmatprep.subr.bf16.mxu0 %v8317_v0 }
 0x7c3   :  { %8208 = vrsqrt.f32 %v4344_v8 }
 0x7cd   :  { %v8209_v10 = vpop.eup %8208 }
 0x7ce   :  { %v4349_v16 = vrot.slane %v8209_v10, %v8913_v37  ;;  %v4488_v37 = vld [vmem:[#allocation5 + $0x3a0] sm:$0xff] }
 0x7cf   :  { %v8070_v28 = vpack.c.bf16 %v4489_v2, %v4488_v37  ;;  %v4620_v37 = vld [vmem:[#allocation5 + $0x448] sm:$0xff] }
 0x7d0   :  { %v4350_v11 = vmul.f32 %v4349_v16, %v4343_v59  ;;  %v4611_v59 = vld [vmem:[#allocation5 + $0x400] sm:$0xff]  ;;  %v4612_v16 = vld [vmem:[#allocation5 + $0x408] sm:$0xff]  ;;  %v8100_v2 = vpack.c.bf16 %v4620_v37, %v4619_v13 }
 0x7d1   :  { %8071 = vmatpush3.bf16.msra.mxu0 %v8070_v28  ;;  %v4621_v28 = vld [vmem:[#allocation5 + $0x450] sm:$0xff]  ;;  %v4751_v13 = vld [vmem:[#allocation5 + $0x4e8] sm:$0xff] }
 0x7d2   :  { %v4355_v3 = vadd.f32 %v4856_v21, %v4350_v11  ;;  %8072 = vmatprep.subr.bf16.mxu0 %v8317_v0  ;;  %v8088_v21 = vpack.c.bf16 %v4612_v16, %v4611_v59  ;;  %v4613_v11 = vld [vmem:[#allocation5 + $0x410] sm:$0xff]  ;;  %v8103_v27 = vpack.c.bf16 %v4622_v25, %v4621_v28  ;;  %v4743_v59 = vld [vmem:[#allocation5 + $0x4a8] sm:$0xff]  ;;  %v4753_v28 = vld [vmem:[#allocation5 + $0x4f8] sm:$0xff] }
 0x7d4   :  { %v4356_v15 = vmax.f32 %v4355_v3, 0.0  ;;  %v4614_v3 = vld [vmem:[#allocation5 + $0x418] sm:$0xff] }
 0x7d5   :  { %8074 = vmatpush3.bf16.msra.mxu0 %v8073_v33  ;;  %v4623_v33 = vld [vmem:[#allocation5 + $0x460] sm:$0xff] }
 0x7d6   :  { %6996 = vmatmul.mubr.f32.vlgmr.msra.gmra.mrb[8].mxu1 %v4356_v15  ;;  %8075 = vmatprep.subr.bf16.mxu0 %v8317_v0  ;;  %v8091_v15 = vpack.c.bf16 %v4614_v3, %v4613_v11  ;;  %v8106_v52 = vpack.c.bf16 %v4624_v34, %v4623_v33  ;;  %v4745_v11 = vld [vmem:[#allocation5 + $0x4b8] sm:$0xff] }
 0x7d7   :  { %7065 = vmatprep.mubr.msk.f32.mxu1 %vm8318_vm0, %v8319_v1  ;;  %8089 = vmatpush3.bf16.msra.mxu1 %v8088_v21  ;;  %v4744_v21 = vld [vmem:[#allocation5 + $0x4b0] sm:$0xff] }
 0x7d8   :  { %8090 = vmatprep.subr.bf16.mxu1 %v8317_v0  ;;  %v8121_v3 = vpack.c.bf16 %v4745_v11, %v4744_v21 }
 0x7d9   :  { %8077 = vmatpush3.bf16.msra.mxu0 %v8076_v38  ;;  %v4625_v38 = vld [vmem:[#allocation5 + $0x470] sm:$0xff] }
 0x7da   :  { %8078 = vmatprep.subr.bf16.mxu0 %v8317_v0  ;;  %v8109_v62 = vpack.c.bf16 %v4626_v18, %v4625_v38 }
 0x7db   :  { %8092 = vmatpush3.bf16.msra.mxu1 %v8091_v15  ;;  %v4746_v15 = vld [vmem:[#allocation5 + $0x4c0] sm:$0xff] }
 0x7dc   :  { %8093 = vmatprep.subr.bf16.mxu1 %v8317_v0  ;;  %v8124_v12 = vpack.c.bf16 %v4747_v57, %v4746_v15 }
 0x7dd   :  { %8080 = vmatpush3.bf16.msra.mxu0 %v8079_v40  ;;  %v4860_v40 = vld [vmem:[#allocation7 + $0xc] ss:$0 sm:$0xff] }
 0x7de   :  { %8081 = vmatprep.subr.bf16.mxu0 %v8317_v0 }
 0x7df   :  { %8095 = vmatpush3.bf16.msra.mxu1 %v8094_v30  ;;  %v4748_v30 = vld [vmem:[#allocation5 + $0x4d0] sm:$0xff] }
 0x7e0   :  { %8096 = vmatprep.subr.bf16.mxu1 %v8317_v0 }
 0x7e1   :  { %8083 = vmatpush3.bf16.msra.mxu0 %v8082_v19 }
 0x7e2   :  { %8084 = vmatprep.subr.bf16.mxu0 %v8317_v0 }
 0x7e5   :  { %8086 = vmatpush3.bf16.msra.mxu0 %v8085_v63 }
 0x7e6   :  { %8111 = vmatprep.subr.bf16.mxu0 %v8317_v0 }
 0x8a9   :  { %v4444_v39 = vpop.f32.mrb[8].mxu1 }
 0x8aa   :  { %v4445_v54 = vadd.f32 %v4857_v53, %v4444_v39  ;;  %v6997_v9 = vpop.f32.mrb[9].mxu1 }
 0x8ac   :  { %v4448_v20 = vmax.f32 %v4445_v54, 0.0 }
 0x8ae   :  { %v4451_v47 = vrot.slane %v4448_v20, 4  ;;  %v4458_v26 = vmul.f32 %v4448_v20, %v4448_v20 }
 0x8b0   :  { %v4452_v49 = vadd.f32 %v4451_v47, %v4448_v20  ;;  %v4459_v46 = vrot.slane %v4458_v26, 4 }
 0x8b2   :  { %v4453_v51 = vrot.slane %v4452_v49, 2  ;;  %v4460_v61 = vadd.f32 %v4459_v46, %v4458_v26 }
 0x8b4   :  { %v4454_v45 = vadd.f32 %v4453_v51, %v4452_v49  ;;  %v4461_v17 = vrot.slane %v4460_v61, 2 }
 0x8b6   :  { %v4455_v29 = vrot.slane %v4454_v45, 1  ;;  %v4462_v41 = vadd.f32 %v4461_v17, %v4460_v61 }
 0x8b8   :  { %v4456_v4 = vadd.f32 %v4455_v29, %v4454_v45  ;;  %v4463_v24 = vrot.slane %v4462_v41, 1 }
 0x8ba   :  { %v4457_v58 = vmul.f32 0.125, %v4456_v4  ;;  %v4464_v32 = vadd.f32 %v4463_v24, %v4462_v41 }
 0x8bc   :  { %v4465_v7 = vmul.f32 0.125, %v4464_v32  ;;  %v4466_v14 = vmul.f32 %v4457_v58, %v4457_v58  ;;  %v4469_v43 = vsub.f32 %v4448_v20, %v4457_v58  ;;  %v4861_v32 = vld [vmem:[#allocation7 + $0xd] ss:$0 sm:$0xff] }
 0x8be   :  { %v4467_v50 = vsub.f32 %v4465_v7, %v4466_v14  ;;  %v4474_v48 = vmul.f32 %v4858_v55, %v4469_v43  ;;  %v4738_v55 = vld [vmem:[#allocation5 + $0x480] sm:$0xff] }
 0x8c0   :  { %v4468_v56 = vmax.f32 %v4467_v50, 0.0  ;;  %v4862_v50 = vld [vmem:[#allocation7 + $0xe] ss:$0 sm:$0xff] }
 0x8c2   :  { %v4475_v23 = vadd.f32 1e-05, %v4468_v56 }
 0x8c4   :  { %8210 = vrsqrt.f32 %v4475_v23 }
 0x8ce   :  { %v8211_v8 = vpop.eup %8210 }
 0x8cf   :  { %v4477_v5 = vmul.f32 %v8211_v8, %v4474_v48  ;;  %v4739_v48 = vld [vmem:[#allocation5 + $0x488] sm:$0xff] }
 0x8d0   :  { %v8112_v8 = vpack.c.bf16 %v4739_v48, %v4738_v55 }
 0x8d1   :  { %v4482_v22 = vadd.f32 %v4859_v35, %v4477_v5  ;;  %v4740_v35 = vld [vmem:[#allocation5 + $0x490] sm:$0xff]  ;;  %v4741_v5 = vld [vmem:[#allocation5 + $0x498] sm:$0xff] }
 0x8d3   :  { %v4483_v10 = vmax.f32 %v4482_v22, 0.0  ;;  %v8115_v22 = vpack.c.bf16 %v4741_v5, %v4740_v35 }
 0x8d5   :  { %7031 = vmatmul.mubr.f32.vlgmr.msra.gmra.mrb[10].mxu0 %v4483_v10  ;;  %v4742_v10 = vld [vmem:[#allocation5 + $0x4a0] sm:$0xff] }
 0x8d6   :  { %7100 = vmatprep.mubr.msk.f32.mxu0 %vm8318_vm0, %v8319_v1  ;;  %v4618_v1 = vld [vmem:[#allocation5 + $0x438] sm:$0xff]  ;;  %8113 = vmatpush3.bf16.msra.mxu0 %v8112_v8  ;;  %v8118_v16 = vpack.c.bf16 %v4743_v59, %v4742_v10 }
 0x8d7   :  { %v8097_v44 = vpack.c.bf16 %v4618_v1, %v4617_v42  ;;  %8114 = vmatprep.subr.bf16.mxu0 %v8317_v0  ;;  %v4749_v42 = vld [vmem:[#allocation5 + $0x4d8] sm:$0xff] }
 0x8d8   :  { %v8127_v1 = vpack.c.bf16 %v4749_v42, %v4748_v30 }
 0x8d9   :  { %8098 = vmatpush3.bf16.msra.mxu1 %v8097_v44  ;;  %v4750_v44 = vld [vmem:[#allocation5 + $0x4e0] sm:$0xff] }
 0x8da   :  { %8099 = vmatprep.subr.bf16.mxu1 %v8317_v0  ;;  %8116 = vmatpush3.bf16.msra.mxu0 %v8115_v22  ;;  %v8130_v37 = vpack.c.bf16 %v4751_v13, %v4750_v44 }
 0x8db   :  { %8117 = vmatprep.subr.bf16.mxu0 %v8317_v0 }
 0x8dd   :  { %8101 = vmatpush3.bf16.msra.mxu1 %v8100_v2  ;;  %v4752_v2 = vld [vmem:[#allocation5 + $0x4f0] sm:$0xff] }
 0x8de   :  { %8102 = vmatprep.subr.bf16.mxu1 %v8317_v0  ;;  %8119 = vmatpush3.bf16.msra.mxu0 %v8118_v16  ;;  %v8133_v25 = vpack.c.bf16 %v4753_v28, %v4752_v2 }
 0x8df   :  { %8120 = vmatprep.subr.bf16.mxu0 %v8317_v0 }
 0x8e1   :  { %8104 = vmatpush3.bf16.msra.mxu1 %v8103_v27  ;;  %v4863_v27 = vld [vmem:[#allocation7 + $0xf] ss:$0 sm:$0xff] }
 0x8e2   :  { %8105 = vmatprep.subr.bf16.mxu1 %v8317_v0  ;;  %8122 = vmatpush3.bf16.msra.mxu0 %v8121_v3 }
 0x8e3   :  { %8123 = vmatprep.subr.bf16.mxu0 %v8317_v0 }
 0x8e5   :  { %8107 = vmatpush3.bf16.msra.mxu1 %v8106_v52 }
 0x8e6   :  { %8108 = vmatprep.subr.bf16.mxu1 %v8317_v0  ;;  %8125 = vmatpush3.bf16.msra.mxu0 %v8124_v12 }
 0x8e7   :  { %8126 = vmatprep.subr.bf16.mxu0 %v8317_v0 }
 0x8e9   :  { %8110 = vmatpush3.bf16.msra.mxu1 %v8109_v62 }
 0x8ea   :  { %8128 = vmatpush3.bf16.msra.mxu0 %v8127_v1 }
 0x8eb   :  { %8129 = vmatprep.subr.bf16.mxu0 %v8317_v0 }
 0x8ee   :  { %8131 = vmatpush3.bf16.msra.mxu0 %v8130_v37 }
 0x8ef   :  { %8132 = vmatprep.subr.bf16.mxu0 %v8317_v0 }
 0x8f2   :  { %8134 = vmatpush3.bf16.msra.mxu0 %v8133_v25 }
 0x9a8   :  { %v4571_v31 = vpop.f32.mrb[10].mxu0 }
 0x9a9   :  { %v4572_v36 = vadd.f32 %v4860_v40, %v4571_v31  ;;  %v7032_v19 = vpop.f32.mrb[11].mxu0 }
 0x9ab   :  { %v4575_v60 = vmax.f32 %v4572_v36, 0.0 }
 0x9ad   :  { %v4578_v6 = vrot.slane %v4575_v60, 4  ;;  %v4585_v63 = vmul.f32 %v4575_v60, %v4575_v60 }
 0x9af   :  { %v4579_v53 = vadd.f32 %v4578_v6, %v4575_v60  ;;  %v4586_v39 = vrot.slane %v4585_v63, 4 }
 0x9b1   :  { %v4580_v54 = vrot.slane %v4579_v53, 2  ;;  %v4587_v9 = vadd.f32 %v4586_v39, %v4585_v63 }
 0x9b3   :  { %v4581_v20 = vadd.f32 %v4580_v54, %v4579_v53  ;;  %v4588_v47 = vrot.slane %v4587_v9, 2 }
 0x9b5   :  { %v4582_v26 = vrot.slane %v4581_v20, 1  ;;  %v4589_v49 = vadd.f32 %v4588_v47, %v4587_v9 }
 0x9b7   :  { %v4583_v46 = vadd.f32 %v4582_v26, %v4581_v20  ;;  %v4590_v51 = vrot.slane %v4589_v49, 1 }
 0x9b9   :  { %v4584_v61 = vmul.f32 0.125, %v4583_v46  ;;  %v4591_v45 = vadd.f32 %v4590_v51, %v4589_v49 }
 0x9bb   :  { %v4592_v17 = vmul.f32 0.125, %v4591_v45  ;;  %v4593_v29 = vmul.f32 %v4584_v61, %v4584_v61  ;;  %v4596_v58 = vsub.f32 %v4575_v60, %v4584_v61  ;;  %v4864_v61 = vld [vmem:[#allocation7 + $0x10] ss:$0 sm:$0xff] }
 0x9bd   :  { %v4594_v41 = vsub.f32 %v4592_v17, %v4593_v29  ;;  %v4601_v7 = vmul.f32 %v4861_v32, %v4596_v58  ;;  %v4865_v29 = vld [vmem:[#allocation7 + $0x11] ss:$0 sm:$0xff]  ;;  %v4866_v58 = vld [vmem:[#allocation7 + $0x12] ss:$0 sm:$0xff] }
 0x9bf   :  { %v4595_v4 = vmax.f32 %v4594_v41, 0.0 }
 0x9c1   :  { %v4602_v24 = vadd.f32 1e-05, %v4595_v4 }
 0x9c3   :  { %8212 = vrsqrt.f32 %v4602_v24 }
 0x9cd   :  { %v8213_v14 = vpop.eup %8212 }
 0x9ce   :  { %v4604_v56 = vmul.f32 %v8213_v14, %v4601_v7 }
 0x9d0   :  { %v4609_v23 = vadd.f32 %v4862_v50, %v4604_v56 }
 0x9d2   :  { %v4610_v43 = vmax.f32 %v4609_v23, 0.0 }
 0x9d4   :  { %7066 = vmatmul.mubr.f32.vlgmr.msra.gmra.mrb[10].mxu1 %v4610_v43 }
 0xaa7   :  { %v4698_v33 = vpop.f32.mrb[10].mxu1 }
 0xaa8   :  { %v4699_v34 = vadd.f32 %v4863_v27, %v4698_v33  ;;  %v7067_v52 = vpop.f32.mrb[11].mxu1 }
 0xaaa   :  { %v4702_v38 = vmax.f32 %v4699_v34, 0.0 }
 0xaac   :  { %v4705_v18 = vrot.slane %v4702_v38, 4  ;;  %v4712_v62 = vmul.f32 %v4702_v38, %v4702_v38 }
 0xaae   :  { %v4706_v40 = vadd.f32 %v4705_v18, %v4702_v38  ;;  %v4713_v31 = vrot.slane %v4712_v62, 4 }
 0xab0   :  { %v4707_v36 = vrot.slane %v4706_v40, 2  ;;  %v4714_v19 = vadd.f32 %v4713_v31, %v4712_v62 }
 0xab2   :  { %v4708_v60 = vadd.f32 %v4707_v36, %v4706_v40  ;;  %v4715_v6 = vrot.slane %v4714_v19, 2 }
 0xab4   :  { %v4709_v63 = vrot.slane %v4708_v60, 1  ;;  %v4716_v53 = vadd.f32 %v4715_v6, %v4714_v19 }
 0xab6   :  { %v4710_v39 = vadd.f32 %v4709_v63, %v4708_v60  ;;  %v4717_v54 = vrot.slane %v4716_v53, 1 }
 0xab8   :  { %v4711_v9 = vmul.f32 0.125, %v4710_v39  ;;  %v4718_v0 = vadd.f32 %v4717_v54, %v4716_v53 }
 0xaba   :  { %v4719_v20 = vmul.f32 0.125, %v4718_v0  ;;  %v4720_v47 = vmul.f32 %v4711_v9, %v4711_v9  ;;  %v4723_v51 = vsub.f32 %v4702_v38, %v4711_v9 }
 0xabc   :  { %v4721_v26 = vsub.f32 %v4719_v20, %v4720_v47  ;;  %v4728_v45 = vmul.f32 %v4864_v61, %v4723_v51 }
 0xabe   :  { %v4722_v49 = vmax.f32 %v4721_v26, 0.0 }
 0xac0   :  { %v4729_v46 = vadd.f32 1e-05, %v4722_v49 }
 0xac2   :  { %8214 = vrsqrt.f32 %v4729_v46 }
 0xacc   :  { %v8215_v17 = vpop.eup %8214 }
 0xacd   :  { %v4731_v41 = vmul.f32 %v8215_v17, %v4728_v45 }
 0xacf   :  { %v4736_v4 = vadd.f32 %v4865_v29, %v4731_v41 }
 0xad1   :  { %v4737_v24 = vmax.f32 %v4736_v4, 0.0 }
 0xad3   :  { %7101 = vmatmul.mubr.f32.vlgmr.msra.gmra.mrb[12].mxu0 %v4737_v24 }
 0xba6   :  { %v4825_v32 = vpop.f32.mrb[12].mxu0 }
 0xba7   :  { %v4826_v7 = vadd.f32 %v4866_v58, %v4825_v32  ;;  %v7102_v14 = vpop.f32.mrb[13].mxu0 }
 0xba9   :  { %8216 = vtanh.f32 %v4826_v7 }
 0xbb3   :  { %v8217_v50 = vpop.eup %8216 }
 0xbb4   :  { %4830 = vst [vmem:[#allocation8] sm:$0xff] %v8217_v50 }
 0xbb5   :  { %8295 = shalt.err (!%p8292_p0)
}
 0xbb6   :  { %s8296_s25 = scalar_lea.hbm %s9939_s3, 128 }
 0xbb7   :  { %p8297_p1 = scmp.ne.s32.totalorder %s9939_s3, %s8296_s25  ;;  %p8300_p2 = scmp.lt.u32.totalorder %s8296_s25, %s9939_s3 }
 0xbb9   :  { %p8302_p3 = pnand %p8300_p2, %p8297_p1 }
 0xbbb   :  { %8305 = shalt.err (!%p8302_p3)
}
 0xbbc   :  { %4840 = dma.vmem_to_hbm [thread:$0]  %s4838_s21, 128, %s9939_s3, [#allocation4]  }
 0xbbd   :  { %8310 = dma.done.wait [#allocation4], 128  }
 0xbbe   :  { %8311 = vsyncadd [#allocation4], 4294967168 }
 0xbbf   :  { %4844 = vsyncpa [#allocation3], 1 }
 0xbc0   :  { %4845 = vsyncpa [#allocation6], 1 }
 0xbc1   :  { %4846 = vsyncpa [#allocation4], 1 }

</bundles_post_ra>
